<compile_context>
chip_gen: v7x
topology: tpu7x:2x2x1
jax: 0.10.0
libtpu: 0.0.40
codegen_flags: <defaults>
</compile_context>

<pallas_src>
import math
import functools

import jax
import jax.numpy as jnp
from jax.experimental import pallas as pl
from jax.experimental.pallas import tpu as pltpu

SEQUENCE_LENGTH = 95


# ----------------------------- kernel ---------------------------------------

def _layer_norm_t(x, w, b, eps=1e-5):
    """LayerNorm over the feature axis of a feature-major [D, S] activation."""
    mu = jnp.mean(x, axis=0, keepdims=True)                      # [1, S]
    var = jnp.mean(jnp.square(x - mu), axis=0, keepdims=True)    # [1, S]
    return (x - mu) * jax.lax.rsqrt(var + eps) * w + b           # w, b: [D, 1]


def fused_model_kernel(ids_ref, pe_ref, emb_ref,
                       wqkv_ref, bqkv_ref, wo_ref, bo_ref,
                       ln1w_ref, ln1b_ref, w1_ref, b1_ref,
                       w2_ref, b2_ref, ln2w_ref, ln2b_ref,
                       wout_ref, bout_ref, out_ref,
                       *, nlayers, nhead, d_model):
    """Embedding + PE + `nlayers` encoder layers + flatten + Linear, one batch elem."""
    hd = d_model // nhead
    S = ids_ref.shape[2]
    npad = emb_ref.shape[1]          # padded vocab (multiple of 128)
    tpad = bout_ref.shape[1]         # padded ntoken (multiple of 128)

    # ---- embedding lookup as a one-hot matmul (fused gather) ----------------
    ids = ids_ref[0]                                                   # [1, S] int32
    onehot = (jax.lax.broadcasted_iota(jnp.int32, (npad, S), 0) == ids
              ).astype(jnp.float32)                                    # [Npad, S]
    # table pre-scaled by sqrt(d_model); x is feature-major [D, S]
    x = jnp.dot(emb_ref[...], onehot, preferred_element_type=jnp.float32)
    # positional encoding (reference quirk: pe row = batch index, bcast over seq)
    x = x + pe_ref[0]                                                  # [D, 1]

    for l in range(nlayers):                                           # static unroll
        # ---- multi-head self-attention (feature-major) ----------------------
        xb = x.astype(jnp.bfloat16)
        qkv = jnp.dot(wqkv_ref[l], xb,
                      preferred_element_type=jnp.float32) + bqkv_ref[l]   # [3D, S]
        # Q rows were pre-scaled by 1/sqrt(head_dim) at init.
        q = qkv[0:d_model].reshape(nhead, hd, S)                       # [H, hd, S]
        k = qkv[d_model:2 * d_model].reshape(nhead, hd, S)
        v = qkv[2 * d_model:3 * d_model].reshape(nhead, hd, S)

        # scores[h, i, j] = sum_d q[h, d, i] * k[h, d, j]               -> [H, S, S]
        scores = jax.lax.dot_general(q, k, (((1,), (1,)), ((0,), (0,))),
                                     preferred_element_type=jnp.float32)
        scores = scores - jnp.max(scores, axis=-1, keepdims=True)
        p = jnp.exp(scores)
        p = p * pl.reciprocal(jnp.sum(p, axis=-1, keepdims=True), approx=True)

        # o[h, d, i] = sum_j v[h, d, j] * p[h, i, j]                    -> [H, hd, S]
        o = jax.lax.dot_general(v, p, (((2,), (2,)), ((0,), (0,))),
                                preferred_element_type=jnp.float32)
        o = o.reshape(d_model, S)                                      # concat heads [D, S]

        attn = jnp.dot(wo_ref[l], o.astype(jnp.bfloat16),
                       preferred_element_type=jnp.float32) + bo_ref[l]  # [D, S]
        x = _layer_norm_t(x + attn, ln1w_ref[l], ln1b_ref[l])

        # ---- feed-forward ---------------------------------------------------
        xb = x.astype(jnp.bfloat16)
        h = jnp.maximum(
            jnp.dot(w1_ref[l], xb, preferred_element_type=jnp.float32) + b1_ref[l],
            0.0)                                                        # [d_hid, S]
        ff = jnp.dot(w2_ref[l], h.astype(jnp.bfloat16),
                     preferred_element_type=jnp.float32) + b2_ref[l]    # [D, S]
        x = _layer_norm_t(x + ff, ln2w_ref[l], ln2b_ref[l])

    # ---- flatten (view(-1, S*D)) + output Linear, fused ----------------------
    # wout[s, d'*Tp + t] = W_out[t, s*D + d'], so
    #   P[d, d'*Tp + t] = sum_s x[d, s] * W_out[t, s*D + d']
    # and logits[t] = b[t] + sum_d P[d, d*Tp + t]  (block-diagonal reduction).
    P = jnp.dot(x.astype(jnp.bfloat16), wout_ref[...],
                preferred_element_type=jnp.float32)                     # [D, D*Tp]
    acc = bout_ref[...]                                                 # [1, Tp]
    for d in range(d_model):
        acc = acc + P[d:d + 1, d * tpad:(d + 1) * tpad]
    out_ref[0] = acc                                                    # lane-dense row


# ----------------------------- wrapper ---------------------------------------

def _full_spec(shape):
    """Whole-array block, identical for every grid step (weights)."""
    zeros = (0,) * len(shape)
    return pl.BlockSpec(shape, lambda *_, z=zeros: z)


def transformer_model_forward(src, params):
    """src: int32 [batch, SEQUENCE_LENGTH]  ->  float32 [batch, ntoken]."""
    B, S = src.shape
    D = params['d_model']
    L = params['nlayers']
    H = params['nhead']
    dh = params['d_hid']
    npad = params['emb_t'].shape[1]
    tpad = params['out_b'].shape[1]
    lp = params['layers']

    ids = src.reshape(B, 1, S).astype(jnp.int32)   # 3-D so the block is full-dim in last 2 axes

    kernel = functools.partial(fused_model_kernel, nlayers=L, nhead=H, d_model=D)

    logits_pad = pl.pallas_call(
        kernel,
        out_shape=jax.ShapeDtypeStruct((B, 1, tpad), jnp.float32),
        grid=(B,),
        in_specs=[
            pl.BlockSpec((1, 1, S), lambda b: (b, 0, 0)),     # token ids, one batch row
            pl.BlockSpec((1, D, 1), lambda b: (b, 0, 0)),     # pe row b (reference quirk)
            _full_spec((D, npad)),                            # embedding^T (f32, *sqrt(D) folded)
            _full_spec((L, 3 * D, D)),                        # in_proj weight (bf16, Q pre-scaled)
            _full_spec((L, 3 * D, 1)),                        # in_proj bias (f32)
            _full_spec((L, D, D)),                            # out_proj weight (bf16)
            _full_spec((L, D, 1)),                            # out_proj bias (f32)
            _full_spec((L, D, 1)), _full_spec((L, D, 1)),     # ln1 w, b
            _full_spec((L, dh, D)), _full_spec((L, dh, 1)),   # W1 (bf16), b1
            _full_spec((L, D, dh)), _full_spec((L, D, 1)),    # W2 (bf16), b2
            _full_spec((L, D, 1)), _full_spec((L, D, 1)),     # ln2 w, b
            _full_spec((S, D * tpad)),                        # fused output weight (bf16)
            _full_spec((1, tpad)),                            # output bias (f32, padded)
        ],
        out_specs=pl.BlockSpec((1, 1, tpad), lambda b: (b, 0, 0)),
        compiler_params=pltpu.CompilerParams(dimension_semantics=("parallel",)),
    )(ids, params['pe_t'], params['emb_t'],
      lp['wqkv'], lp['bqkv'], lp['wo'], lp['bo'],
      lp['ln1w'], lp['ln1b'], lp['w1'], lp['b1'],
      lp['w2'], lp['b2'], lp['ln2w'], lp['ln2b'],
      params['out_w'], params['out_b'])

    return logits_pad[:, 0, :params['ntoken']]                 # drop lane padding


# ----------------------------- parameter init --------------------------------

def init_params(key, ntoken, d_model, nhead, d_hid, nlayers, max_len=256):
    keys = jax.random.split(key, 3 + nlayers)
    hd = d_model // nhead

    def u(kk, shape, bound):
        return jax.random.uniform(kk, shape, jnp.float32, -bound, bound)

    # embedding table, transposed + padded + *sqrt(d_model) folded in
    npad = max(128, ((ntoken + 127) // 128) * 128)
    emb = u(keys[0], (ntoken, d_model), 0.1)
    emb_t = jnp.zeros((d_model, npad), jnp.float32)
    emb_t = emb_t.at[:, :ntoken].set((emb * math.sqrt(d_model)).T)

    # positional-encoding buffer (same construction as the PyTorch module), transposed
    position = jnp.arange(max_len, dtype=jnp.float32)[:, None]
    div_term = jnp.exp(jnp.arange(0, d_model, 2, dtype=jnp.float32)
                       * (-math.log(10000.0) / d_model))
    pe = jnp.zeros((max_len, 1, d_model), jnp.float32)
    pe = pe.at[:, 0, 0::2].set(jnp.sin(position * div_term))
    pe = pe.at[:, 0, 1::2].set(jnp.cos(position * div_term))
    pe_t = jnp.transpose(pe, (0, 2, 1))                         # [max_len, D, 1]

    per_layer = []
    q_scale = 1.0 / math.sqrt(hd)
    for l in range(nlayers):
        k = jax.random.split(keys[3 + l], 6)
        s_in = 1.0 / math.sqrt(d_model)
        s_hid = 1.0 / math.sqrt(d_hid)
        wqkv = u(k[0], (3 * d_model, d_model), s_in)
        wqkv = wqkv.at[:d_model].multiply(q_scale)              # fold 1/sqrt(hd) into Q
        per_layer.append(dict(
            wqkv=wqkv.astype(jnp.bfloat16),
            bqkv=jnp.zeros((3 * d_model, 1), jnp.float32),
            wo=u(k[1], (d_model, d_model), s_in).astype(jnp.bfloat16),
            bo=jnp.zeros((d_model, 1), jnp.float32),
            ln1w=jnp.ones((d_model, 1), jnp.float32),
            ln1b=jnp.zeros((d_model, 1), jnp.float32),
            w1=u(k[2], (d_hid, d_model), s_in).astype(jnp.bfloat16),
            b1=u(k[3], (d_hid, 1), s_in),
            w2=u(k[4], (d_model, d_hid), s_hid).astype(jnp.bfloat16),
            b2=u(k[5], (d_model, 1), s_hid),
            ln2w=jnp.ones((d_model, 1), jnp.float32),
            ln2b=jnp.zeros((d_model, 1), jnp.float32)))

    layers = {name: jnp.stack([p[name] for p in per_layer], axis=0)
              for name in per_layer[0]}

    # final Linear, rearranged for the fused in-kernel formulation
    fan_in = d_model * SEQUENCE_LENGTH
    bound = 1.0 / math.sqrt(fan_in)
    ow = u(keys[1], (ntoken, fan_in), bound)                    # [T, S*D]
    ob = u(keys[2], (ntoken,), bound)
    tpad = max(128, ((ntoken + 127) // 128) * 128)
    w3 = ow.reshape(ntoken, SEQUENCE_LENGTH, d_model)           # [T, S, D]
    wcat = jnp.zeros((SEQUENCE_LENGTH, d_model, tpad), jnp.float32)
    wcat = wcat.at[:, :, :ntoken].set(jnp.transpose(w3, (1, 2, 0)))
    wcat = wcat.reshape(SEQUENCE_LENGTH, d_model * tpad).astype(jnp.bfloat16)
    out_b = jnp.zeros((1, tpad), jnp.float32).at[0, :ntoken].set(ob)

    return dict(emb_t=emb_t, pe_t=pe_t, layers=layers,
                out_w=wcat, out_b=out_b,
                nhead=nhead, nlayers=nlayers, ntoken=ntoken,
                d_model=d_model, d_hid=d_hid)


# ----------------------------- main -------------------------------------------

if __name__ == "__main__":
    ntoken, d_model, nhead, d_hid, nlayers = 50, 32, 4, 64, 2
    batch = 2

    key = jax.random.PRNGKey(0)
    pkey, dkey = jax.random.split(key)
    params = init_params(pkey, ntoken, d_model, nhead, d_hid, nlayers)

    src = jax.random.randint(dkey, (batch, SEQUENCE_LENGTH), 0, ntoken,
                             dtype=jnp.int32)

    out = transformer_model_forward(src, params)
    out = jax.block_until_ready(out)
    assert out.shape == (batch, ntoken), out.shape
    assert out.dtype == jnp.float32
    assert bool(jnp.all(jnp.isfinite(out)))
    print("KERNEL_OK")
</pallas_src>

<mosaic_0001>
module attributes {stable_mosaic.version = 11 : i64} {
  func.func @fused_model_kernel(%arg0: i32, %arg1: memref<1x1x95xi32, #tpu.memory_space<vmem>>, %arg2: memref<1x32x1xf32, #tpu.memory_space<vmem>>, %arg3: memref<32x128xf32, #tpu.memory_space<vmem>>, %arg4: memref<2x96x32xbf16, #tpu.memory_space<vmem>>, %arg5: memref<2x96x1xf32, #tpu.memory_space<vmem>>, %arg6: memref<2x32x32xbf16, #tpu.memory_space<vmem>>, %arg7: memref<2x32x1xf32, #tpu.memory_space<vmem>>, %arg8: memref<2x32x1xf32, #tpu.memory_space<vmem>>, %arg9: memref<2x32x1xf32, #tpu.memory_space<vmem>>, %arg10: memref<2x64x32xbf16, #tpu.memory_space<vmem>>, %arg11: memref<2x64x1xf32, #tpu.memory_space<vmem>>, %arg12: memref<2x32x64xbf16, #tpu.memory_space<vmem>>, %arg13: memref<2x32x1xf32, #tpu.memory_space<vmem>>, %arg14: memref<2x32x1xf32, #tpu.memory_space<vmem>>, %arg15: memref<2x32x1xf32, #tpu.memory_space<vmem>>, %arg16: memref<95x4096xbf16, #tpu.memory_space<vmem>>, %arg17: memref<1x128xf32, #tpu.memory_space<vmem>>, %arg18: memref<1x1x128xf32, #tpu.memory_space<vmem>>) attributes {dimension_semantics = [#tpu.dimension_semantics<parallel>], iteration_bounds = array<i64: 2>, scalar_prefetch = 0 : i64, scratch_operands = 0 : i64, tpu.core_type = #tpu.core_type<tc>, window_params = [{transform_indices = @transform_0, window_bounds = array<i64: 1, 1, 95>}, {transform_indices = @transform_1, window_bounds = array<i64: 1, 32, 1>}, {pipeline_mode = #tpu.pipeline_mode<synchronous>, transform_indices = @transform_2, window_bounds = array<i64: 32, 128>}, {pipeline_mode = #tpu.pipeline_mode<synchronous>, transform_indices = @transform_3, window_bounds = array<i64: 2, 96, 32>}, {pipeline_mode = #tpu.pipeline_mode<synchronous>, transform_indices = @transform_4, window_bounds = array<i64: 2, 96, 1>}, {pipeline_mode = #tpu.pipeline_mode<synchronous>, transform_indices = @transform_5, window_bounds = array<i64: 2, 32, 32>}, {pipeline_mode = #tpu.pipeline_mode<synchronous>, transform_indices = @transform_6, window_bounds = array<i64: 2, 32, 1>}, {pipeline_mode = #tpu.pipeline_mode<synchronous>, transform_indices = @transform_7, window_bounds = array<i64: 2, 32, 1>}, {pipeline_mode = #tpu.pipeline_mode<synchronous>, transform_indices = @transform_8, window_bounds = array<i64: 2, 32, 1>}, {pipeline_mode = #tpu.pipeline_mode<synchronous>, transform_indices = @transform_9, window_bounds = array<i64: 2, 64, 32>}, {pipeline_mode = #tpu.pipeline_mode<synchronous>, transform_indices = @transform_10, window_bounds = array<i64: 2, 64, 1>}, {pipeline_mode = #tpu.pipeline_mode<synchronous>, transform_indices = @transform_11, window_bounds = array<i64: 2, 32, 64>}, {pipeline_mode = #tpu.pipeline_mode<synchronous>, transform_indices = @transform_12, window_bounds = array<i64: 2, 32, 1>}, {pipeline_mode = #tpu.pipeline_mode<synchronous>, transform_indices = @transform_13, window_bounds = array<i64: 2, 32, 1>}, {pipeline_mode = #tpu.pipeline_mode<synchronous>, transform_indices = @transform_14, window_bounds = array<i64: 2, 32, 1>}, {pipeline_mode = #tpu.pipeline_mode<synchronous>, transform_indices = @transform_15, window_bounds = array<i64: 95, 4096>}, {pipeline_mode = #tpu.pipeline_mode<synchronous>, transform_indices = @transform_16, window_bounds = array<i64: 1, 128>}, {transform_indices = @transform_17, window_bounds = array<i64: 1, 1, 128>}]} {
    %c0 = arith.constant 0 : index
    %c0_0 = arith.constant 0 : index
    %c0_1 = arith.constant 0 : index
    %0 = vector.load %arg1[%c0, %c0_0, %c0_1] : memref<1x1x95xi32, #tpu.memory_space<vmem>>, vector<1x1x95xi32>
    %1 = vector.shape_cast %0 : vector<1x1x95xi32> to vector<1x95xi32>
    %2 = tpu.iota {dimensions = array<i32: 0>} : vector<128x95xi32>
    %3 = vector.broadcast %1 : vector<1x95xi32> to vector<128x95xi32>
    %4 = arith.cmpi eq, %2, %3 : vector<128x95xi32>
    %5 = arith.extui %4 : vector<128x95xi1> to vector<128x95xi32>
    %6 = arith.sitofp %5 : vector<128x95xi32> to vector<128x95xf32>
    %c0_2 = arith.constant 0 : index
    %c0_3 = arith.constant 0 : index
    %7 = vector.load %arg3[%c0_2, %c0_3] : memref<32x128xf32, #tpu.memory_space<vmem>>, vector<32x128xf32>
    %cst = arith.constant dense<0.000000e+00> : vector<32x95xf32>
    %8 = tpu.matmul %7, %6, %cst {dimension_numbers = #tpu.dot_dimension_numbers<[1], [0], [0], [1], [0, 0, 1, 1], [], []>} : vector<32x128xf32>, vector<128x95xf32>, vector<32x95xf32> -> vector<32x95xf32>
    %c0_4 = arith.constant 0 : index
    %c0_5 = arith.constant 0 : index
    %c0_6 = arith.constant 0 : index
    %9 = vector.load %arg2[%c0_4, %c0_5, %c0_6] : memref<1x32x1xf32, #tpu.memory_space<vmem>>, vector<1x32x1xf32>
    %10 = vector.shape_cast %9 : vector<1x32x1xf32> to vector<32x1xf32>
    %11 = vector.broadcast %10 : vector<32x1xf32> to vector<32x95xf32>
    %12 = arith.addf %8, %11 : vector<32x95xf32>
    %13 = arith.truncf %12 : vector<32x95xf32> to vector<32x95xbf16>
    %c0_7 = arith.constant 0 : index
    %c0_8 = arith.constant 0 : index
    %c0_9 = arith.constant 0 : index
    %14 = vector.load %arg4[%c0_7, %c0_8, %c0_9] : memref<2x96x32xbf16, #tpu.memory_space<vmem>>, vector<1x96x32xbf16>
    %15 = vector.shape_cast %14 : vector<1x96x32xbf16> to vector<96x32xbf16>
    %cst_10 = arith.constant dense<0.000000e+00> : vector<96x95xf32>
    %16 = tpu.matmul %15, %13, %cst_10 {dimension_numbers = #tpu.dot_dimension_numbers<[1], [0], [0], [1], [0, 0, 1, 1], [], []>} : vector<96x32xbf16>, vector<32x95xbf16>, vector<96x95xf32> -> vector<96x95xf32>
    %c0_11 = arith.constant 0 : index
    %c0_12 = arith.constant 0 : index
    %c0_13 = arith.constant 0 : index
    %17 = vector.load %arg5[%c0_11, %c0_12, %c0_13] : memref<2x96x1xf32, #tpu.memory_space<vmem>>, vector<1x96x1xf32>
    %18 = vector.shape_cast %17 : vector<1x96x1xf32> to vector<96x1xf32>
    %19 = vector.broadcast %18 : vector<96x1xf32> to vector<96x95xf32>
    %20 = arith.addf %16, %19 : vector<96x95xf32>
    %21 = vector.extract_strided_slice %20 {offsets = [0, 0], sizes = [32, 95], strides = [1, 1]} : vector<96x95xf32> to vector<32x95xf32>
    %22 = vector.shape_cast %21 : vector<32x95xf32> to vector<4x8x95xf32>
    %23 = vector.extract_strided_slice %20 {offsets = [32, 0], sizes = [32, 95], strides = [1, 1]} : vector<96x95xf32> to vector<32x95xf32>
    %24 = vector.shape_cast %23 : vector<32x95xf32> to vector<4x8x95xf32>
    %25 = vector.extract_strided_slice %20 {offsets = [64, 0], sizes = [32, 95], strides = [1, 1]} : vector<96x95xf32> to vector<32x95xf32>
    %26 = vector.shape_cast %25 : vector<32x95xf32> to vector<4x8x95xf32>
    %cst_14 = arith.constant dense<0.000000e+00> : vector<4x95x95xf32>
    %27 = tpu.matmul %22, %24, %cst_14 {dimension_numbers = #tpu.dot_dimension_numbers<[1], [1], [2], [2], [0, 0, 0, 2, 1, 2], [0], [0]>} : vector<4x8x95xf32>, vector<4x8x95xf32>, vector<4x95x95xf32> -> vector<4x95x95xf32>
    %cst_15 = arith.constant dense<0xFF800000> : vector<4x95xf32>
    %28 = vector.multi_reduction <maximumf>, %27, %cst_15 [2] : vector<4x95x95xf32> to vector<4x95xf32>
    %29 = vector.shape_cast %28 : vector<4x95xf32> to vector<4x95x1xf32>
    %30 = vector.broadcast %29 : vector<4x95x1xf32> to vector<4x95x95xf32>
    %31 = arith.subf %27, %30 : vector<4x95x95xf32>
    %32 = math.exp %31 : vector<4x95x95xf32>
    %cst_16 = arith.constant dense<0.000000e+00> : vector<4x95xf32>
    %33 = vector.multi_reduction <add>, %32, %cst_16 [2] : vector<4x95x95xf32> to vector<4x95xf32>
    %34 = vector.shape_cast %33 : vector<4x95xf32> to vector<4x95x1xf32>
    %35 = tpu.reciprocal %34 {approx = true} : vector<4x95x1xf32> -> vector<4x95x1xf32>
    %36 = vector.broadcast %35 : vector<4x95x1xf32> to vector<4x95x95xf32>
    %37 = arith.mulf %32, %36 : vector<4x95x95xf32>
    %cst_17 = arith.constant dense<0.000000e+00> : vector<4x8x95xf32>
    %38 = tpu.matmul %26, %37, %cst_17 {dimension_numbers = #tpu.dot_dimension_numbers<[2], [2], [1], [1], [0, 0, 0, 1, 1, 1], [0], [0]>} : vector<4x8x95xf32>, vector<4x95x95xf32>, vector<4x8x95xf32> -> vector<4x8x95xf32>
    %39 = vector.shape_cast %38 : vector<4x8x95xf32> to vector<32x95xf32>
    %c0_18 = arith.constant 0 : index
    %c0_19 = arith.constant 0 : index
    %c0_20 = arith.constant 0 : index
    %40 = vector.load %arg6[%c0_18, %c0_19, %c0_20] : memref<2x32x32xbf16, #tpu.memory_space<vmem>>, vector<1x32x32xbf16>
    %41 = vector.shape_cast %40 : vector<1x32x32xbf16> to vector<32x32xbf16>
    %42 = arith.truncf %39 : vector<32x95xf32> to vector<32x95xbf16>
    %cst_21 = arith.constant dense<0.000000e+00> : vector<32x95xf32>
    %43 = tpu.matmul %41, %42, %cst_21 {dimension_numbers = #tpu.dot_dimension_numbers<[1], [0], [0], [1], [0, 0, 1, 1], [], []>} : vector<32x32xbf16>, vector<32x95xbf16>, vector<32x95xf32> -> vector<32x95xf32>
    %c0_22 = arith.constant 0 : index
    %c0_23 = arith.constant 0 : index
    %c0_24 = arith.constant 0 : index
    %44 = vector.load %arg7[%c0_22, %c0_23, %c0_24] : memref<2x32x1xf32, #tpu.memory_space<vmem>>, vector<1x32x1xf32>
    %45 = vector.shape_cast %44 : vector<1x32x1xf32> to vector<32x1xf32>
    %46 = vector.broadcast %45 : vector<32x1xf32> to vector<32x95xf32>
    %47 = arith.addf %43, %46 : vector<32x95xf32>
    %48 = arith.addf %12, %47 : vector<32x95xf32>
    %c0_25 = arith.constant 0 : index
    %c0_26 = arith.constant 0 : index
    %c0_27 = arith.constant 0 : index
    %49 = vector.load %arg8[%c0_25, %c0_26, %c0_27] : memref<2x32x1xf32, #tpu.memory_space<vmem>>, vector<1x32x1xf32>
    %50 = vector.shape_cast %49 : vector<1x32x1xf32> to vector<32x1xf32>
    %c0_28 = arith.constant 0 : index
    %c0_29 = arith.constant 0 : index
    %c0_30 = arith.constant 0 : index
    %51 = vector.load %arg9[%c0_28, %c0_29, %c0_30] : memref<2x32x1xf32, #tpu.memory_space<vmem>>, vector<1x32x1xf32>
    %52 = vector.shape_cast %51 : vector<1x32x1xf32> to vector<32x1xf32>
    %cst_31 = arith.constant dense<0.000000e+00> : vector<95xf32>
    %53 = vector.multi_reduction <add>, %48, %cst_31 [0] : vector<32x95xf32> to vector<95xf32>
    %54 = vector.shape_cast %53 : vector<95xf32> to vector<1x95xf32>
    %cst_32 = arith.constant 3.200000e+01 : f32
    %55 = vector.broadcast %cst_32 : f32 to vector<1x95xf32>
    %56 = arith.divf %54, %55 : vector<1x95xf32>
    %57 = vector.broadcast %56 : vector<1x95xf32> to vector<32x95xf32>
    %58 = arith.subf %48, %57 : vector<32x95xf32>
    %59 = arith.mulf %58, %58 : vector<32x95xf32>
    %cst_33 = arith.constant dense<0.000000e+00> : vector<95xf32>
    %60 = vector.multi_reduction <add>, %59, %cst_33 [0] : vector<32x95xf32> to vector<95xf32>
    %61 = vector.shape_cast %60 : vector<95xf32> to vector<1x95xf32>
    %cst_34 = arith.constant 3.200000e+01 : f32
    %62 = vector.broadcast %cst_34 : f32 to vector<1x95xf32>
    %63 = arith.divf %61, %62 : vector<1x95xf32>
    %64 = vector.broadcast %56 : vector<1x95xf32> to vector<32x95xf32>
    %65 = arith.subf %48, %64 : vector<32x95xf32>
    %cst_35 = arith.constant 9.99999974E-6 : f32
    %66 = vector.broadcast %cst_35 : f32 to vector<1x95xf32>
    %67 = arith.addf %63, %66 : vector<1x95xf32>
    %68 = math.rsqrt %67 : vector<1x95xf32>
    %69 = vector.broadcast %68 : vector<1x95xf32> to vector<32x95xf32>
    %70 = arith.mulf %65, %69 : vector<32x95xf32>
    %71 = vector.broadcast %50 : vector<32x1xf32> to vector<32x95xf32>
    %72 = arith.mulf %70, %71 : vector<32x95xf32>
    %73 = vector.broadcast %52 : vector<32x1xf32> to vector<32x95xf32>
    %74 = arith.addf %72, %73 : vector<32x95xf32>
    %75 = arith.truncf %74 : vector<32x95xf32> to vector<32x95xbf16>
    %c0_36 = arith.constant 0 : index
    %c0_37 = arith.constant 0 : index
    %c0_38 = arith.constant 0 : index
    %76 = vector.load %arg10[%c0_36, %c0_37, %c0_38] : memref<2x64x32xbf16, #tpu.memory_space<vmem>>, vector<1x64x32xbf16>
    %77 = vector.shape_cast %76 : vector<1x64x32xbf16> to vector<64x32xbf16>
    %cst_39 = arith.constant dense<0.000000e+00> : vector<64x95xf32>
    %78 = tpu.matmul %77, %75, %cst_39 {dimension_numbers = #tpu.dot_dimension_numbers<[1], [0], [0], [1], [0, 0, 1, 1], [], []>} : vector<64x32xbf16>, vector<32x95xbf16>, vector<64x95xf32> -> vector<64x95xf32>
    %c0_40 = arith.constant 0 : index
    %c0_41 = arith.constant 0 : index
    %c0_42 = arith.constant 0 : index
    %79 = vector.load %arg11[%c0_40, %c0_41, %c0_42] : memref<2x64x1xf32, #tpu.memory_space<vmem>>, vector<1x64x1xf32>
    %80 = vector.shape_cast %79 : vector<1x64x1xf32> to vector<64x1xf32>
    %81 = vector.broadcast %80 : vector<64x1xf32> to vector<64x95xf32>
    %82 = arith.addf %78, %81 : vector<64x95xf32>
    %cst_43 = arith.constant 0.000000e+00 : f32
    %83 = vector.broadcast %cst_43 : f32 to vector<64x95xf32>
    %84 = arith.maximumf %82, %83 : vector<64x95xf32>
    %c0_44 = arith.constant 0 : index
    %c0_45 = arith.constant 0 : index
    %c0_46 = arith.constant 0 : index
    %85 = vector.load %arg12[%c0_44, %c0_45, %c0_46] : memref<2x32x64xbf16, #tpu.memory_space<vmem>>, vector<1x32x64xbf16>
    %86 = vector.shape_cast %85 : vector<1x32x64xbf16> to vector<32x64xbf16>
    %87 = arith.truncf %84 : vector<64x95xf32> to vector<64x95xbf16>
    %cst_47 = arith.constant dense<0.000000e+00> : vector<32x95xf32>
    %88 = tpu.matmul %86, %87, %cst_47 {dimension_numbers = #tpu.dot_dimension_numbers<[1], [0], [0], [1], [0, 0, 1, 1], [], []>} : vector<32x64xbf16>, vector<64x95xbf16>, vector<32x95xf32> -> vector<32x95xf32>
    %c0_48 = arith.constant 0 : index
    %c0_49 = arith.constant 0 : index
    %c0_50 = arith.constant 0 : index
    %89 = vector.load %arg13[%c0_48, %c0_49, %c0_50] : memref<2x32x1xf32, #tpu.memory_space<vmem>>, vector<1x32x1xf32>
    %90 = vector.shape_cast %89 : vector<1x32x1xf32> to vector<32x1xf32>
    %91 = vector.broadcast %90 : vector<32x1xf32> to vector<32x95xf32>
    %92 = arith.addf %88, %91 : vector<32x95xf32>
    %93 = arith.addf %74, %92 : vector<32x95xf32>
    %c0_51 = arith.constant 0 : index
    %c0_52 = arith.constant 0 : index
    %c0_53 = arith.constant 0 : index
    %94 = vector.load %arg14[%c0_51, %c0_52, %c0_53] : memref<2x32x1xf32, #tpu.memory_space<vmem>>, vector<1x32x1xf32>
    %95 = vector.shape_cast %94 : vector<1x32x1xf32> to vector<32x1xf32>
    %c0_54 = arith.constant 0 : index
    %c0_55 = arith.constant 0 : index
    %c0_56 = arith.constant 0 : index
    %96 = vector.load %arg15[%c0_54, %c0_55, %c0_56] : memref<2x32x1xf32, #tpu.memory_space<vmem>>, vector<1x32x1xf32>
    %97 = vector.shape_cast %96 : vector<1x32x1xf32> to vector<32x1xf32>
    %cst_57 = arith.constant dense<0.000000e+00> : vector<95xf32>
    %98 = vector.multi_reduction <add>, %93, %cst_57 [0] : vector<32x95xf32> to vector<95xf32>
    %99 = vector.shape_cast %98 : vector<95xf32> to vector<1x95xf32>
    %cst_58 = arith.constant 3.200000e+01 : f32
    %100 = vector.broadcast %cst_58 : f32 to vector<1x95xf32>
    %101 = arith.divf %99, %100 : vector<1x95xf32>
    %102 = vector.broadcast %101 : vector<1x95xf32> to vector<32x95xf32>
    %103 = arith.subf %93, %102 : vector<32x95xf32>
    %104 = arith.mulf %103, %103 : vector<32x95xf32>
    %cst_59 = arith.constant dense<0.000000e+00> : vector<95xf32>
    %105 = vector.multi_reduction <add>, %104, %cst_59 [0] : vector<32x95xf32> to vector<95xf32>
    %106 = vector.shape_cast %105 : vector<95xf32> to vector<1x95xf32>
    %cst_60 = arith.constant 3.200000e+01 : f32
    %107 = vector.broadcast %cst_60 : f32 to vector<1x95xf32>
    %108 = arith.divf %106, %107 : vector<1x95xf32>
    %109 = vector.broadcast %101 : vector<1x95xf32> to vector<32x95xf32>
    %110 = arith.subf %93, %109 : vector<32x95xf32>
    %cst_61 = arith.constant 9.99999974E-6 : f32
    %111 = vector.broadcast %cst_61 : f32 to vector<1x95xf32>
    %112 = arith.addf %108, %111 : vector<1x95xf32>
    %113 = math.rsqrt %112 : vector<1x95xf32>
    %114 = vector.broadcast %113 : vector<1x95xf32> to vector<32x95xf32>
    %115 = arith.mulf %110, %114 : vector<32x95xf32>
    %116 = vector.broadcast %95 : vector<32x1xf32> to vector<32x95xf32>
    %117 = arith.mulf %115, %116 : vector<32x95xf32>
    %118 = vector.broadcast %97 : vector<32x1xf32> to vector<32x95xf32>
    %119 = arith.addf %117, %118 : vector<32x95xf32>
    %120 = arith.truncf %119 : vector<32x95xf32> to vector<32x95xbf16>
    %c1 = arith.constant 1 : index
    %c0_62 = arith.constant 0 : index
    %c0_63 = arith.constant 0 : index
    %121 = vector.load %arg4[%c1, %c0_62, %c0_63] : memref<2x96x32xbf16, #tpu.memory_space<vmem>>, vector<1x96x32xbf16>
    %122 = vector.shape_cast %121 : vector<1x96x32xbf16> to vector<96x32xbf16>
    %cst_64 = arith.constant dense<0.000000e+00> : vector<96x95xf32>
    %123 = tpu.matmul %122, %120, %cst_64 {dimension_numbers = #tpu.dot_dimension_numbers<[1], [0], [0], [1], [0, 0, 1, 1], [], []>} : vector<96x32xbf16>, vector<32x95xbf16>, vector<96x95xf32> -> vector<96x95xf32>
    %c1_65 = arith.constant 1 : index
    %c0_66 = arith.constant 0 : index
    %c0_67 = arith.constant 0 : index
    %124 = vector.load %arg5[%c1_65, %c0_66, %c0_67] : memref<2x96x1xf32, #tpu.memory_space<vmem>>, vector<1x96x1xf32>
    %125 = vector.shape_cast %124 : vector<1x96x1xf32> to vector<96x1xf32>
    %126 = vector.broadcast %125 : vector<96x1xf32> to vector<96x95xf32>
    %127 = arith.addf %123, %126 : vector<96x95xf32>
    %128 = vector.extract_strided_slice %127 {offsets = [0, 0], sizes = [32, 95], strides = [1, 1]} : vector<96x95xf32> to vector<32x95xf32>
    %129 = vector.shape_cast %128 : vector<32x95xf32> to vector<4x8x95xf32>
    %130 = vector.extract_strided_slice %127 {offsets = [32, 0], sizes = [32, 95], strides = [1, 1]} : vector<96x95xf32> to vector<32x95xf32>
    %131 = vector.shape_cast %130 : vector<32x95xf32> to vector<4x8x95xf32>
    %132 = vector.extract_strided_slice %127 {offsets = [64, 0], sizes = [32, 95], strides = [1, 1]} : vector<96x95xf32> to vector<32x95xf32>
    %133 = vector.shape_cast %132 : vector<32x95xf32> to vector<4x8x95xf32>
    %cst_68 = arith.constant dense<0.000000e+00> : vector<4x95x95xf32>
    %134 = tpu.matmul %129, %131, %cst_68 {dimension_numbers = #tpu.dot_dimension_numbers<[1], [1], [2], [2], [0, 0, 0, 2, 1, 2], [0], [0]>} : vector<4x8x95xf32>, vector<4x8x95xf32>, vector<4x95x95xf32> -> vector<4x95x95xf32>
    %cst_69 = arith.constant dense<0xFF800000> : vector<4x95xf32>
    %135 = vector.multi_reduction <maximumf>, %134, %cst_69 [2] : vector<4x95x95xf32> to vector<4x95xf32>
    %136 = vector.shape_cast %135 : vector<4x95xf32> to vector<4x95x1xf32>
    %137 = vector.broadcast %136 : vector<4x95x1xf32> to vector<4x95x95xf32>
    %138 = arith.subf %134, %137 : vector<4x95x95xf32>
    %139 = math.exp %138 : vector<4x95x95xf32>
    %cst_70 = arith.constant dense<0.000000e+00> : vector<4x95xf32>
    %140 = vector.multi_reduction <add>, %139, %cst_70 [2] : vector<4x95x95xf32> to vector<4x95xf32>
    %141 = vector.shape_cast %140 : vector<4x95xf32> to vector<4x95x1xf32>
    %142 = tpu.reciprocal %141 {approx = true} : vector<4x95x1xf32> -> vector<4x95x1xf32>
    %143 = vector.broadcast %142 : vector<4x95x1xf32> to vector<4x95x95xf32>
    %144 = arith.mulf %139, %143 : vector<4x95x95xf32>
    %cst_71 = arith.constant dense<0.000000e+00> : vector<4x8x95xf32>
    %145 = tpu.matmul %133, %144, %cst_71 {dimension_numbers = #tpu.dot_dimension_numbers<[2], [2], [1], [1], [0, 0, 0, 1, 1, 1], [0], [0]>} : vector<4x8x95xf32>, vector<4x95x95xf32>, vector<4x8x95xf32> -> vector<4x8x95xf32>
    %146 = vector.shape_cast %145 : vector<4x8x95xf32> to vector<32x95xf32>
    %c1_72 = arith.constant 1 : index
    %c0_73 = arith.constant 0 : index
    %c0_74 = arith.constant 0 : index
    %147 = vector.load %arg6[%c1_72, %c0_73, %c0_74] : memref<2x32x32xbf16, #tpu.memory_space<vmem>>, vector<1x32x32xbf16>
    %148 = vector.shape_cast %147 : vector<1x32x32xbf16> to vector<32x32xbf16>
    %149 = arith.truncf %146 : vector<32x95xf32> to vector<32x95xbf16>
    %cst_75 = arith.constant dense<0.000000e+00> : vector<32x95xf32>
    %150 = tpu.matmul %148, %149, %cst_75 {dimension_numbers = #tpu.dot_dimension_numbers<[1], [0], [0], [1], [0, 0, 1, 1], [], []>} : vector<32x32xbf16>, vector<32x95xbf16>, vector<32x95xf32> -> vector<32x95xf32>
    %c1_76 = arith.constant 1 : index
    %c0_77 = arith.constant 0 : index
    %c0_78 = arith.constant 0 : index
    %151 = vector.load %arg7[%c1_76, %c0_77, %c0_78] : memref<2x32x1xf32, #tpu.memory_space<vmem>>, vector<1x32x1xf32>
    %152 = vector.shape_cast %151 : vector<1x32x1xf32> to vector<32x1xf32>
    %153 = vector.broadcast %152 : vector<32x1xf32> to vector<32x95xf32>
    %154 = arith.addf %150, %153 : vector<32x95xf32>
    %155 = arith.addf %119, %154 : vector<32x95xf32>
    %c1_79 = arith.constant 1 : index
    %c0_80 = arith.constant 0 : index
    %c0_81 = arith.constant 0 : index
    %156 = vector.load %arg8[%c1_79, %c0_80, %c0_81] : memref<2x32x1xf32, #tpu.memory_space<vmem>>, vector<1x32x1xf32>
    %157 = vector.shape_cast %156 : vector<1x32x1xf32> to vector<32x1xf32>
    %c1_82 = arith.constant 1 : index
    %c0_83 = arith.constant 0 : index
    %c0_84 = arith.constant 0 : index
    %158 = vector.load %arg9[%c1_82, %c0_83, %c0_84] : memref<2x32x1xf32, #tpu.memory_space<vmem>>, vector<1x32x1xf32>
    %159 = vector.shape_cast %158 : vector<1x32x1xf32> to vector<32x1xf32>
    %cst_85 = arith.constant dense<0.000000e+00> : vector<95xf32>
    %160 = vector.multi_reduction <add>, %155, %cst_85 [0] : vector<32x95xf32> to vector<95xf32>
    %161 = vector.shape_cast %160 : vector<95xf32> to vector<1x95xf32>
    %cst_86 = arith.constant 3.200000e+01 : f32
    %162 = vector.broadcast %cst_86 : f32 to vector<1x95xf32>
    %163 = arith.divf %161, %162 : vector<1x95xf32>
    %164 = vector.broadcast %163 : vector<1x95xf32> to vector<32x95xf32>
    %165 = arith.subf %155, %164 : vector<32x95xf32>
    %166 = arith.mulf %165, %165 : vector<32x95xf32>
    %cst_87 = arith.constant dense<0.000000e+00> : vector<95xf32>
    %167 = vector.multi_reduction <add>, %166, %cst_87 [0] : vector<32x95xf32> to vector<95xf32>
    %168 = vector.shape_cast %167 : vector<95xf32> to vector<1x95xf32>
    %cst_88 = arith.constant 3.200000e+01 : f32
    %169 = vector.broadcast %cst_88 : f32 to vector<1x95xf32>
    %170 = arith.divf %168, %169 : vector<1x95xf32>
    %171 = vector.broadcast %163 : vector<1x95xf32> to vector<32x95xf32>
    %172 = arith.subf %155, %171 : vector<32x95xf32>
    %cst_89 = arith.constant 9.99999974E-6 : f32
    %173 = vector.broadcast %cst_89 : f32 to vector<1x95xf32>
    %174 = arith.addf %170, %173 : vector<1x95xf32>
    %175 = math.rsqrt %174 : vector<1x95xf32>
    %176 = vector.broadcast %175 : vector<1x95xf32> to vector<32x95xf32>
    %177 = arith.mulf %172, %176 : vector<32x95xf32>
    %178 = vector.broadcast %157 : vector<32x1xf32> to vector<32x95xf32>
    %179 = arith.mulf %177, %178 : vector<32x95xf32>
    %180 = vector.broadcast %159 : vector<32x1xf32> to vector<32x95xf32>
    %181 = arith.addf %179, %180 : vector<32x95xf32>
    %182 = arith.truncf %181 : vector<32x95xf32> to vector<32x95xbf16>
    %c1_90 = arith.constant 1 : index
    %c0_91 = arith.constant 0 : index
    %c0_92 = arith.constant 0 : index
    %183 = vector.load %arg10[%c1_90, %c0_91, %c0_92] : memref<2x64x32xbf16, #tpu.memory_space<vmem>>, vector<1x64x32xbf16>
    %184 = vector.shape_cast %183 : vector<1x64x32xbf16> to vector<64x32xbf16>
    %cst_93 = arith.constant dense<0.000000e+00> : vector<64x95xf32>
    %185 = tpu.matmul %184, %182, %cst_93 {dimension_numbers = #tpu.dot_dimension_numbers<[1], [0], [0], [1], [0, 0, 1, 1], [], []>} : vector<64x32xbf16>, vector<32x95xbf16>, vector<64x95xf32> -> vector<64x95xf32>
    %c1_94 = arith.constant 1 : index
    %c0_95 = arith.constant 0 : index
    %c0_96 = arith.constant 0 : index
    %186 = vector.load %arg11[%c1_94, %c0_95, %c0_96] : memref<2x64x1xf32, #tpu.memory_space<vmem>>, vector<1x64x1xf32>
    %187 = vector.shape_cast %186 : vector<1x64x1xf32> to vector<64x1xf32>
    %188 = vector.broadcast %187 : vector<64x1xf32> to vector<64x95xf32>
    %189 = arith.addf %185, %188 : vector<64x95xf32>
    %cst_97 = arith.constant 0.000000e+00 : f32
    %190 = vector.broadcast %cst_97 : f32 to vector<64x95xf32>
    %191 = arith.maximumf %189, %190 : vector<64x95xf32>
    %c1_98 = arith.constant 1 : index
    %c0_99 = arith.constant 0 : index
    %c0_100 = arith.constant 0 : index
    %192 = vector.load %arg12[%c1_98, %c0_99, %c0_100] : memref<2x32x64xbf16, #tpu.memory_space<vmem>>, vector<1x32x64xbf16>
    %193 = vector.shape_cast %192 : vector<1x32x64xbf16> to vector<32x64xbf16>
    %194 = arith.truncf %191 : vector<64x95xf32> to vector<64x95xbf16>
    %cst_101 = arith.constant dense<0.000000e+00> : vector<32x95xf32>
    %195 = tpu.matmul %193, %194, %cst_101 {dimension_numbers = #tpu.dot_dimension_numbers<[1], [0], [0], [1], [0, 0, 1, 1], [], []>} : vector<32x64xbf16>, vector<64x95xbf16>, vector<32x95xf32> -> vector<32x95xf32>
    %c1_102 = arith.constant 1 : index
    %c0_103 = arith.constant 0 : index
    %c0_104 = arith.constant 0 : index
    %196 = vector.load %arg13[%c1_102, %c0_103, %c0_104] : memref<2x32x1xf32, #tpu.memory_space<vmem>>, vector<1x32x1xf32>
    %197 = vector.shape_cast %196 : vector<1x32x1xf32> to vector<32x1xf32>
    %198 = vector.broadcast %197 : vector<32x1xf32> to vector<32x95xf32>
    %199 = arith.addf %195, %198 : vector<32x95xf32>
    %200 = arith.addf %181, %199 : vector<32x95xf32>
    %c1_105 = arith.constant 1 : index
    %c0_106 = arith.constant 0 : index
    %c0_107 = arith.constant 0 : index
    %201 = vector.load %arg14[%c1_105, %c0_106, %c0_107] : memref<2x32x1xf32, #tpu.memory_space<vmem>>, vector<1x32x1xf32>
    %202 = vector.shape_cast %201 : vector<1x32x1xf32> to vector<32x1xf32>
    %c1_108 = arith.constant 1 : index
    %c0_109 = arith.constant 0 : index
    %c0_110 = arith.constant 0 : index
    %203 = vector.load %arg15[%c1_108, %c0_109, %c0_110] : memref<2x32x1xf32, #tpu.memory_space<vmem>>, vector<1x32x1xf32>
    %204 = vector.shape_cast %203 : vector<1x32x1xf32> to vector<32x1xf32>
    %cst_111 = arith.constant dense<0.000000e+00> : vector<95xf32>
    %205 = vector.multi_reduction <add>, %200, %cst_111 [0] : vector<32x95xf32> to vector<95xf32>
    %206 = vector.shape_cast %205 : vector<95xf32> to vector<1x95xf32>
    %cst_112 = arith.constant 3.200000e+01 : f32
    %207 = vector.broadcast %cst_112 : f32 to vector<1x95xf32>
    %208 = arith.divf %206, %207 : vector<1x95xf32>
    %209 = vector.broadcast %208 : vector<1x95xf32> to vector<32x95xf32>
    %210 = arith.subf %200, %209 : vector<32x95xf32>
    %211 = arith.mulf %210, %210 : vector<32x95xf32>
    %cst_113 = arith.constant dense<0.000000e+00> : vector<95xf32>
    %212 = vector.multi_reduction <add>, %211, %cst_113 [0] : vector<32x95xf32> to vector<95xf32>
    %213 = vector.shape_cast %212 : vector<95xf32> to vector<1x95xf32>
    %cst_114 = arith.constant 3.200000e+01 : f32
    %214 = vector.broadcast %cst_114 : f32 to vector<1x95xf32>
    %215 = arith.divf %213, %214 : vector<1x95xf32>
    %216 = vector.broadcast %208 : vector<1x95xf32> to vector<32x95xf32>
    %217 = arith.subf %200, %216 : vector<32x95xf32>
    %cst_115 = arith.constant 9.99999974E-6 : f32
    %218 = vector.broadcast %cst_115 : f32 to vector<1x95xf32>
    %219 = arith.addf %215, %218 : vector<1x95xf32>
    %220 = math.rsqrt %219 : vector<1x95xf32>
    %221 = vector.broadcast %220 : vector<1x95xf32> to vector<32x95xf32>
    %222 = arith.mulf %217, %221 : vector<32x95xf32>
    %223 = vector.broadcast %202 : vector<32x1xf32> to vector<32x95xf32>
    %224 = arith.mulf %222, %223 : vector<32x95xf32>
    %225 = vector.broadcast %204 : vector<32x1xf32> to vector<32x95xf32>
    %226 = arith.addf %224, %225 : vector<32x95xf32>
    %227 = arith.truncf %226 : vector<32x95xf32> to vector<32x95xbf16>
    %c0_116 = arith.constant 0 : index
    %c0_117 = arith.constant 0 : index
    %228 = vector.load %arg16[%c0_116, %c0_117] : memref<95x4096xbf16, #tpu.memory_space<vmem>>, vector<95x4096xbf16>
    %cst_118 = arith.constant dense<0.000000e+00> : vector<32x4096xf32>
    %229 = tpu.matmul %227, %228, %cst_118 {dimension_numbers = #tpu.dot_dimension_numbers<[1], [0], [0], [1], [0, 0, 1, 1], [], []>} : vector<32x95xbf16>, vector<95x4096xbf16>, vector<32x4096xf32> -> vector<32x4096xf32>
    %c0_119 = arith.constant 0 : index
    %c0_120 = arith.constant 0 : index
    %230 = vector.load %arg17[%c0_119, %c0_120] : memref<1x128xf32, #tpu.memory_space<vmem>>, vector<1x128xf32>
    %231 = vector.extract_strided_slice %229 {offsets = [0, 0], sizes = [1, 128], strides = [1, 1]} : vector<32x4096xf32> to vector<1x128xf32>
    %232 = arith.addf %230, %231 : vector<1x128xf32>
    %233 = vector.extract_strided_slice %229 {offsets = [1, 128], sizes = [1, 128], strides = [1, 1]} : vector<32x4096xf32> to vector<1x128xf32>
    %234 = arith.addf %232, %233 : vector<1x128xf32>
    %235 = vector.extract_strided_slice %229 {offsets = [2, 256], sizes = [1, 128], strides = [1, 1]} : vector<32x4096xf32> to vector<1x128xf32>
    %236 = arith.addf %234, %235 : vector<1x128xf32>
    %237 = vector.extract_strided_slice %229 {offsets = [3, 384], sizes = [1, 128], strides = [1, 1]} : vector<32x4096xf32> to vector<1x128xf32>
    %238 = arith.addf %236, %237 : vector<1x128xf32>
    %239 = vector.extract_strided_slice %229 {offsets = [4, 512], sizes = [1, 128], strides = [1, 1]} : vector<32x4096xf32> to vector<1x128xf32>
    %240 = arith.addf %238, %239 : vector<1x128xf32>
    %241 = vector.extract_strided_slice %229 {offsets = [5, 640], sizes = [1, 128], strides = [1, 1]} : vector<32x4096xf32> to vector<1x128xf32>
    %242 = arith.addf %240, %241 : vector<1x128xf32>
    %243 = vector.extract_strided_slice %229 {offsets = [6, 768], sizes = [1, 128], strides = [1, 1]} : vector<32x4096xf32> to vector<1x128xf32>
    %244 = arith.addf %242, %243 : vector<1x128xf32>
    %245 = vector.extract_strided_slice %229 {offsets = [7, 896], sizes = [1, 128], strides = [1, 1]} : vector<32x4096xf32> to vector<1x128xf32>
    %246 = arith.addf %244, %245 : vector<1x128xf32>
    %247 = vector.extract_strided_slice %229 {offsets = [8, 1024], sizes = [1, 128], strides = [1, 1]} : vector<32x4096xf32> to vector<1x128xf32>
    %248 = arith.addf %246, %247 : vector<1x128xf32>
    %249 = vector.extract_strided_slice %229 {offsets = [9, 1152], sizes = [1, 128], strides = [1, 1]} : vector<32x4096xf32> to vector<1x128xf32>
    %250 = arith.addf %248, %249 : vector<1x128xf32>
    %251 = vector.extract_strided_slice %229 {offsets = [10, 1280], sizes = [1, 128], strides = [1, 1]} : vector<32x4096xf32> to vector<1x128xf32>
    %252 = arith.addf %250, %251 : vector<1x128xf32>
    %253 = vector.extract_strided_slice %229 {offsets = [11, 1408], sizes = [1, 128], strides = [1, 1]} : vector<32x4096xf32> to vector<1x128xf32>
    %254 = arith.addf %252, %253 : vector<1x128xf32>
    %255 = vector.extract_strided_slice %229 {offsets = [12, 1536], sizes = [1, 128], strides = [1, 1]} : vector<32x4096xf32> to vector<1x128xf32>
    %256 = arith.addf %254, %255 : vector<1x128xf32>
    %257 = vector.extract_strided_slice %229 {offsets = [13, 1664], sizes = [1, 128], strides = [1, 1]} : vector<32x4096xf32> to vector<1x128xf32>
    %258 = arith.addf %256, %257 : vector<1x128xf32>
    %259 = vector.extract_strided_slice %229 {offsets = [14, 1792], sizes = [1, 128], strides = [1, 1]} : vector<32x4096xf32> to vector<1x128xf32>
    %260 = arith.addf %258, %259 : vector<1x128xf32>
    %261 = vector.extract_strided_slice %229 {offsets = [15, 1920], sizes = [1, 128], strides = [1, 1]} : vector<32x4096xf32> to vector<1x128xf32>
    %262 = arith.addf %260, %261 : vector<1x128xf32>
    %263 = vector.extract_strided_slice %229 {offsets = [16, 2048], sizes = [1, 128], strides = [1, 1]} : vector<32x4096xf32> to vector<1x128xf32>
    %264 = arith.addf %262, %263 : vector<1x128xf32>
    %265 = vector.extract_strided_slice %229 {offsets = [17, 2176], sizes = [1, 128], strides = [1, 1]} : vector<32x4096xf32> to vector<1x128xf32>
    %266 = arith.addf %264, %265 : vector<1x128xf32>
    %267 = vector.extract_strided_slice %229 {offsets = [18, 2304], sizes = [1, 128], strides = [1, 1]} : vector<32x4096xf32> to vector<1x128xf32>
    %268 = arith.addf %266, %267 : vector<1x128xf32>
    %269 = vector.extract_strided_slice %229 {offsets = [19, 2432], sizes = [1, 128], strides = [1, 1]} : vector<32x4096xf32> to vector<1x128xf32>
    %270 = arith.addf %268, %269 : vector<1x128xf32>
    %271 = vector.extract_strided_slice %229 {offsets = [20, 2560], sizes = [1, 128], strides = [1, 1]} : vector<32x4096xf32> to vector<1x128xf32>
    %272 = arith.addf %270, %271 : vector<1x128xf32>
    %273 = vector.extract_strided_slice %229 {offsets = [21, 2688], sizes = [1, 128], strides = [1, 1]} : vector<32x4096xf32> to vector<1x128xf32>
    %274 = arith.addf %272, %273 : vector<1x128xf32>
    %275 = vector.extract_strided_slice %229 {offsets = [22, 2816], sizes = [1, 128], strides = [1, 1]} : vector<32x4096xf32> to vector<1x128xf32>
    %276 = arith.addf %274, %275 : vector<1x128xf32>
    %277 = vector.extract_strided_slice %229 {offsets = [23, 2944], sizes = [1, 128], strides = [1, 1]} : vector<32x4096xf32> to vector<1x128xf32>
    %278 = arith.addf %276, %277 : vector<1x128xf32>
    %279 = vector.extract_strided_slice %229 {offsets = [24, 3072], sizes = [1, 128], strides = [1, 1]} : vector<32x4096xf32> to vector<1x128xf32>
    %280 = arith.addf %278, %279 : vector<1x128xf32>
    %281 = vector.extract_strided_slice %229 {offsets = [25, 3200], sizes = [1, 128], strides = [1, 1]} : vector<32x4096xf32> to vector<1x128xf32>
    %282 = arith.addf %280, %281 : vector<1x128xf32>
    %283 = vector.extract_strided_slice %229 {offsets = [26, 3328], sizes = [1, 128], strides = [1, 1]} : vector<32x4096xf32> to vector<1x128xf32>
    %284 = arith.addf %282, %283 : vector<1x128xf32>
    %285 = vector.extract_strided_slice %229 {offsets = [27, 3456], sizes = [1, 128], strides = [1, 1]} : vector<32x4096xf32> to vector<1x128xf32>
    %286 = arith.addf %284, %285 : vector<1x128xf32>
    %287 = vector.extract_strided_slice %229 {offsets = [28, 3584], sizes = [1, 128], strides = [1, 1]} : vector<32x4096xf32> to vector<1x128xf32>
    %288 = arith.addf %286, %287 : vector<1x128xf32>
    %289 = vector.extract_strided_slice %229 {offsets = [29, 3712], sizes = [1, 128], strides = [1, 1]} : vector<32x4096xf32> to vector<1x128xf32>
    %290 = arith.addf %288, %289 : vector<1x128xf32>
    %291 = vector.extract_strided_slice %229 {offsets = [30, 3840], sizes = [1, 128], strides = [1, 1]} : vector<32x4096xf32> to vector<1x128xf32>
    %292 = arith.addf %290, %291 : vector<1x128xf32>
    %293 = vector.extract_strided_slice %229 {offsets = [31, 3968], sizes = [1, 128], strides = [1, 1]} : vector<32x4096xf32> to vector<1x128xf32>
    %294 = arith.addf %292, %293 : vector<1x128xf32>
    %c0_121 = arith.constant 0 : index
    %c0_122 = arith.constant 0 : index
    %c0_123 = arith.constant 0 : index
    %295 = vector.load %arg18[%c0_121, %c0_122, %c0_123] : memref<1x1x128xf32, #tpu.memory_space<vmem>>, vector<1x1x128xf32>
    %296 = vector.shape_cast %295 : vector<1x1x128xf32> to vector<1x128xf32>
    %297 = vector.shape_cast %294 : vector<1x128xf32> to vector<1x1x128xf32>
    tpu.vector_store %arg18[%c0_121, %c0_122, %c0_123], %297 {strides = array<i32>} : memref<1x1x128xf32, #tpu.memory_space<vmem>>, vector<1x1x128xf32>,
    return
  }
  func.func @transform_0(%arg0: i32) -> (i32, i32, i32) {
    %c0_i32 = arith.constant 0 : i32
    %c0_i32_0 = arith.constant 0 : i32
    %c0_i32_1 = arith.constant 0 : i32
    return %arg0, %c0_i32, %c0_i32_0 : i32, i32, i32
  }
  func.func @transform_1(%arg0: i32) -> (i32, i32, i32) {
    %c0_i32 = arith.constant 0 : i32
    %c0_i32_0 = arith.constant 0 : i32
    %c0_i32_1 = arith.constant 0 : i32
    return %arg0, %c0_i32, %c0_i32_0 : i32, i32, i32
  }
  func.func @transform_2(%arg0: i32) -> (i32, i32) {
    %c0_i32 = arith.constant 0 : i32
    %c0_i32_0 = arith.constant 0 : i32
    %c0_i32_1 = arith.constant 0 : i32
    return %c0_i32, %c0_i32_0 : i32, i32
  }
  func.func @transform_3(%arg0: i32) -> (i32, i32, i32) {
    %c0_i32 = arith.constant 0 : i32
    %c0_i32_0 = arith.constant 0 : i32
    %c0_i32_1 = arith.constant 0 : i32
    %c0_i32_2 = arith.constant 0 : i32
    return %c0_i32, %c0_i32_0, %c0_i32_1 : i32, i32, i32
  }
  func.func @transform_4(%arg0: i32) -> (i32, i32, i32) {
    %c0_i32 = arith.constant 0 : i32
    %c0_i32_0 = arith.constant 0 : i32
    %c0_i32_1 = arith.constant 0 : i32
    %c0_i32_2 = arith.constant 0 : i32
    return %c0_i32, %c0_i32_0, %c0_i32_1 : i32, i32, i32
  }
  func.func @transform_5(%arg0: i32) -> (i32, i32, i32) {
    %c0_i32 = arith.constant 0 : i32
    %c0_i32_0 = arith.constant 0 : i32
    %c0_i32_1 = arith.constant 0 : i32
    %c0_i32_2 = arith.constant 0 : i32
    return %c0_i32, %c0_i32_0, %c0_i32_1 : i32, i32, i32
  }
  func.func @transform_6(%arg0: i32) -> (i32, i32, i32) {
    %c0_i32 = arith.constant 0 : i32
    %c0_i32_0 = arith.constant 0 : i32
    %c0_i32_1 = arith.constant 0 : i32
    %c0_i32_2 = arith.constant 0 : i32
    return %c0_i32, %c0_i32_0, %c0_i32_1 : i32, i32, i32
  }
  func.func @transform_7(%arg0: i32) -> (i32, i32, i32) {
    %c0_i32 = arith.constant 0 : i32
    %c0_i32_0 = arith.constant 0 : i32
    %c0_i32_1 = arith.constant 0 : i32
    %c0_i32_2 = arith.constant 0 : i32
    return %c0_i32, %c0_i32_0, %c0_i32_1 : i32, i32, i32
  }
  func.func @transform_8(%arg0: i32) -> (i32, i32, i32) {
    %c0_i32 = arith.constant 0 : i32
    %c0_i32_0 = arith.constant 0 : i32
    %c0_i32_1 = arith.constant 0 : i32
    %c0_i32_2 = arith.constant 0 : i32
    return %c0_i32, %c0_i32_0, %c0_i32_1 : i32, i32, i32
  }
  func.func @transform_9(%arg0: i32) -> (i32, i32, i32) {
    %c0_i32 = arith.constant 0 : i32
    %c0_i32_0 = arith.constant 0 : i32
    %c0_i32_1 = arith.constant 0 : i32
    %c0_i32_2 = arith.constant 0 : i32
    return %c0_i32, %c0_i32_0, %c0_i32_1 : i32, i32, i32
  }
  func.func @transform_10(%arg0: i32) -> (i32, i32, i32) {
    %c0_i32 = arith.constant 0 : i32
    %c0_i32_0 = arith.constant 0 : i32
    %c0_i32_1 = arith.constant 0 : i32
    %c0_i32_2 = arith.constant 0 : i32
    return %c0_i32, %c0_i32_0, %c0_i32_1 : i32, i32, i32
  }
  func.func @transform_11(%arg0: i32) -> (i32, i32, i32) {
    %c0_i32 = arith.constant 0 : i32
    %c0_i32_0 = arith.constant 0 : i32
    %c0_i32_1 = arith.constant 0 : i32
    %c0_i32_2 = arith.constant 0 : i32
    return %c0_i32, %c0_i32_0, %c0_i32_1 : i32, i32, i32
  }
  func.func @transform_12(%arg0: i32) -> (i32, i32, i32) {
    %c0_i32 = arith.constant 0 : i32
    %c0_i32_0 = arith.constant 0 : i32
    %c0_i32_1 = arith.constant 0 : i32
    %c0_i32_2 = arith.constant 0 : i32
    return %c0_i32, %c0_i32_0, %c0_i32_1 : i32, i32, i32
  }
  func.func @transform_13(%arg0: i32) -> (i32, i32, i32) {
    %c0_i32 = arith.constant 0 : i32
    %c0_i32_0 = arith.constant 0 : i32
    %c0_i32_1 = arith.constant 0 : i32
    %c0_i32_2 = arith.constant 0 : i32
    return %c0_i32, %c0_i32_0, %c0_i32_1 : i32, i32, i32
  }
  func.func @transform_14(%arg0: i32) -> (i32, i32, i32) {
    %c0_i32 = arith.constant 0 : i32
    %c0_i32_0 = arith.constant 0 : i32
    %c0_i32_1 = arith.constant 0 : i32
    %c0_i32_2 = arith.constant 0 : i32
    return %c0_i32, %c0_i32_0, %c0_i32_1 : i32, i32, i32
  }
  func.func @transform_15(%arg0: i32) -> (i32, i32) {
    %c0_i32 = arith.constant 0 : i32
    %c0_i32_0 = arith.constant 0 : i32
    %c0_i32_1 = arith.constant 0 : i32
    return %c0_i32, %c0_i32_0 : i32, i32
  }
  func.func @transform_16(%arg0: i32) -> (i32, i32) {
    %c0_i32 = arith.constant 0 : i32
    %c0_i32_0 = arith.constant 0 : i32
    %c0_i32_1 = arith.constant 0 : i32
    return %c0_i32, %c0_i32_0 : i32, i32
  }
  func.func @transform_17(%arg0: i32) -> (i32, i32, i32) {
    %c0_i32 = arith.constant 0 : i32
    %c0_i32_0 = arith.constant 0 : i32
    %c0_i32_1 = arith.constant 0 : i32
    return %arg0, %c0_i32, %c0_i32_0 : i32, i32, i32
  }
}

</mosaic_0001>

<bundles_post_ra>
// kernel: tpu_custom_call.1
= control target key start
LH: loop header
LB: loop body
LE: loop exit
PB: predicated region body
PF: predicated region fallthrough
CT: control target
= control target key end

     0   :  { %s13357_s0 = inlined_call_operand.vmem [shape: s32[2,1,95], index: 0, kind: input, shape index: {}]   ;;  %s13358_s1 = inlined_call_operand.vmem [shape: f32[256,32,1], index: 1, kind: input, shape index: {}]   ;;  %s13359_s2 = inlined_call_operand.vmem [shape: f32[32,128], index: 2, kind: input, shape index: {}]   ;;  %s13360_s3 = inlined_call_operand.vmem [shape: bf16[2,96,32], index: 3, kind: input, shape index: {}]   ;;  %s13361_s4 = inlined_call_operand.vmem [shape: f32[2,96,1], index: 4, kind: input, shape index: {}]   ;;  %s13362_s5 = inlined_call_operand.vmem [shape: bf16[2,32,32], index: 5, kind: input, shape index: {}]   ;;  %s13363_s6 = inlined_call_operand.vmem [shape: f32[2,32,1], index: 6, kind: input, shape index: {}]   ;;  %s13364_s7 = inlined_call_operand.vmem [shape: f32[2,32,1], index: 7, kind: input, shape index: {}]   ;;  %s13365_s8 = inlined_call_operand.vmem [shape: f32[2,32,1], index: 8, kind: input, shape index: {}]   ;;  %s13366_s9 = inlined_call_operand.vmem [shape: bf16[2,64,32], index: 9, kind: input, shape index: {}]   ;;  %s13367_s10 = inlined_call_operand.vmem [shape: f32[2,64,1], index: 10, kind: input, shape index: {}]   ;;  %s13368_s11 = inlined_call_operand.vmem [shape: bf16[2,32,64], index: 11, kind: input, shape index: {}]   ;;  %s13369_s12 = inlined_call_operand.vmem [shape: f32[2,32,1], index: 12, kind: input, shape index: {}]   ;;  %s13370_s13 = inlined_call_operand.vmem [shape: f32[2,32,1], index: 13, kind: input, shape index: {}]   ;;  %s13371_s14 = inlined_call_operand.vmem [shape: f32[2,32,1], index: 14, kind: input, shape index: {}]   ;;  %s13372_s15 = inlined_call_operand.vmem [shape: bf16[95,4096], index: 15, kind: input, shape index: {}]   ;;  %s13373_s16 = inlined_call_operand.vmem [shape: f32[1,128], index: 16, kind: input, shape index: {}]   ;;  %s13374_s17 = inlined_call_operand.hbm [shape: f32[2,1,128], index: 17, kind: output, shape index: {}]  }
   0x1   :  { %13394 = sst [smem:[#allocation19_spill]] %s13357_s0 }
   0x2   :  { %13395 = sst [smem:[#allocation20_spill]] %s13358_s1 }
   0x3   :  { %13396 = sst [smem:[#allocation21_spill]] %s13359_s2 }
   0x4   :  { %13397 = sst [smem:[#allocation22_spill]] %s13360_s3 }
   0x5   :  { %13398 = sst [smem:[#allocation23_spill]] %s13361_s4 }
   0x6   :  { %22 = vsyncpa [#allocation3], 0 }
   0x7   :  { %24 = vsyncpa [#allocation3 + $0x1], 0  ;;  %s10606_s24 = smov 0   ;;  %s10608_s25 = smov 0  }
   0x8   :  { %s10610_s26 = smov 0   ;;  %s10612_s27 = smov 0  }
   0x9 LB: > { %13399 = sst [smem:[#allocation5_spill]] %s10502_s26  ;;  %s10627_s28 = sadd.s32 4294967295, %s10506_s27   ;;  %s10506_s27 = sphi %s10612_s27, %s13465_s27   ;;  %s10502_s26 = sphi %s10610_s26, %s13467_s26   ;;  %s10498_s25 = sphi %s10608_s25, %s13469_s25   ;;  %s10494_s24 = sphi %s10606_s24, %s13468_s24  }
   0xa   : > { %s8369_s29 = sadd.s32 4294967294, %s10506_s27   ;;  %s10631_s0 = sadd.s32 1, %s10506_s27  }
   0xb   : > { %13400 = sst [smem:[#allocation6_spill]] %s10631_s0  ;;  %s404_s30 = sadd.s32 1, %s10502_s26 }
   0xc   : > { %s401_s18 = ssub.s32 %s10506_s27, %s10631_s0  ;;  %p414_p0 = scmp.ne.s32.totalorder %s10502_s26, %s10498_s25 }
   0xd   : > { %p402_p1 = scmp.eq.s32.totalorder %s401_s18, 0  ;;  %p415_p2 = scmp.eq.s32.totalorder %s10627_s28, 1 }
   0xe   : > { %p420_p3 = scmp.ne.s32.totalorder %s10498_s25, %s10494_s24  ;;  %p421_p4 = scmp.eq.s32.totalorder %s8369_s29, 1 }
   0xf   : > { %s10642_s19 = scalar_select %p402_p1, %s10502_s26, %s404_s30  }
  0x10   : > { %p10644_p5 = por %p415_p2, %p414_p0  ;;  %p10648_p6 = por %p421_p4, %p420_p3 }
  0x11   : > { %13401 = sst [smem:[#allocation7_spill]] %s10642_s19  ;;  %p8372_p7 = scmp.ge.s32.totalorder %s10506_s27, 1 }
  0x12   : > { %p498_p8 = scmp.lt.s32.totalorder %s10506_s27, 3 }
  0x14   : > { %p499_p9 = pnand %p8372_p7, %p498_p8 }
  0x16   : > { %502 = sbr.rel (%p499_p9) target bundleno = 4881 (0x1311), region = 88 }
  0x1d   : > { %p552_p10 = scmp.lt.s32.totalorder %s10627_s28, 1  ;;  %v562_v0 = vlaneseq  ;;  %s13404_s2 = sld [smem:[#allocation21_spill]]  ;;  %v13376_v3 = vmov 0   ;;  %v10509_v14 = vmov 1.0|1.0  }
  0x1e   : > { %p555_p11 = scmp.lt.s32.totalorder %s10627_s28, 255  ;;  %10022 = vset.pattern.permute.xlu0 %v13376_v3  ;;  %10023 = vset.pattern.permute.xlu1 %v13376_v3  ;;  %s13406_s19 = sld [smem:[#allocation19_spill]] }
  0x1f   : > { %s553_s23 = scalar_select %p552_p10, %s10627_s28, 1  ;;  %v10660_v2 = vshrl.u32 %v562_v0, 7 }
  0x20   : > { %s556_s29 = scalar_select %p555_p11, %s10627_s28, 255 }
  0x21   : > { %13405 = vst [vmem:[#allocation8_spill] sm:$0xff] %v10660_v2  ;;  %v564_v4 = vadd.s32 8, %v10660_v2  ;;  %v565_v5 = vadd.s32 16, %v10660_v2  ;;  %v566_v6 = vadd.s32 24, %v10660_v2  ;;  %v567_v7 = vadd.s32 32, %v10660_v2  ;;  %s13412_s4 = sld [smem:[#allocation23_spill]] }
  0x22   : > { %v568_v9 = vadd.s32 40, %v10660_v2  ;;  %v569_v10 = vadd.s32 48, %v10660_v2  ;;  %v570_v11 = vadd.s32 56, %v10660_v2  ;;  %s8963_s21 = sshll.u32 %s556_s29, 5  ;;  %v571_v16 = vadd.s32 64, %v10660_v2  ;;  %s13421_s3 = sld [smem:[#allocation22_spill]] }
  0x23   : > { %v631_v1 = vld [vmem:[%s13404_s2] sm:$0xff]  ;;  %v572_v17 = vadd.s32 72, %v10660_v2  ;;  %v573_v18 = vadd.s32 80, %v10660_v2  ;;  %v574_v19 = vadd.s32 88, %v10660_v2  ;;  %v575_v24 = vadd.s32 96, %v10660_v2  ;;  %v632_v37 = vld [vmem:[%s13404_s2 + $0x8] sm:$0xff] }
  0x24   : > { %9272 = vmatprep.mubr.f32.mxu0 %v631_v1  ;;  %s554_s26 = scalar_lea.vmem %s13406_s19, %s553_s23  ;;  %v576_v25 = vadd.s32 104, %v10660_v2  ;;  %v577_v29 = vadd.s32 112, %v10660_v2  ;;  %v578_v30 = vadd.s32 120, %v10660_v2  ;;  %v633_v38 = vld [vmem:[%s13404_s2 + $0x10] sm:$0xff]  ;;  %v634_v39 = vld [vmem:[%s13404_s2 + $0x18] sm:$0xff]  ;;  %s550_s18 = sand.u32 1, %s10498_s25  }
  0x25   : > { %v10672_v8 = vld [vmem:[%s554_s26] ss:$0 sm:$0xff]  ;;  %s13407_s26 = sld [smem:[#allocation20_spill]]  ;;  %s551_s19 = scalar_lea.vmem [#allocation2], %s550_s18 }
  0x26   : > { %vm583_vm0 = vcmp.eq.s32.totalorder %v10660_v2, %v10672_v8  ;;  %vm584_vm1 = vcmp.eq.s32.totalorder %v564_v4, %v10672_v8  ;;  %vm585_vm2 = vcmp.eq.s32.totalorder %v565_v5, %v10672_v8  ;;  %vm586_vm3 = vcmp.eq.s32.totalorder %v566_v6, %v10672_v8  ;;  %s8305_s22 = sshll.u32 %s551_s19, 4  ;;  %s8293_s0 = scalar_lea.sflag [#allocation3], %s550_s18  ;;  %s13317_s22 = int_to_ptr.vmem [resolvable:$true] %s8305_s22 }
  0x27   : > { %vm9750_vm4 = vmpackc.low %vm584_vm1, %vm583_vm0  ;;  %vm587_vm5 = vcmp.eq.s32.totalorder %v567_v7, %v10672_v8  ;;  %vm588_vm6 = vcmp.eq.s32.totalorder %v568_v9, %v10672_v8  ;;  %vm589_vm8 = vcmp.eq.s32.totalorder %v569_v10, %v10672_v8  ;;  %vm590_vm9 = vcmp.eq.s32.totalorder %v570_v11, %v10672_v8  ;;  %v758_v23 = vld [vmem:[%s13412_s4] sm:$0xff]  ;;  %v759_v26 = vld [vmem:[%s13412_s4 + $0x8] sm:$0xff]  ;;  %s10444_s29 = scalar_lea.vmem %s13317_s22, 16 }
  0x28   : > { %9751 = vmatprep.subr.msk.bf16.mxu0 %vm9750_vm4, %v10509_v14  ;;  %vm10687_vm7 = vmpackc.low %vm586_vm3, %vm585_vm2  ;;  %vm591_vm11 = vcmp.eq.s32.totalorder %v571_v16, %v10672_v8  ;;  %vm592_vm12 = vcmp.eq.s32.totalorder %v572_v17, %v10672_v8  ;;  %vm593_vm13 = vcmp.eq.s32.totalorder %v573_v18, %v10672_v8  ;;  %vm594_vm14 = vcmp.eq.s32.totalorder %v574_v19, %v10672_v8  ;;  %v762_v32 = vld [vmem:[%s13412_s4 + $0x20] sm:$0xff]  ;;  %v763_v33 = vld [vmem:[%s13412_s4 + $0x28] sm:$0xff]  ;;  %p10445_p12 = scmp.ne.s32.totalorder %s13317_s22, %s10444_s29 }
  0x29   : > { %9753 = vmatpush3.bf16.msk.msra.mxu0 %vm9750_vm4, %v10509_v14  ;;  %vm10703_vm10 = vmpackc.low %vm588_vm6, %vm587_vm5  ;;  %vm595_vm2 = vcmp.eq.s32.totalorder %v575_v24, %v10672_v8  ;;  %vm596_vm3 = vcmp.eq.s32.totalorder %v576_v25, %v10672_v8  ;;  %v760_v35 = vld [vmem:[%s13412_s4 + $0x10] sm:$0xff]  ;;  %v761_v36 = vld [vmem:[%s13412_s4 + $0x18] sm:$0xff]  ;;  %vm597_vm5 = vcmp.eq.s32.totalorder %v577_v29, %v10672_v8  ;;  %vm598_vm6 = vcmp.eq.s32.totalorder %v578_v30, %v10672_v8 }
  0x2a   : > { %9755 = vmatprep.subr.msk.bf16.mxu0 %vm10687_vm7, %v10509_v14  ;;  %vm10721_vm15 = vmpackc.low %vm590_vm9, %vm589_vm8  ;;  %v10024_v40 = vld [vmem:[%s13421_s3] sm:$0xff]   ;;  %vm860_vm8 = vcmask 261120   ;;  %v10025_v55 = vld [vmem:[%s13421_s3 + $0x8] sm:$0xff]   ;;  %vm992_vm9 = vcmask 64512   ;;  %p10446_p13 = pnand %p10445_p12, %p10644_p5 }
  0x2b   : > { %s559_s23 = scalar_lea.vmem %s13407_s26, %s8963_s21  ;;  %vm10727_vm0 = vmpackc.low %vm592_vm12, %vm591_vm11  ;;  %9282 = vmatprep.mubr.msk.bf16.mxu1 %vm860_vm8, %v10024_v40  ;;  %v10026_v56 = vld [vmem:[%s13421_s3 + $0x10] sm:$0xff]   ;;  %v10027_v57 = vld [vmem:[%s13421_s3 + $0x18] sm:$0xff]   ;;  %vm1767_vm11 = vcmask 776192   ;;  %vm10511_vm12 = vmmov 0   ;;  %s8960_s21 = sshll.u32 %s10627_s28, 4 }
  0x2c   : > { %v635_v12 = vld [vmem:[%s559_s23] sm:$0xff]  ;;  %v637_v13 = vld [vmem:[%s559_s23 + $0x10] sm:$0xff]  ;;  %v636_v20 = vld [vmem:[%s559_s23 + $0x8] sm:$0xff]  ;;  %s13315_s2 = scalar_lea.hbm %s13374_s17, %s8960_s21  ;;  %p10447_p0 = pneg %p10446_p13 }
  0x2d   : > { %641 = vperm.xlu0 %10022, %v635_v12   ;;  %651 = vperm.xlu1 %10023, %v637_v13   ;;  %v638_v21 = vld [vmem:[%s559_s23 + $0x18] sm:$0xff]  ;;  %vm10733_vm1 = vmpackc.low %vm594_vm14, %vm593_vm13  ;;  %v10028_v58 = vld [vmem:[%s13421_s3 + $0x20] sm:$0xff]   ;;  %vm3102_vm14 = vcmask 523264   ;;  %s10515_s28 = smov [#allocation2]  }
  0x2e   : > { %9757 = vmatpush3.bf16.msk.msra.mxu0 %vm10687_vm7, %v10509_v14  ;;  %vm10749_vm4 = vmpackc.low %vm596_vm3, %vm595_vm2  ;;  %v10029_v59 = vld [vmem:[%s13421_s3 + $0x28] sm:$0xff]   ;;  %v764_v15 = vld [vmem:[%s13412_s4 + $0x30] sm:$0xff]  ;;  %s10448_s30 = sshll.u32 %s10515_s28, 4  ;;  %s10449_s30 = int_to_ptr.vmem [resolvable:$false] %s10448_s30 }
  0x2f   : > { %9759 = vmatprep.subr.msk.bf16.mxu0 %vm10703_vm10, %v10509_v14  ;;  %vm9778_vm7 = vmpackc.low %vm598_vm6, %vm597_vm5  ;;  %p10451_p1 = scmp.lt.s32.totalorder %s13317_s22, %s10449_s30 }
  0x31   : > { %646 = vperm.xlu0 %10022, %v636_v20   ;;  %656 = vperm.xlu1 %10023, %v638_v21  }
  0x32   : > { %9761 = vmatpush3.bf16.msk.msra.mxu0 %vm10703_vm10, %v10509_v14  ;;  %vm1733_vm10 = vcmask 777216  }
  0x33   : > { %9763 = vmatprep.subr.msk.bf16.mxu0 %vm10721_vm15, %v10509_v14  ;;  %vm11341_vm13 = vmpackc.low %vm1733_vm10, %vm1733_vm10 }
  0x35   : > { %772 = vperm.xlu0 %10022, %v758_v23   ;;  %777 = vperm.xlu1 %10023, %v759_v26  }
  0x36   : > { %9765 = vmatpush3.bf16.msk.msra.mxu0 %vm10721_vm15, %v10509_v14  ;;  %vm6910_vm15 = vcmask 1046528  }
  0x37   : > { %9767 = vmatprep.subr.msk.bf16.mxu0 %vm10727_vm0, %v10509_v14 }
  0x39   : > { %792 = vperm.xlu0 %10022, %v762_v32   ;;  %797 = vperm.xlu1 %10023, %v763_v33  }
  0x3a   : > { %9769 = vmatpush3.bf16.msk.msra.mxu0 %vm10727_vm0, %v10509_v14  ;;  %vm6911_vm0 = vcmask 1047552  }
  0x3b   : > { %9771 = vmatprep.subr.msk.bf16.mxu0 %vm10733_vm1, %v10509_v14 }
  0x3d   : > { %782 = vperm.xlu0 %10022, %v760_v35   ;;  %787 = vperm.xlu1 %10023, %v761_v36  }
  0x3e   : > { %9773 = vmatpush3.bf16.msk.msra.mxu0 %vm10733_vm1, %v10509_v14 }
  0x3f   : > { %9775 = vmatprep.subr.msk.bf16.mxu0 %vm10749_vm4, %v10509_v14 }
  0x42   : > { %9777 = vmatpush3.bf16.msk.msra.mxu0 %vm10749_vm4, %v10509_v14 }
  0x43   : > { %9779 = vmatprep.subr.msk.bf16.mxu0 %vm9778_vm7, %v10509_v14 }
  0x46   : > { %9781 = vmatpush3.bf16.msk.msra.mxu0 %vm9778_vm7, %v10509_v14  ;;  %v765_v14 = vld [vmem:[%s13412_s4 + $0x38] sm:$0xff] }
  0x49   : > { %9273 = vmatmul.mubr.f32.vlgmr.msra.gmra.mrb[0].mxu0 %v632_v37 }
  0x4a   : > { %9275 = vmatprep.mubr.f32.mxu0 %v633_v38 }
  0x4d   : > { %9276 = vmatmul.mubr.f32.gmra.mrb[2].mxu0 %v634_v39 }
  0xac   : > { %v642_v41 = vpop.permute.xlu0 %641  ;;  %v652_v42 = vpop.permute.xlu1 %651 }
  0xb0   : > { %v647_v43 = vpop.permute.xlu0 %646  ;;  %v657_v48 = vpop.permute.xlu1 %656 }
  0xb4   : > { %v773_v61 = vpop.permute.xlu0 %772  ;;  %v778_v1 = vpop.permute.xlu1 %777 }
  0xb8   : > { %v793_v7 = vpop.permute.xlu0 %792  ;;  %v798_v11 = vpop.permute.xlu1 %797 }
  0xbc   : > { %v783_v16 = vpop.permute.xlu0 %782  ;;  %v788_v18 = vpop.permute.xlu1 %787 }
 0x11c   : > { %v9274_v44 = vpop.f32.mrb[0].mxu0 }
 0x11d   : > { %v10788_v45 = vadd.f32 %v9274_v44, %v647_v43  ;;  %v725_v46 = vpop.f32.mrb[1].mxu0 }
 0x11e   : > { %v10790_v47 = vadd.f32 %v725_v46, %v642_v41 }
 0x11f   : > { %13422 = vst [vmem:[#allocation9_spill] sm:$0xff] %v10788_v45 }
 0x120   : > { %13423 = vst [vmem:[#allocation10_spill] sm:$0xff] %v10790_v47  ;;  %v9277_v49 = vpop.f32.mrb[2].mxu0  ;;  %v744_v50 = vpack.c.bf16 %v10788_v45, %v10790_v47 }
 0x121   : > { %v10794_v51 = vadd.f32 %v9277_v49, %v657_v48  ;;  %v735_v52 = vpop.f32.mrb[3].mxu0  ;;  %v766_v48 = vld [vmem:[%s13412_s4 + $0x40] sm:$0xff] }
 0x122   : > { %v10796_v53 = vadd.f32 %v735_v52, %v652_v42  ;;  %9278 = vmatprep.subr.bf16.mxu1 %v744_v50  ;;  %v767_v52 = vld [vmem:[%s13412_s4 + $0x48] sm:$0xff] }
 0x123   : > { %13424 = vst [vmem:[#allocation11_spill] sm:$0xff] %v10794_v51  ;;  %9279 = vmatpush3.bf16.msra.mxu1 %v744_v50 }
 0x124   : > { %13425 = vst [vmem:[#allocation12_spill] sm:$0xff] %v10796_v53  ;;  %v745_v54 = vpack.c.bf16 %v10794_v51, %v10796_v53 }
 0x126   : > { %9280 = vmatprep.subr.bf16.mxu1 %v745_v54 }
 0x127   : > { %9281 = vmatpush3.bf16.msra.mxu1 %v745_v54 }
 0x12a   : > { %9283 = vmatmul.mubr.msk.bf16.vlgmr.msra.gmra.mrb[0].mxu1 %vm860_vm8, %v10025_v55 }
 0x12b   : > { %9286 = vmatprep.mubr.msk.bf16.mxu1 %vm860_vm8, %v10026_v56 }
 0x132   : > { %9287 = vmatmul.mubr.msk.bf16.gmra.mrb[4].mxu1 %vm860_vm8, %v10027_v57 }
 0x133   : > { %9290 = vmatprep.mubr.msk.bf16.mxu1 %vm860_vm8, %v10028_v58 }
 0x13a   : > { %9291 = vmatmul.mubr.msk.bf16.gmra.mrb[8].mxu1 %vm860_vm8, %v10029_v59 }
 0x1fd   : > { %v9284_v60 = vpop.f32.mrb[0].mxu1 }
 0x1fe   : > { %v913_v62 = vpop.f32.mrb[1].mxu1  ;;  %v922_v17 = vadd.f32 %v9284_v60, %v783_v16 }
 0x1ff   : > { %v914_v63 = vadd.f32 %v913_v62, %v773_v61  ;;  %v9285_v0 = vpop.f32.mrb[2].mxu1 }
 0x200   : > { %v916_v4 = vpop.f32.mrb[3].mxu1  ;;  %v925_v19 = vadd.f32 %v9285_v0, %v788_v18 }
 0x201   : > { %v917_v5 = vadd.f32 %v916_v4, %v778_v1  ;;  %960 = vxpose.xlu0.b32.start.end [1/1] (short) (narrow) %v914_v63, 96 }
 0x203   : > { %1154 = vxpose.xlu1.b32.start.end [1/1] (short) (narrow) %v917_v5, 96 }
 0x205   : > { %v10820_v6 = vpop.f32.mrb[4].mxu1 }
 0x206   : > { %v929_v8 = vpop.f32.mrb[5].mxu1 }
 0x207   : > { %v930_v9 = vadd.f32 %v929_v8, %v793_v7  ;;  %v10822_v10 = vpop.f32.mrb[6].mxu1 }
 0x208   : > { %v932_v12 = vpop.f32.mrb[7].mxu1 }
 0x209   : > { %v933_v13 = vadd.f32 %v932_v12, %v798_v11  ;;  %9294 = vmatprep.subr.mxu0 %v930_v9  ;;  %9974 = vmatprep.subr.mxu1 %v930_v9 }
 0x20a   : > { %9295 = vmatpush3.msra.mxu0 %v930_v9  ;;  %9975 = vmatpush3.msra.mxu1 %v930_v9 }
 0x20b   : > { %9314 = vmatprep.subr.mxu0 %v933_v13 }
 0x20d   : > { %v10852_v42 = vpop.f32.mrb[8].mxu1 }
 0x20e   : > { %13426 = vst [vmem:[#allocation13_spill] sm:$0xff] %v10852_v42  ;;  %v10854_v44 = vpop.f32.mrb[9].mxu1 }
 0x20f   : > { %v10861_v49 = vpop.f32.mrb[10].mxu1 }
 0x210   : > { %13427 = vst [vmem:[#allocation14_spill] sm:$0xff] %v10861_v49  ;;  %v10863_v50 = vpop.f32.mrb[11].mxu1 }
 0x211   : > { %13428 = vst [vmem:[#allocation15_spill] sm:$0xff] %v10863_v50 }
 0x24d   : > { %807 = vperm.xlu1 %10023, %v765_v14  }
 0x256   : > { %802 = vperm.xlu0 %10022, %v764_v15  }
 0x274   : > { %1347 = vxpose.xlu0.b32.start.end [1/1] (short) (narrow) %v922_v17, 96 }
 0x276   : > { %1540 = vxpose.xlu1.b32.start.end [1/1] (short) (narrow) %v925_v19, 96 }
 0x281   : > { %v976_v20 = vpop.trf.xlu0 }
 0x282   : > { %9296 = vmatprep.mubr.msk.f32.mxu0 %vm992_vm9, %v976_v20 }
 0x283   : > { %v1170_v21 = vpop.trf.xlu1 }
 0x285   : > { %v977_v22 = vpop.trf.xlu0 }
 0x286   : > { %9297 = vmatmul.mubr.msk.f32.vlgmr.msra.gmra.mrb[4].mxu0 %vm992_vm9, %v977_v22 }
 0x287   : > { %9315 = vmatpush3.msra.mxu0 %v933_v13  ;;  %v1171_v23 = vpop.trf.xlu1  ;;  %9316 = vmatprep.mubr.msk.f32.mxu0 %vm992_vm9, %v1170_v21 }
 0x289   : > { %v978_v24 = vpop.trf.xlu0 }
 0x28a   : > { %9317 = vmatmul.mubr.msk.f32.vlgmr.msra.gmra.mrb[6].mxu0 %vm992_vm9, %v1171_v23  ;;  %9299 = vmatprep.mubr.msk.f32.mxu1 %vm992_vm9, %v978_v24 }
 0x28b   : > { %v1172_v25 = vpop.trf.xlu1 }
 0x28c   : > { %9319 = vmatprep.mubr.msk.f32.mxu0 %vm992_vm9, %v1172_v25 }
 0x28d   : > { %v979_v26 = vpop.trf.xlu0 }
 0x28e   : > { %9300 = vmatmul.mubr.msk.f32.vlgmr.msra.gmra.mrb[12].mxu1 %vm992_vm9, %v979_v26 }
 0x28f   : > { %v1173_v27 = vpop.trf.xlu1 }
 0x290   : > { %9320 = vmatmul.mubr.msk.f32.gmra.mrb[8].mxu0 %vm992_vm9, %v1173_v27 }
 0x291   : > { %v980_v28 = vpop.trf.xlu0 }
 0x292   : > { %9302 = vmatprep.mubr.msk.f32.mxu1 %vm992_vm9, %v980_v28 }
 0x293   : > { %v1174_v29 = vpop.trf.xlu1 }
 0x294   : > { %9322 = vmatprep.mubr.msk.f32.mxu0 %vm992_vm9, %v1174_v29 }
 0x295   : > { %v981_v30 = vpop.trf.xlu0 }
 0x296   : > { %9303 = vmatmul.mubr.msk.f32.gmra.mrb[14].mxu1 %vm992_vm9, %v981_v30 }
 0x297   : > { %v1175_v31 = vpop.trf.xlu1 }
 0x298   : > { %9323 = vmatmul.mubr.msk.f32.gmra.mrb[10].mxu0 %vm992_vm9, %v1175_v31 }
 0x299   : > { %v982_v32 = vpop.trf.xlu0 }
 0x29a   : > { %9305 = vmatprep.mubr.msk.f32.mxu1 %vm992_vm9, %v982_v32 }
 0x29b   : > { %v1176_v33 = vpop.trf.xlu1 }
 0x29c   : > { %9325 = vmatprep.mubr.msk.f32.mxu0 %vm992_vm9, %v1176_v33 }
 0x29d   : > { %v983_v34 = vpop.trf.xlu0 }
 0x29e   : > { %9306 = vmatmul.mubr.msk.f32.gmra.mrb[16].mxu1 %vm992_vm9, %v983_v34 }
 0x29f   : > { %v1177_v35 = vpop.trf.xlu1 }
 0x2a0   : > { %9326 = vmatmul.mubr.msk.f32.gmra.mrb[12].mxu0 %vm992_vm9, %v1177_v35 }
 0x2a1   : > { %v984_v36 = vpop.trf.xlu0 }
 0x2a2   : > { %9308 = vmatprep.mubr.msk.f32.mxu1 %vm992_vm9, %v984_v36 }
 0x2a3   : > { %v1178_v37 = vpop.trf.xlu1 }
 0x2a4   : > { %9328 = vmatprep.mubr.msk.f32.mxu0 %vm992_vm9, %v1178_v37 }
 0x2a5   : > { %v985_v38 = vpop.trf.xlu0 }
 0x2a6   : > { %9309 = vmatmul.mubr.msk.f32.gmra.mrb[18].mxu1 %vm992_vm9, %v985_v38 }
 0x2a7   : > { %v1179_v39 = vpop.trf.xlu1 }
 0x2a8   : > { %9329 = vmatmul.mubr.msk.f32.gmra.mrb[14].mxu0 %vm992_vm9, %v1179_v39 }
 0x2a9   : > { %v986_v40 = vpop.trf.xlu0 }
 0x2aa   : > { %9311 = vmatprep.mubr.msk.f32.mxu1 %vm992_vm9, %v986_v40 }
 0x2ab   : > { %v1180_v41 = vpop.trf.xlu1 }
 0x2ac   : > { %9331 = vmatprep.mubr.msk.f32.mxu0 %vm992_vm9, %v1180_v41 }
 0x2ad   : > { %v987_v43 = vpop.trf.xlu0 }
 0x2ae   : > { %9312 = vmatmul.mubr.msk.f32.gmra.mrb[20].mxu1 %vm992_vm9, %v987_v43 }
 0x2af   : > { %v1181_v46 = vpop.trf.xlu1 }
 0x2b0   : > { %9332 = vmatmul.mubr.msk.f32.gmra.mrb[16].mxu0 %vm992_vm9, %v1181_v46 }
 0x2c0   : > { %812 = vperm.xlu1 %10023, %v766_v48  }
 0x2c9   : > { %817 = vperm.xlu0 %10022, %v767_v52  }
 0x2cc   : > { %v808_v54 = vpop.permute.xlu1 %807 }
 0x2cd   : > { %v941_v55 = vadd.f32 %v10822_v10, %v808_v54 }
 0x2cf   : > { %9354 = vmatprep.subr.mxu0 %v941_v55 }
 0x2d0   : > { %9355 = vmatpush3.msra.mxu0 %v941_v55 }
 0x2d5   : > { %v803_v56 = vpop.permute.xlu0 %802 }
 0x2d6   : > { %v938_v57 = vadd.f32 %v10820_v6, %v803_v56 }
 0x2d8   : > { %9334 = vmatprep.subr.mxu1 %v938_v57 }
 0x2d9   : > { %9335 = vmatpush3.msra.mxu1 %v938_v57 }
 0x2f4   : > { %v1363_v58 = vpop.trf.xlu0 }
 0x2f5   : > { %9336 = vmatprep.mubr.msk.f32.mxu1 %vm992_vm9, %v1363_v58 }
 0x2f6   : > { %v1556_v59 = vpop.trf.xlu1 }
 0x2f7   : > { %9356 = vmatprep.mubr.msk.f32.mxu0 %vm992_vm9, %v1556_v59 }
 0x2f8   : > { %v1364_v60 = vpop.trf.xlu0 }
 0x2f9   : > { %9337 = vmatmul.mubr.msk.f32.vlgmr.msra.gmra.mrb[22].mxu1 %vm992_vm9, %v1364_v60 }
 0x2fa   : > { %v1557_v61 = vpop.trf.xlu1 }
 0x2fb   : > { %9357 = vmatmul.mubr.msk.f32.vlgmr.msra.gmra.mrb[18].mxu0 %vm992_vm9, %v1557_v61 }
 0x2fc   : > { %v1365_v62 = vpop.trf.xlu0 }
 0x2fd   : > { %9339 = vmatprep.mubr.msk.f32.mxu1 %vm992_vm9, %v1365_v62 }
 0x2fe   : > { %v1558_v63 = vpop.trf.xlu1 }
 0x2ff   : > { %9359 = vmatprep.mubr.msk.f32.mxu0 %vm992_vm9, %v1558_v63 }
 0x300   : > { %v1366_v0 = vpop.trf.xlu0 }
 0x301   : > { %9340 = vmatmul.mubr.msk.f32.gmra.mrb[24].mxu1 %vm992_vm9, %v1366_v0 }
 0x302   : > { %v1559_v1 = vpop.trf.xlu1 }
 0x303   : > { %9360 = vmatmul.mubr.msk.f32.gmra.mrb[20].mxu0 %vm992_vm9, %v1559_v1 }
 0x304   : > { %v1367_v4 = vpop.trf.xlu0 }
 0x305   : > { %9342 = vmatprep.mubr.msk.f32.mxu1 %vm992_vm9, %v1367_v4 }
 0x306   : > { %v1560_v5 = vpop.trf.xlu1 }
 0x307   : > { %9362 = vmatprep.mubr.msk.f32.mxu0 %vm992_vm9, %v1560_v5 }
 0x308   : > { %v1368_v6 = vpop.trf.xlu0 }
 0x309   : > { %9343 = vmatmul.mubr.msk.f32.gmra.mrb[26].mxu1 %vm992_vm9, %v1368_v6 }
 0x30a   : > { %v1561_v7 = vpop.trf.xlu1 }
 0x30b   : > { %9363 = vmatmul.mubr.msk.f32.gmra.mrb[22].mxu0 %vm992_vm9, %v1561_v7 }
 0x30c   : > { %v1369_v8 = vpop.trf.xlu0 }
 0x30d   : > { %9345 = vmatprep.mubr.msk.f32.mxu1 %vm992_vm9, %v1369_v8 }
 0x30e   : > { %v1562_v9 = vpop.trf.xlu1 }
 0x30f   : > { %9365 = vmatprep.mubr.msk.f32.mxu0 %vm992_vm9, %v1562_v9 }
 0x310   : > { %v1370_v10 = vpop.trf.xlu0 }
 0x311   : > { %9346 = vmatmul.mubr.msk.f32.gmra.mrb[28].mxu1 %vm992_vm9, %v1370_v10 }
 0x312   : > { %v1563_v11 = vpop.trf.xlu1 }
 0x313   : > { %9366 = vmatmul.mubr.msk.f32.gmra.mrb[24].mxu0 %vm992_vm9, %v1563_v11 }
 0x314   : > { %v1371_v12 = vpop.trf.xlu0 }
 0x315   : > { %9348 = vmatprep.mubr.msk.f32.mxu1 %vm992_vm9, %v1371_v12 }
 0x316   : > { %v1564_v13 = vpop.trf.xlu1 }
 0x317   : > { %9368 = vmatprep.mubr.msk.f32.mxu0 %vm992_vm9, %v1564_v13 }
 0x318   : > { %v1372_v14 = vpop.trf.xlu0 }
 0x319   : > { %9349 = vmatmul.mubr.msk.f32.gmra.mrb[30].mxu1 %vm992_vm9, %v1372_v14 }
 0x31a   : > { %v1565_v15 = vpop.trf.xlu1 }
 0x31b   : > { %9369 = vmatmul.mubr.msk.f32.gmra.mrb[26].mxu0 %vm992_vm9, %v1565_v15 }
 0x31c   : > { %v1373_v16 = vpop.trf.xlu0 }
 0x31d   : > { %9351 = vmatprep.mubr.msk.f32.mxu1 %vm992_vm9, %v1373_v16 }
 0x31e   : > { %v1566_v17 = vpop.trf.xlu1 }
 0x31f   : > { %9371 = vmatprep.mubr.msk.f32.mxu0 %vm992_vm9, %v1566_v17 }
 0x320   : > { %v1374_v18 = vpop.trf.xlu0 }
 0x321   : > { %9352 = vmatmul.mubr.msk.f32.gmra.mrb[32].mxu1 %vm992_vm9, %v1374_v18 }
 0x322   : > { %v1567_v19 = vpop.trf.xlu1 }
 0x323   : > { %9372 = vmatmul.mubr.msk.f32.gmra.mrb[28].mxu0 %vm992_vm9, %v1567_v19 }
 0x359   : > { %v10894_v20 = vpop.f32.mrb[4].mxu0 }
 0x35a   : > { %v10896_v21 = vpop.f32.mrb[5].mxu0  ;;  %v1737_v22 = vsel %vm1733_vm10, %v10894_v20, -inf }
 0x35b   : > { %1738 = vmax.xlane.f32.xlu1 %v1737_v22  ;;  %v1734_v23 = vsel %vm1733_vm10, %v10896_v21, -inf }
 0x35c   : > { %1735 = vmax.xlane.f32.xlu0 %v1734_v23 }
 0x35d   : > { %v10902_v24 = vpop.f32.mrb[6].mxu0 }
 0x35e   : > { %v1774_v25 = vsel %vm1733_vm10, %v10902_v24, -inf  ;;  %v10906_v26 = vpop.f32.mrb[7].mxu0 }
 0x35f   : > { %v1771_v28 = vsel %vm1733_vm10, %v10906_v26, -inf }
 0x360   : > { %1775 = vmax.xlane.f32.xlu0 %v1774_v25 }
 0x361   : > { %v10908_v27 = vpop.f32.mrb[12].mxu1 }
 0x362   : > { %v10912_v29 = vpop.f32.mrb[13].mxu1  ;;  %v1743_v33 = vsel %vm1733_vm10, %v10908_v27, -inf }
 0x363   : > { %v1740_v30 = vsel %vm1733_vm10, %v10912_v29, -inf  ;;  %v10916_v31 = vpop.f32.mrb[8].mxu0 }
 0x364   : > { %1772 = vmax.xlane.f32.xlu0 %v1771_v28  ;;  %1741 = vmax.xlane.f32.xlu1 %v1740_v30  ;;  %v10918_v32 = vpop.f32.mrb[9].mxu0  ;;  %v1780_v36 = vsel %vm1733_vm10, %v10916_v31, -inf }
 0x365   : > { %v1777_v34 = vsel %vm1733_vm10, %v10918_v32, -inf }
 0x368   : > { %1744 = vmax.xlane.f32.xlu0 %v1743_v33  ;;  %1778 = vmax.xlane.f32.xlu1 %v1777_v34 }
 0x369   : > { %v10924_v35 = vpop.f32.mrb[14].mxu1 }
 0x36a   : > { %v10928_v37 = vpop.f32.mrb[15].mxu1  ;;  %v1749_v41 = vsel %vm1733_vm10, %v10924_v35, -inf }
 0x36b   : > { %v1746_v38 = vsel %vm1733_vm10, %v10928_v37, -inf  ;;  %v10932_v39 = vpop.f32.mrb[10].mxu0 }
 0x36c   : > { %1781 = vmax.xlane.f32.xlu0 %v1780_v36  ;;  %1747 = vmax.xlane.f32.xlu1 %v1746_v38  ;;  %v10934_v40 = vpop.f32.mrb[11].mxu0  ;;  %v1786_v48 = vsel %vm1733_vm10, %v10932_v39, -inf }
 0x36d   : > { %v1783_v43 = vsel %vm1733_vm10, %v10934_v40, -inf }
 0x370   : > { %1750 = vmax.xlane.f32.xlu0 %v1749_v41  ;;  %1784 = vmax.xlane.f32.xlu1 %v1783_v43 }
 0x371   : > { %v10940_v46 = vpop.f32.mrb[16].mxu1 }
 0x372   : > { %v10944_v52 = vpop.f32.mrb[17].mxu1  ;;  %v1755_v57 = vsel %vm1733_vm10, %v10940_v46, -inf }
 0x373   : > { %v1752_v54 = vsel %vm1733_vm10, %v10944_v52, -inf  ;;  %v10948_v55 = vpop.f32.mrb[12].mxu0 }
 0x374   : > { %1787 = vmax.xlane.f32.xlu0 %v1786_v48  ;;  %1753 = vmax.xlane.f32.xlu1 %v1752_v54  ;;  %v10950_v56 = vpop.f32.mrb[13].mxu0  ;;  %v1792_v60 = vsel %vm1733_vm10, %v10948_v55, -inf }
 0x375   : > { %v1789_v58 = vsel %vm1733_vm10, %v10950_v56, -inf }
 0x378   : > { %1756 = vmax.xlane.f32.xlu0 %v1755_v57  ;;  %1790 = vmax.xlane.f32.xlu1 %v1789_v58 }
 0x379   : > { %v10956_v59 = vpop.f32.mrb[18].mxu1 }
 0x37a   : > { %v10960_v61 = vpop.f32.mrb[19].mxu1  ;;  %v1761_v1 = vsel %vm1733_vm10, %v10956_v59, -inf }
 0x37b   : > { %v1758_v62 = vsel %vm1733_vm10, %v10960_v61, -inf  ;;  %v10964_v63 = vpop.f32.mrb[14].mxu0 }
 0x37c   : > { %1793 = vmax.xlane.f32.xlu0 %v1792_v60  ;;  %1759 = vmax.xlane.f32.xlu1 %v1758_v62  ;;  %v10966_v0 = vpop.f32.mrb[15].mxu0  ;;  %v1798_v6 = vsel %vm1733_vm10, %v10964_v63, -inf }
 0x37d   : > { %v1795_v4 = vsel %vm1733_vm10, %v10966_v0, -inf }
 0x380   : > { %1762 = vmax.xlane.f32.xlu0 %v1761_v1  ;;  %1796 = vmax.xlane.f32.xlu1 %v1795_v4  ;;  %v11038_v4 = vpop.permute.xlu1 %812 }
 0x381   : > { %v10972_v5 = vpop.f32.mrb[20].mxu1 }
 0x382   : > { %v10976_v7 = vpop.f32.mrb[21].mxu1  ;;  %v1768_v11 = vsel %vm1767_vm11, %v10972_v5, -inf }
 0x383   : > { %v1764_v8 = vsel %vm1733_vm10, %v10976_v7, -inf  ;;  %v10980_v9 = vpop.f32.mrb[16].mxu0 }
 0x384   : > { %1799 = vmax.xlane.f32.xlu0 %v1798_v6  ;;  %1765 = vmax.xlane.f32.xlu1 %v1764_v8  ;;  %v10982_v10 = vpop.f32.mrb[17].mxu0  ;;  %v1804_v13 = vsel %vm1767_vm11, %v10980_v9, -inf  ;;  %v11042_v8 = vpop.permute.xlu0 %817 }
 0x385   : > { %v1801_v12 = vsel %vm1733_vm10, %v10982_v10, -inf  ;;  %13429 = vst [vmem:[#allocation16_spill] sm:$0xff] %v11042_v8 }
 0x388   : > { %1769 = vmax.xlane.f32.xlu0 %v1768_v11  ;;  %1802 = vmax.xlane.f32.xlu1 %v1801_v12 }
 0x38c   : > { %1805 = vmax.xlane.f32.xlu0 %v1804_v13 }
 0x3cc   : > { %v10990_v14 = vpop.f32.mrb[22].mxu1 }
 0x3cd   : > { %v10992_v15 = vpop.f32.mrb[23].mxu1  ;;  %v1810_v16 = vsel %vm1733_vm10, %v10990_v14, -inf }
 0x3ce   : > { %1811 = vmax.xlane.f32.xlu0 %v1810_v16  ;;  %v10996_v17 = vpop.f32.mrb[18].mxu0  ;;  %v1807_v18 = vsel %vm1733_vm10, %v10992_v15, -inf }
 0x3cf   : > { %1808 = vmax.xlane.f32.xlu1 %v1807_v18  ;;  %v11000_v19 = vpop.f32.mrb[19].mxu0  ;;  %v1846_v22 = vsel %vm1733_vm10, %v10996_v17, -inf }
 0x3d0   : > { %v1843_v23 = vsel %vm1733_vm10, %v11000_v19, -inf }
 0x3d2   : > { %1847 = vmax.xlane.f32.xlu0 %v1846_v22 }
 0x3d3   : > { %1844 = vmax.xlane.f32.xlu1 %v1843_v23 }
 0x3d4   : > { %v11006_v25 = vpop.f32.mrb[24].mxu1 }
 0x3d5   : > { %v11008_v28 = vpop.f32.mrb[25].mxu1  ;;  %v1816_v30 = vsel %vm1733_vm10, %v11006_v25, -inf }
 0x3d6   : > { %1817 = vmax.xlane.f32.xlu0 %v1816_v30  ;;  %v11012_v33 = vpop.f32.mrb[20].mxu0  ;;  %v1813_v34 = vsel %vm1733_vm10, %v11008_v28, -inf }
 0x3d7   : > { %1814 = vmax.xlane.f32.xlu1 %v1813_v34  ;;  %v11016_v36 = vpop.f32.mrb[21].mxu0  ;;  %v1852_v38 = vsel %vm1733_vm10, %v11012_v33, -inf }
 0x3d8   : > { %v1849_v41 = vsel %vm1733_vm10, %v11016_v36, -inf }
 0x3da   : > { %1853 = vmax.xlane.f32.xlu0 %v1852_v38 }
 0x3db   : > { %1850 = vmax.xlane.f32.xlu1 %v1849_v41 }
 0x3dc   : > { %v11022_v43 = vpop.f32.mrb[26].mxu1 }
 0x3dd   : > { %v11024_v48 = vpop.f32.mrb[27].mxu1  ;;  %v1822_v54 = vsel %vm1733_vm10, %v11022_v43, -inf }
 0x3de   : > { %1823 = vmax.xlane.f32.xlu0 %v1822_v54  ;;  %v11028_v57 = vpop.f32.mrb[22].mxu0  ;;  %v1819_v58 = vsel %vm1733_vm10, %v11024_v48, -inf }
 0x3df   : > { %1820 = vmax.xlane.f32.xlu1 %v1819_v58  ;;  %v11032_v60 = vpop.f32.mrb[23].mxu0  ;;  %v1858_v62 = vsel %vm1733_vm10, %v11028_v57, -inf }
 0x3e0   : > { %v1855_v1 = vsel %vm1733_vm10, %v11032_v60, -inf }
 0x3e2   : > { %1859 = vmax.xlane.f32.xlu0 %v1858_v62 }
 0x3e3   : > { %1856 = vmax.xlane.f32.xlu1 %v1855_v1 }
 0x3e4   : > { %v11040_v6 = vpop.f32.mrb[28].mxu1 }
 0x3e5   : > { %v11044_v11 = vpop.f32.mrb[29].mxu1  ;;  %v1828_v12 = vsel %vm1733_vm10, %v11040_v6, -inf }
 0x3e6   : > { %1829 = vmax.xlane.f32.xlu0 %v1828_v12  ;;  %v11048_v13 = vpop.f32.mrb[24].mxu0  ;;  %v1825_v16 = vsel %vm1733_vm10, %v11044_v11, -inf }
 0x3e7   : > { %1826 = vmax.xlane.f32.xlu1 %v1825_v16  ;;  %v11052_v18 = vpop.f32.mrb[25].mxu0  ;;  %v1864_v22 = vsel %vm1733_vm10, %v11048_v13, -inf }
 0x3e8   : > { %v1739_v23 = vpop.xlane.xlu1 %1738  ;;  %v1861_v30 = vsel %vm1733_vm10, %v11052_v18, -inf }
 0x3e9   : > { %v1880_v34 = vsub.f32 %v10894_v20, %v1739_v23  ;;  %v1736_v38 = vpop.xlane.xlu0 %1735 }
 0x3ea   : > { %v1879_v41 = vsub.f32 %v10896_v21, %v1736_v38  ;;  %1865 = vmax.xlane.f32.xlu0 %v1864_v22 }
 0x3eb   : > { %1862 = vmax.xlane.f32.xlu1 %v1861_v30  ;;  %v1929_v54 = vmul.f32 1.442695, %v1880_v34 }
 0x3ec   : > { %v11060_v58 = vpop.f32.mrb[30].mxu1  ;;  %v1927_v62 = vmul.f32 1.442695, %v1879_v41 }
 0x3ed   : > { %v11062_v1 = vpop.f32.mrb[31].mxu1  ;;  %v1776_v12 = vpop.xlane.xlu0 %1775  ;;  %v1834_v16 = vsel %vm1733_vm10, %v11060_v58, -inf  ;;  %10052 = vpow2.f32 %v1929_v54 }
 0x3ee   : > { %v1892_v3 = vsub.f32 %v10902_v24, %v1776_v12  ;;  %1835 = vmax.xlane.f32.xlu0 %v1834_v16  ;;  %v11067_v2 = vpop.f32.mrb[26].mxu0  ;;  %v1831_v20 = vsel %vm1733_vm10, %v11062_v1, -inf  ;;  %10054 = vpow2.f32 %v1927_v62 }
 0x3ef   : > { %1832 = vmax.xlane.f32.xlu1 %v1831_v20  ;;  %v11071_v21 = vpop.f32.mrb[27].mxu0  ;;  %v1870_v22 = vsel %vm1733_vm10, %v11067_v2, -inf }
 0x3f0   : > { %v1953_v23 = vmul.f32 1.442695, %v1892_v3  ;;  %v1867_v30 = vsel %vm1733_vm10, %v11071_v21, -inf }
 0x3f1   : > { %v1742_v34 = vpop.xlane.xlu1 %1741  ;;  %v1773_v24 = vpop.xlane.xlu0 %1772 }
 0x3f2   : > { %v1881_v38 = vsub.f32 %v10912_v29, %v1742_v34  ;;  %v1891_v41 = vsub.f32 %v10906_v26, %v1773_v24  ;;  %1871 = vmax.xlane.f32.xlu0 %v1870_v22  ;;  %10056 = vpow2.f32 %v1953_v23 }
 0x3f3   : > { %1868 = vmax.xlane.f32.xlu1 %v1867_v30 }
 0x3f4   : > { %v1951_v12 = vmul.f32 1.442695, %v1891_v41  ;;  %v11079_v16 = vpop.f32.mrb[32].mxu1  ;;  %v1931_v20 = vmul.f32 1.442695, %v1881_v38 }
 0x3f5   : > { %v1779_v51 = vpop.xlane.xlu1 %1778  ;;  %v11081_v54 = vpop.f32.mrb[33].mxu1  ;;  %v1840_v3 = vsel %vm1767_vm11, %v11079_v16, -inf }
 0x3f6   : > { %v1893_v62 = vsub.f32 %v10918_v32, %v1779_v51  ;;  %v1745_v45 = vpop.xlane.xlu0 %1744  ;;  %1841 = vmax.xlane.f32.xlu0 %v1840_v3  ;;  %v11086_v29 = vpop.f32.mrb[28].mxu0  ;;  %v1837_v26 = vsel %vm1733_vm10, %v11081_v54, -inf  ;;  %10058 = vpow2.f32 %v1951_v12 }
 0x3f7   : > { %v1882_v22 = vsub.f32 %v10908_v27, %v1745_v45  ;;  %1838 = vmax.xlane.f32.xlu1 %v1837_v26  ;;  %v11091_v23 = vpop.f32.mrb[29].mxu0  ;;  %v1876_v30 = vsel %vm1767_vm11, %v11086_v29, -inf  ;;  %10060 = vpow2.f32 %v1931_v20  ;;  %v11097_v38 = vpop.eup %10052 }
 0x3f8   : > { %v1873_v34 = vsel %vm1733_vm10, %v11091_v23, -inf  ;;  %v1955_v51 = vmul.f32 1.442695, %v1893_v62  ;;  %v11100_v45 = vpop.eup %10054  ;;  %v2026_v20 = vsel %vm1733_vm10, %v11097_v38, 0.0 }
 0x3f9   : > { %v1933_v32 = vmul.f32 1.442695, %v1882_v22  ;;  %v1748_v24 = vpop.xlane.xlu1 %1747 }
 0x3fa   : > { %v1883_v41 = vsub.f32 %v10928_v37, %v1748_v24  ;;  %v1782_v12 = vpop.xlane.xlu0 %1781  ;;  %1877 = vmax.xlane.f32.xlu0 %v1876_v30  ;;  %v2023_v30 = vsel %vm1733_vm10, %v11100_v45, 0.0 }
 0x3fb   : > { %10062 = vpow2.f32 %v1933_v32  ;;  %v1894_v27 = vsub.f32 %v10916_v31, %v1782_v12  ;;  %1874 = vmax.xlane.f32.xlu1 %v1873_v34 }
 0x3fc   : > { %10064 = vpow2.f32 %v1955_v51  ;;  %v1935_v3 = vmul.f32 1.442695, %v1883_v41  ;;  %v11105_v62 = vpop.eup %10056 }
 0x3fd   : > { %v1957_v26 = vmul.f32 1.442695, %v1894_v27  ;;  %v1785_v53 = vpop.xlane.xlu1 %1784  ;;  %v2062_v41 = vsel %vm1733_vm10, %v11105_v62, 0.0 }
 0x3fe   : > { %v1895_v22 = vsub.f32 %v10934_v40, %v1785_v53  ;;  %v1751_v37 = vpop.xlane.xlu0 %1750  ;;  %2027 = vadd.xlane.f32.xlu0 %v2026_v20 }
 0x3ff   : > { %10066 = vpow2.f32 %v1957_v26  ;;  %v1884_v31 = vsub.f32 %v10924_v35, %v1751_v37  ;;  %2024 = vadd.xlane.f32.xlu1 %v2023_v30 }
 0x400   : > { %v11111_v34 = vpop.eup %10058  ;;  %10068 = vpow2.f32 %v1935_v3  ;;  %v1959_v51 = vmul.f32 1.442695, %v1895_v22 }
 0x401   : > { %v1937_v32 = vmul.f32 1.442695, %v1884_v31  ;;  %v1754_v24 = vpop.xlane.xlu1 %1753  ;;  %v2059_v12 = vsel %vm1733_vm10, %v11111_v34, 0.0  ;;  %v11118_v27 = vpop.eup %10060 }
 0x402   : > { %v1885_v53 = vsub.f32 %v10944_v52, %v1754_v24  ;;  %v1788_v40 = vpop.xlane.xlu0 %1787  ;;  %2063 = vadd.xlane.f32.xlu0 %v2062_v41  ;;  %v2029_v31 = vsel %vm1733_vm10, %v11118_v27, 0.0 }
 0x403   : > { %10070 = vpow2.f32 %v1937_v32  ;;  %v1896_v35 = vsub.f32 %v10932_v39, %v1788_v40  ;;  %2060 = vadd.xlane.f32.xlu1 %v2059_v12 }
 0x404   : > { %10072 = vpow2.f32 %v1959_v51  ;;  %v1939_v26 = vmul.f32 1.442695, %v1885_v53 }
 0x405   : > { %v11121_v3 = vpop.eup %10062  ;;  %v1961_v20 = vmul.f32 1.442695, %v1896_v35  ;;  %v1791_v22 = vpop.xlane.xlu1 %1790 }
 0x406   : > { %v1897_v37 = vsub.f32 %v10950_v56, %v1791_v22  ;;  %v1757_v52 = vpop.xlane.xlu0 %1756  ;;  %v2032_v30 = vsel %vm1733_vm10, %v11121_v3, 0.0  ;;  %v11128_v24 = vpop.eup %10064 }
 0x407   : > { %10074 = vpow2.f32 %v1961_v20  ;;  %v1886_v39 = vsub.f32 %v10940_v46, %v1757_v52  ;;  %2033 = vadd.xlane.f32.xlu0 %v2032_v30  ;;  %2030 = vadd.xlane.f32.xlu1 %v2029_v31  ;;  %v2065_v35 = vsel %vm1733_vm10, %v11128_v24, 0.0 }
 0x408   : > { %10076 = vpow2.f32 %v1939_v26  ;;  %v1963_v32 = vmul.f32 1.442695, %v1897_v37 }
 0x409   : > { %v11131_v51 = vpop.eup %10066  ;;  %v1941_v41 = vmul.f32 1.442695, %v1886_v39  ;;  %v1760_v56 = vpop.xlane.xlu1 %1759 }
 0x40a   : > { %v1887_v53 = vsub.f32 %v10960_v61, %v1760_v56  ;;  %v1794_v40 = vpop.xlane.xlu0 %1793  ;;  %v2068_v12 = vsel %vm1733_vm10, %v11131_v51, 0.0  ;;  %v11138_v20 = vpop.eup %10068 }
 0x40b   : > { %10078 = vpow2.f32 %v1941_v41  ;;  %v1898_v46 = vsub.f32 %v10948_v55, %v1794_v40  ;;  %2069 = vadd.xlane.f32.xlu0 %v2068_v12  ;;  %2066 = vadd.xlane.f32.xlu1 %v2065_v35  ;;  %v2035_v39 = vsel %vm1733_vm10, %v11138_v20, 0.0 }
 0x40c   : > { %10080 = vpow2.f32 %v1963_v32  ;;  %v1943_v22 = vmul.f32 1.442695, %v1887_v53 }
 0x40d   : > { %v11141_v26 = vpop.eup %10070  ;;  %v1965_v37 = vmul.f32 1.442695, %v1898_v46  ;;  %v1797_v61 = vpop.xlane.xlu1 %1796 }
 0x40e   : > { %v1899_v52 = vsub.f32 %v10966_v0, %v1797_v61  ;;  %v1763_v30 = vpop.xlane.xlu0 %1762  ;;  %v2038_v31 = vsel %vm1733_vm10, %v11141_v26, 0.0  ;;  %v11148_v41 = vpop.eup %10072 }
 0x40f   : > { %10082 = vpow2.f32 %v1965_v37  ;;  %v1888_v55 = vsub.f32 %v10956_v59, %v1763_v30  ;;  %2039 = vadd.xlane.f32.xlu0 %v2038_v31  ;;  %2036 = vadd.xlane.f32.xlu1 %v2035_v39  ;;  %v2071_v46 = vsel %vm1733_vm10, %v11148_v41, 0.0 }
 0x410   : > { %10084 = vpow2.f32 %v1943_v22  ;;  %v1967_v56 = vmul.f32 1.442695, %v1899_v52 }
 0x411   : > { %v11151_v32 = vpop.eup %10074  ;;  %v1945_v53 = vmul.f32 1.442695, %v1888_v55  ;;  %v1766_v0 = vpop.xlane.xlu1 %1765 }
 0x412   : > { %v1889_v40 = vsub.f32 %v10976_v7, %v1766_v0  ;;  %v1800_v12 = vpop.xlane.xlu0 %1799  ;;  %v2074_v35 = vsel %vm1733_vm10, %v11151_v32, 0.0  ;;  %v11158_v37 = vpop.eup %10076 }
 0x413   : > { %10086 = vpow2.f32 %v1945_v53  ;;  %v1900_v59 = vsub.f32 %v10964_v63, %v1800_v12  ;;  %2075 = vadd.xlane.f32.xlu0 %v2074_v35  ;;  %2072 = vadd.xlane.f32.xlu1 %v2071_v46  ;;  %v2041_v55 = vsel %vm1733_vm10, %v11158_v37, 0.0 }
 0x414   : > { %10088 = vpow2.f32 %v1967_v56  ;;  %v1947_v61 = vmul.f32 1.442695, %v1889_v40 }
 0x415   : > { %v11161_v22 = vpop.eup %10078  ;;  %v1969_v52 = vmul.f32 1.442695, %v1900_v59  ;;  %v1803_v7 = vpop.xlane.xlu1 %1802 }
 0x416   : > { %v1901_v30 = vsub.f32 %v10982_v10, %v1803_v7  ;;  %v1770_v31 = vpop.xlane.xlu0 %1769  ;;  %v2044_v39 = vsel %vm1733_vm10, %v11161_v22, 0.0  ;;  %v11168_v53 = vpop.eup %10080 }
 0x417   : > { %10090 = vpow2.f32 %v1969_v52  ;;  %v1890_v63 = vsub.f32 %v10972_v5, %v1770_v31  ;;  %2045 = vadd.xlane.f32.xlu0 %v2044_v39  ;;  %2042 = vadd.xlane.f32.xlu1 %v2041_v55  ;;  %v2077_v35 = vsel %vm1733_vm10, %v11168_v53, 0.0  ;;  %v13382_v52 = vmov 0.0|0.0  }
 0x418   : > { %10092 = vpow2.f32 %v1947_v61  ;;  %v1971_v0 = vmul.f32 1.442695, %v1901_v30  ;;  %9782 = vmatprep.subr.bf16.mxu1 %v13382_v52  ;;  %9806 = vmatprep.subr.bf16.mxu0 %v13382_v52 }
 0x419   : > { %v11171_v56 = vpop.eup %10082  ;;  %v1949_v40 = vmul.f32 1.442695, %v1890_v63 }
 0x41a   : > { %v1806_v10 = vpop.xlane.xlu0 %1805  ;;  %v2080_v12 = vsel %vm1733_vm10, %v11171_v56, 0.0  ;;  %v11177_v46 = vpop.eup %10084 }
 0x41b   : > { %10094 = vpow2.f32 %v1949_v40  ;;  %v1902_v59 = vsub.f32 %v10980_v9, %v1806_v10  ;;  %2081 = vadd.xlane.f32.xlu0 %v2080_v12  ;;  %2078 = vadd.xlane.f32.xlu1 %v2077_v35  ;;  %v2047_v30 = vsel %vm1733_vm10, %v11177_v46, 0.0 }
 0x41c   : > { %10096 = vpow2.f32 %v1971_v0 }
 0x41d   : > { %v11180_v5 = vpop.eup %10086  ;;  %v1973_v61 = vmul.f32 1.442695, %v1902_v59 }
 0x41e   : > { %v2050_v7 = vsel %vm1733_vm10, %v11180_v5, 0.0  ;;  %v11188_v31 = vpop.eup %10088 }
 0x41f   : > { %10098 = vpow2.f32 %v1973_v61  ;;  %2051 = vadd.xlane.f32.xlu0 %v2050_v7  ;;  %2048 = vadd.xlane.f32.xlu1 %v2047_v30  ;;  %v2083_v55 = vsel %vm1733_vm10, %v11188_v31, 0.0  ;;  %v13385_v7 = vmov 0.0  }
 0x420   : > { %9398 = vmatprep.mubr.msk.f32.mxu1 %vm10511_vm12, %v13385_v7  ;;  %9425 = vmatprep.mubr.msk.f32.mxu0 %vm10511_vm12, %v13385_v7 }
 0x421   : > { %v11190_v9 = vpop.eup %10090 }
 0x422   : > { %v2086_v39 = vsel %vm1733_vm10, %v11190_v9, 0.0  ;;  %v11196_v63 = vpop.eup %10092 }
 0x423   : > { %2087 = vadd.xlane.f32.xlu0 %v2086_v39  ;;  %2084 = vadd.xlane.f32.xlu1 %v2083_v55  ;;  %v2053_v10 = vsel %vm1733_vm10, %v11196_v63, 0.0 }
 0x425   : > { %v11198_v0 = vpop.eup %10094 }
 0x426   : > { %v2056_v40 = vsel %vm1767_vm11, %v11198_v0, 0.0  ;;  %v11204_v12 = vpop.eup %10096 }
 0x427   : > { %2057 = vadd.xlane.f32.xlu0 %v2056_v40  ;;  %2054 = vadd.xlane.f32.xlu1 %v2053_v10  ;;  %v2089_v61 = vsel %vm1733_vm10, %v11204_v12, 0.0 }
 0x429   : > { %v11206_v35 = vpop.eup %10098 }
 0x42a   : > { %v2092_v59 = vsel %vm1767_vm11, %v11206_v35, 0.0 }
 0x42b   : > { %2093 = vadd.xlane.f32.xlu0 %v2092_v59  ;;  %2090 = vadd.xlane.f32.xlu1 %v2089_v61 }
 0x45b   : > { %v1812_v30 = vpop.xlane.xlu0 %1811 }
 0x45c   : > { %v1904_v39 = vsub.f32 %v10990_v14, %v1812_v30  ;;  %v1809_v55 = vpop.xlane.xlu1 %1808 }
 0x45d   : > { %v1903_v40 = vsub.f32 %v10992_v15, %v1809_v55 }
 0x45e   : > { %v1977_v10 = vmul.f32 1.442695, %v1904_v39 }
 0x45f   : > { %v1975_v52 = vmul.f32 1.442695, %v1903_v40  ;;  %v1848_v47 = vpop.xlane.xlu0 %1847 }
 0x460   : > { %10100 = vpow2.f32 %v1977_v10  ;;  %v1916_v59 = vsub.f32 %v10996_v17, %v1848_v47  ;;  %v1845_v61 = vpop.xlane.xlu1 %1844 }
 0x461   : > { %10102 = vpow2.f32 %v1975_v52  ;;  %v1915_v49 = vsub.f32 %v11000_v19, %v1845_v61 }
 0x462   : > { %v2001_v42 = vmul.f32 1.442695, %v1916_v59 }
 0x463   : > { %v1999_v50 = vmul.f32 1.442695, %v1915_v49  ;;  %v1818_v8 = vpop.xlane.xlu0 %1817 }
 0x464   : > { %10104 = vpow2.f32 %v2001_v42  ;;  %v1906_v7 = vsub.f32 %v11006_v25, %v1818_v8  ;;  %v1815_v14 = vpop.xlane.xlu1 %1814 }
 0x465   : > { %10106 = vpow2.f32 %v1999_v50  ;;  %v1905_v15 = vsub.f32 %v11008_v28, %v1815_v14 }
 0x466   : > { %v1981_v30 = vmul.f32 1.442695, %v1906_v7 }
 0x467   : > { %v1979_v39 = vmul.f32 1.442695, %v1905_v15  ;;  %v1854_v55 = vpop.xlane.xlu0 %1853 }
 0x468   : > { %10108 = vpow2.f32 %v1981_v30  ;;  %v1918_v47 = vsub.f32 %v11012_v33, %v1854_v55  ;;  %v1851_v17 = vpop.xlane.xlu1 %1850 }
 0x469   : > { %10110 = vpow2.f32 %v1979_v39  ;;  %v1917_v19 = vsub.f32 %v11016_v36, %v1851_v17 }
 0x46a   : > { %v11224_v52 = vpop.eup %10100  ;;  %v2005_v49 = vmul.f32 1.442695, %v1918_v47 }
 0x46b   : > { %v11226_v42 = vpop.eup %10102  ;;  %v2003_v25 = vmul.f32 1.442695, %v1917_v19  ;;  %v1824_v8 = vpop.xlane.xlu0 %1823  ;;  %v2098_v50 = vsel %vm1733_vm10, %v11224_v52, 0.0 }
 0x46c   : > { %10112 = vpow2.f32 %v2005_v49  ;;  %v1908_v28 = vsub.f32 %v11022_v43, %v1824_v8  ;;  %v1821_v7 = vpop.xlane.xlu1 %1820  ;;  %2099 = vadd.xlane.f32.xlu0 %v2098_v50  ;;  %v2095_v33 = vsel %vm1733_vm10, %v11226_v42, 0.0 }
 0x46d   : > { %10114 = vpow2.f32 %v2003_v25  ;;  %v1907_v36 = vsub.f32 %v11024_v48, %v1821_v7  ;;  %2096 = vadd.xlane.f32.xlu1 %v2095_v33 }
 0x46e   : > { %v11234_v40 = vpop.eup %10104  ;;  %v1985_v10 = vmul.f32 1.442695, %v1908_v28 }
 0x46f   : > { %v11236_v59 = vpop.eup %10106  ;;  %v1983_v61 = vmul.f32 1.442695, %v1907_v36  ;;  %v1860_v14 = vpop.xlane.xlu0 %1859  ;;  %v2134_v15 = vsel %vm1733_vm10, %v11234_v40, 0.0 }
 0x470   : > { %10116 = vpow2.f32 %v1985_v10  ;;  %v1920_v43 = vsub.f32 %v11028_v57, %v1860_v14  ;;  %v1857_v30 = vpop.xlane.xlu1 %1856  ;;  %2135 = vadd.xlane.f32.xlu0 %v2134_v15  ;;  %v2131_v39 = vsel %vm1733_vm10, %v11236_v59, 0.0 }
 0x471   : > { %10118 = vpow2.f32 %v1983_v61  ;;  %v1919_v48 = vsub.f32 %v11032_v60, %v1857_v30  ;;  %2132 = vadd.xlane.f32.xlu1 %v2131_v39 }
 0x472   : > { %v11244_v55 = vpop.eup %10108  ;;  %v2009_v47 = vmul.f32 1.442695, %v1920_v43 }
 0x473   : > { %v11246_v17 = vpop.eup %10110  ;;  %v2007_v19 = vmul.f32 1.442695, %v1919_v48  ;;  %v1830_v49 = vpop.xlane.xlu0 %1829  ;;  %v2104_v25 = vsel %vm1733_vm10, %v11244_v55, 0.0 }
 0x474   : > { %10120 = vpow2.f32 %v2009_v47  ;;  %v1910_v57 = vsub.f32 %v11040_v6, %v1830_v49  ;;  %v1827_v8 = vpop.xlane.xlu1 %1826  ;;  %2105 = vadd.xlane.f32.xlu0 %v2104_v25  ;;  %v2101_v50 = vsel %vm1733_vm10, %v11246_v17, 0.0 }
 0x475   : > { %10122 = vpow2.f32 %v2007_v19  ;;  %v1909_v60 = vsub.f32 %v11044_v11, %v1827_v8  ;;  %2102 = vadd.xlane.f32.xlu1 %v2101_v50 }
 0x476   : > { %v11254_v28 = vpop.eup %10112  ;;  %v1989_v7 = vmul.f32 1.442695, %v1910_v57 }
 0x477   : > { %v11256_v33 = vpop.eup %10114  ;;  %v1987_v36 = vmul.f32 1.442695, %v1909_v60  ;;  %v1866_v10 = vpop.xlane.xlu0 %1865  ;;  %v2140_v61 = vsel %vm1733_vm10, %v11254_v28, 0.0 }
 0x478   : > { %10124 = vpow2.f32 %v1989_v7  ;;  %v1922_v6 = vsub.f32 %v11048_v13, %v1866_v10  ;;  %v1863_v14 = vpop.xlane.xlu1 %1862  ;;  %2141 = vadd.xlane.f32.xlu0 %v2140_v61  ;;  %v2137_v15 = vsel %vm1733_vm10, %v11256_v33, 0.0 }
 0x479   : > { %10126 = vpow2.f32 %v1987_v36  ;;  %v1921_v11 = vsub.f32 %v11052_v18, %v1863_v14  ;;  %2138 = vadd.xlane.f32.xlu1 %v2137_v15 }
 0x47a   : > { %v11264_v43 = vpop.eup %10116  ;;  %v2013_v30 = vmul.f32 1.442695, %v1922_v6 }
 0x47b   : > { %v11266_v39 = vpop.eup %10118  ;;  %v2011_v48 = vmul.f32 1.442695, %v1921_v11  ;;  %v1836_v47 = vpop.xlane.xlu0 %1835  ;;  %v2110_v19 = vsel %vm1733_vm10, %v11264_v43, 0.0 }
 0x47c   : > { %10128 = vpow2.f32 %v2013_v30  ;;  %v1912_v13 = vsub.f32 %v11060_v58, %v1836_v47  ;;  %v1833_v49 = vpop.xlane.xlu1 %1832  ;;  %2111 = vadd.xlane.f32.xlu0 %v2110_v19  ;;  %v2107_v25 = vsel %vm1733_vm10, %v11266_v39, 0.0 }
 0x47d   : > { %10130 = vpow2.f32 %v2011_v48  ;;  %v1911_v18 = vsub.f32 %v11062_v1, %v1833_v49  ;;  %2108 = vadd.xlane.f32.xlu1 %v2107_v25 }
 0x47e   : > { %v11274_v57 = vpop.eup %10120  ;;  %v1993_v8 = vmul.f32 1.442695, %v1912_v13 }
 0x47f   : > { %v11276_v50 = vpop.eup %10122  ;;  %v1991_v60 = vmul.f32 1.442695, %v1911_v18  ;;  %v1872_v7 = vpop.xlane.xlu0 %1871  ;;  %v2146_v36 = vsel %vm1733_vm10, %v11274_v57, 0.0 }
 0x480   : > { %10132 = vpow2.f32 %v1993_v8  ;;  %v1924_v58 = vsub.f32 %v11067_v2, %v1872_v7  ;;  %v1869_v10 = vpop.xlane.xlu1 %1868  ;;  %2147 = vadd.xlane.f32.xlu0 %v2146_v36  ;;  %v2143_v61 = vsel %vm1733_vm10, %v11276_v50, 0.0 }
 0x481   : > { %10134 = vpow2.f32 %v1991_v60  ;;  %v1923_v1 = vsub.f32 %v11071_v21, %v1869_v10  ;;  %2144 = vadd.xlane.f32.xlu1 %v2143_v61 }
 0x482   : > { %v11284_v6 = vpop.eup %10124  ;;  %v2017_v14 = vmul.f32 1.442695, %v1924_v58 }
 0x483   : > { %v11286_v15 = vpop.eup %10126  ;;  %v2015_v11 = vmul.f32 1.442695, %v1923_v1  ;;  %v1842_v30 = vpop.xlane.xlu0 %1841  ;;  %v2116_v48 = vsel %vm1733_vm10, %v11284_v6, 0.0 }
 0x484   : > { %10136 = vpow2.f32 %v2017_v14  ;;  %v1914_v2 = vsub.f32 %v11079_v16, %v1842_v30  ;;  %v1839_v47 = vpop.xlane.xlu1 %1838  ;;  %2117 = vadd.xlane.f32.xlu0 %v2116_v48  ;;  %v2113_v19 = vsel %vm1733_vm10, %v11286_v15, 0.0 }
 0x485   : > { %10138 = vpow2.f32 %v2015_v11  ;;  %v1913_v21 = vsub.f32 %v11081_v54, %v1839_v47  ;;  %2114 = vadd.xlane.f32.xlu1 %v2113_v19 }
 0x486   : > { %v11294_v13 = vpop.eup %10128  ;;  %v1997_v49 = vmul.f32 1.442695, %v1914_v2 }
 0x487   : > { %v11296_v25 = vpop.eup %10130  ;;  %v1995_v18 = vmul.f32 1.442695, %v1913_v21  ;;  %v1878_v8 = vpop.xlane.xlu0 %1877  ;;  %v2152_v60 = vsel %vm1733_vm10, %v11294_v13, 0.0 }
 0x488   : > { %10140 = vpow2.f32 %v1997_v49  ;;  %v1926_v16 = vsub.f32 %v11086_v29, %v1878_v8  ;;  %v1875_v7 = vpop.xlane.xlu1 %1874  ;;  %2153 = vadd.xlane.f32.xlu0 %v2152_v60  ;;  %v2149_v36 = vsel %vm1733_vm10, %v11296_v25, 0.0 }
 0x489   : > { %10142 = vpow2.f32 %v1995_v18  ;;  %v1925_v54 = vsub.f32 %v11091_v23, %v1875_v7  ;;  %2150 = vadd.xlane.f32.xlu1 %v2149_v36 }
 0x48a   : > { %v11304_v58 = vpop.eup %10132  ;;  %v2021_v10 = vmul.f32 1.442695, %v1926_v16 }
 0x48b   : > { %v11306_v61 = vpop.eup %10134  ;;  %v2019_v1 = vmul.f32 1.442695, %v1925_v54  ;;  %v2028_v14 = vpop.xlane.xlu0 %2027  ;;  %v2122_v11 = vsel %vm1733_vm10, %v11304_v58, 0.0 }
 0x48c   : > { %10144 = vpow2.f32 %v2021_v10  ;;  %v2025_v29 = vpop.xlane.xlu1 %2024  ;;  %2123 = vadd.xlane.f32.xlu0 %v2122_v11  ;;  %v2119_v30 = vsel %vm1733_vm10, %v11306_v61, 0.0 }
 0x48d   : > { %10146 = vpow2.f32 %v2019_v1  ;;  %2120 = vadd.xlane.f32.xlu1 %v2119_v30 }
 0x48e   : > { %v11312_v23 = vpop.eup %10136  ;;  %10148 = vrcp.f32 %v2028_v14 }
 0x48f   : > { %v11314_v48 = vpop.eup %10138  ;;  %10150 = vrcp.f32 %v2025_v29  ;;  %v2064_v2 = vpop.xlane.xlu0 %2063  ;;  %v2158_v47 = vsel %vm1733_vm10, %v11312_v23, 0.0 }
 0x490   : > { %10152 = vrcp.f32 %v2064_v2  ;;  %v2061_v19 = vpop.xlane.xlu1 %2060  ;;  %2159 = vadd.xlane.f32.xlu0 %v2158_v47  ;;  %v2155_v21 = vsel %vm1733_vm10, %v11314_v48, 0.0 }
 0x491   : > { %10154 = vrcp.f32 %v2061_v19  ;;  %2156 = vadd.xlane.f32.xlu1 %v2155_v21 }
 0x492   : > { %v11320_v49 = vpop.eup %10140 }
 0x493   : > { %v11322_v18 = vpop.eup %10142  ;;  %v2128_v8 = vsel %vm1767_vm11, %v11320_v49, 0.0 }
 0x494   : > { %v2034_v60 = vpop.xlane.xlu0 %2033  ;;  %v2031_v16 = vpop.xlane.xlu1 %2030  ;;  %2129 = vadd.xlane.f32.xlu0 %v2128_v8  ;;  %v2125_v7 = vsel %vm1733_vm10, %v11322_v18, 0.0 }
 0x495   : > { %10156 = vrcp.f32 %v2034_v60  ;;  %2126 = vadd.xlane.f32.xlu1 %v2125_v7 }
 0x496   : > { %v11328_v36 = vpop.eup %10144  ;;  %10158 = vrcp.f32 %v2031_v16 }
 0x497   : > { %v11330_v54 = vpop.eup %10146  ;;  %v2164_v10 = vsel %vm1767_vm11, %v11328_v36, 0.0 }
 0x498   : > { %v10149_v1 = vpop.eup %10148  ;;  %v2070_v14 = vpop.xlane.xlu0 %2069  ;;  %2165 = vadd.xlane.f32.xlu0 %v2164_v10  ;;  %v2161_v29 = vsel %vm1733_vm10, %v11330_v54, 0.0 }
 0x499   : > { %v2067_v11 = vpop.xlane.xlu1 %2066  ;;  %v10151_v30 = vpop.eup %10150  ;;  %v2216_v2 = vmul.f32 %v10149_v1, %v11097_v38  ;;  %10160 = vrcp.f32 %v2070_v14  ;;  %2162 = vadd.xlane.f32.xlu1 %v2161_v29  ;;  %v13432_v14 = vmov 0.0|0.0  }
 0x49a   : > { %v10153_v47 = vpop.eup %10152  ;;  %v2215_v19 = vmul.f32 %v10151_v30, %v11100_v45  ;;  %10162 = vrcp.f32 %v2067_v11 }
 0x49b   : > { %v10155_v21 = vpop.eup %10154  ;;  %v2228_v8 = vmul.f32 %v10153_v47, %v11105_v62 }
 0x49c   : > { %v2227_v16 = vmul.f32 %v10155_v21, %v11111_v34  ;;  %v2040_v7 = vpop.xlane.xlu0 %2039  ;;  %v9783_v38 = vpack.c.bf16 %v2216_v2, %v2215_v19 }
 0x49d   : > { %v2037_v10 = vpop.xlane.xlu1 %2036  ;;  %10164 = vrcp.f32 %v2040_v7 }
 0x49e   : > { %10166 = vrcp.f32 %v2037_v10  ;;  %9785 = vmatpush3.bf16.xpose.msk.msra.mxu1 %vm11341_vm13, %v9783_v38  ;;  %v9807_v45 = vpack.c.bf16 %v2228_v8, %v2227_v16  ;;  %v768_v10 = vld [vmem:[%s13412_s4 + $0x50] sm:$0xff] }
 0x49f   : > { %v10157_v1 = vpop.eup %10156  ;;  %9786 = vmatprep.subr.bf16.mxu1 %v13432_v14 }
 0x4a0   : > { %v10159_v62 = vpop.eup %10158  ;;  %v2218_v11 = vmul.f32 %v10157_v1, %v11121_v3  ;;  %v2076_v29 = vpop.xlane.xlu0 %2075  ;;  %9809 = vmatpush3.bf16.xpose.msk.msra.mxu0 %vm11341_vm13, %v9807_v45 }
 0x4a1   : > { %v2073_v30 = vpop.xlane.xlu1 %2072  ;;  %v2217_v34 = vmul.f32 %v10159_v62, %v11118_v27  ;;  %10168 = vrcp.f32 %v2076_v29  ;;  %9810 = vmatprep.subr.bf16.mxu0 %v13432_v14  ;;  %v2705_v29 = vld [vmem:[%s13363_s6] sm:$0xff] }
 0x4a2   : > { %10170 = vrcp.f32 %v2073_v30 }
 0x4a3   : > { %v10161_v2 = vpop.eup %10160  ;;  %v9787_v47 = vpack.c.bf16 %v2218_v11, %v2217_v34 }
 0x4a4   : > { %v10163_v19 = vpop.eup %10162  ;;  %v2230_v21 = vmul.f32 %v10161_v2, %v11131_v51  ;;  %v2046_v8 = vpop.xlane.xlu0 %2045 }
 0x4a5   : > { %v2043_v16 = vpop.xlane.xlu1 %2042  ;;  %v2229_v3 = vmul.f32 %v10163_v19, %v11128_v24  ;;  %10172 = vrcp.f32 %v2046_v8 }
 0x4a6   : > { %10174 = vrcp.f32 %v2043_v16  ;;  %9789 = vmatpush3.bf16.xpose.msk.msra.mxu1 %vm11341_vm13, %v9787_v47 }
 0x4a7   : > { %v10165_v7 = vpop.eup %10164  ;;  %v9811_v27 = vpack.c.bf16 %v2230_v21, %v2229_v3  ;;  %9790 = vmatprep.subr.bf16.mxu1 %v13432_v14 }
 0x4a8   : > { %v10167_v38 = vpop.eup %10166  ;;  %v2220_v51 = vmul.f32 %v10165_v7, %v11141_v26  ;;  %v2082_v45 = vpop.xlane.xlu0 %2081  ;;  %v2707_v7 = vld [vmem:[%s13363_s6 + $0x10] sm:$0xff] }
 0x4a9   : > { %v2079_v1 = vpop.xlane.xlu1 %2078  ;;  %v2219_v24 = vmul.f32 %v10167_v38, %v11138_v20  ;;  %10176 = vrcp.f32 %v2082_v45  ;;  %9813 = vmatpush3.bf16.xpose.msk.msra.mxu0 %vm11341_vm13, %v9811_v27  ;;  %v769_v20 = vld [vmem:[%s13412_s4 + $0x58] sm:$0xff] }
 0x4aa   : > { %10178 = vrcp.f32 %v2079_v1  ;;  %822 = vperm.xlu1 %10023, %v768_v10   ;;  %9814 = vmatprep.subr.bf16.mxu0 %v13432_v14 }
 0x4ab   : > { %v10169_v62 = vpop.eup %10168  ;;  %v9791_v11 = vpack.c.bf16 %v2220_v51, %v2219_v24  ;;  %v2798_v24 = vld [vmem:[%s13364_s7] sm:$0xff] }
 0x4ac   : > { %v10171_v30 = vpop.eup %10170  ;;  %v2232_v26 = vmul.f32 %v10169_v62, %v11151_v32  ;;  %v2052_v34 = vpop.xlane.xlu0 %2051  ;;  %v2706_v32 = vld [vmem:[%s13363_s6 + $0x8] sm:$0xff] }
 0x4ad   : > { %v2049_v2 = vpop.xlane.xlu1 %2048  ;;  %v2231_v47 = vmul.f32 %v10171_v30, %v11148_v41  ;;  %10180 = vrcp.f32 %v2052_v34 }
 0x4ae   : > { %10182 = vrcp.f32 %v2049_v2  ;;  %9793 = vmatpush3.bf16.xpose.msk.msra.mxu1 %vm11341_vm13, %v9791_v11  ;;  %2711 = vperm.xlu1 %10023, %v2705_v29   ;;  %v2802_v2 = vld [vmem:[%s13365_s8] sm:$0xff] }
 0x4af   : > { %v10173_v19 = vpop.eup %10172  ;;  %827 = vperm.xlu0 %10022, %v769_v20   ;;  %v9815_v21 = vpack.c.bf16 %v2232_v26, %v2231_v47  ;;  %9794 = vmatprep.subr.bf16.mxu1 %v13432_v14 }
 0x4b0   : > { %v10175_v8 = vpop.eup %10174  ;;  %v2222_v16 = vmul.f32 %v10173_v19, %v11161_v22  ;;  %v2088_v3 = vpop.xlane.xlu0 %2087  ;;  %v2708_v22 = vld [vmem:[%s13363_s6 + $0x18] sm:$0xff] }
 0x4b1   : > { %v2085_v41 = vpop.xlane.xlu1 %2084  ;;  %v2221_v27 = vmul.f32 %v10175_v8, %v11158_v37  ;;  %10184 = vrcp.f32 %v2088_v3  ;;  %9817 = vmatpush3.bf16.xpose.msk.msra.mxu0 %vm11341_vm13, %v9815_v21 }
 0x4b2   : > { %10186 = vrcp.f32 %v2085_v41  ;;  %2716 = vperm.xlu1 %10023, %v2706_v32   ;;  %9818 = vmatprep.subr.bf16.mxu0 %v13432_v14  ;;  %v2801_v41 = vld [vmem:[%s13364_s7 + $0x18] sm:$0xff] }
 0x4b3   : > { %v10177_v10 = vpop.eup %10176  ;;  %2721 = vperm.xlu0 %10022, %v2707_v7   ;;  %v9795_v38 = vpack.c.bf16 %v2222_v16, %v2221_v27 }
 0x4b4   : > { %v10179_v51 = vpop.eup %10178  ;;  %v2234_v45 = vmul.f32 %v10177_v10, %v11171_v56  ;;  %v2058_v1 = vpop.xlane.xlu0 %2057  ;;  %v2799_v56 = vld [vmem:[%s13364_s7 + $0x8] sm:$0xff] }
 0x4b5   : > { %v2055_v37 = vpop.xlane.xlu1 %2054  ;;  %v2233_v62 = vmul.f32 %v10179_v51, %v11168_v53  ;;  %10188 = vrcp.f32 %v2058_v1 }
 0x4b6   : > { %10190 = vrcp.f32 %v2055_v37  ;;  %9797 = vmatpush3.bf16.xpose.msk.msra.mxu1 %vm11341_vm13, %v9795_v38  ;;  %2726 = vperm.xlu1 %10023, %v2708_v22   ;;  %v2805_v22 = vld [vmem:[%s13365_s8 + $0x18] sm:$0xff]  ;;  %v2908_v37 = vld [vmem:[%s13367_s10 + $0x8] sm:$0xff] }
 0x4b7   : > { %v10181_v11 = vpop.eup %10180  ;;  %2851 = vperm.xlu0 %10022, %v2798_v24   ;;  %v9819_v29 = vpack.c.bf16 %v2234_v45, %v2233_v62  ;;  %9798 = vmatprep.subr.bf16.mxu1 %v13432_v14  ;;  %v2910_v24 = vld [vmem:[%s13367_s10 + $0x18] sm:$0xff]  ;;  %v2911_v62 = vld [vmem:[%s13367_s10 + $0x20] sm:$0xff] }
 0x4b8   : > { %v10183_v30 = vpop.eup %10182  ;;  %v2224_v26 = vmul.f32 %v10181_v11, %v11180_v5  ;;  %v2094_v34 = vpop.xlane.xlu0 %2093  ;;  %v2803_v5 = vld [vmem:[%s13365_s8 + $0x8] sm:$0xff] }
 0x4b9   : > { %v2091_v53 = vpop.xlane.xlu1 %2090  ;;  %v2223_v20 = vmul.f32 %v10183_v30, %v11177_v46  ;;  %10192 = vrcp.f32 %v2094_v34  ;;  %9821 = vmatpush3.bf16.xpose.msk.msra.mxu0 %vm11341_vm13, %v9819_v29  ;;  %v2800_v46 = vld [vmem:[%s13364_s7 + $0x10] sm:$0xff]  ;;  %v13433_v11 = vld [vmem:[#allocation16_spill] sm:$0xff]  ;;  %v13434_v29 = vld [vmem:[#allocation15_spill] sm:$0xff]  ;;  %v13435_v30 = vmov 0.0  }
 0x4ba   : > { %10194 = vrcp.f32 %v2091_v53  ;;  %2856 = vperm.xlu1 %10023, %v2799_v56   ;;  %9822 = vmatprep.subr.bf16.mxu0 %v13432_v14  ;;  %v949_v56 = vadd.f32 %v13434_v29, %v13433_v11  ;;  %v3068_v34 = vld [vmem:[%s13369_s12] sm:$0xff]  ;;  %v3069_v53 = vld [vmem:[%s13369_s12 + $0x8] sm:$0xff] }
 0x4bb   : > { %v10185_v47 = vpop.eup %10184  ;;  %2875 = vperm.xlu0 %10022, %v2802_v2   ;;  %v9799_v19 = vpack.c.bf16 %v2224_v26, %v2223_v20  ;;  %v2914_v26 = vld [vmem:[%s13367_s10 + $0x38] sm:$0xff]  ;;  %v3070_v2 = vld [vmem:[%s13369_s12 + $0x10] sm:$0xff] }
 0x4bc   : > { %v10187_v21 = vpop.eup %10186  ;;  %v2236_v32 = vmul.f32 %v10185_v47, %v11190_v9  ;;  %v3071_v20 = vld [vmem:[%s13369_s12 + $0x18] sm:$0xff]  ;;  %v3162_v47 = vld [vmem:[%s13370_s13] sm:$0xff] }
 0x4bd   : > { %v2235_v8 = vmul.f32 %v10187_v21, %v11188_v31  ;;  %v2804_v31 = vld [vmem:[%s13365_s8 + $0x10] sm:$0xff]  ;;  %v3167_v21 = vld [vmem:[%s13371_s14 + $0x8] sm:$0xff] }
 0x4be   : > { %9801 = vmatpush3.bf16.xpose.msk.msra.mxu1 %vm11341_vm13, %v9799_v19  ;;  %2880 = vperm.xlu1 %10023, %v2803_v5   ;;  %v3163_v19 = vld [vmem:[%s13370_s13 + $0x8] sm:$0xff]  ;;  %v3166_v5 = vld [vmem:[%s13371_s14] sm:$0xff] }
 0x4bf   : > { %v10189_v16 = vpop.eup %10188  ;;  %2861 = vperm.xlu0 %10022, %v2800_v46   ;;  %v9823_v3 = vpack.c.bf16 %v2236_v32, %v2235_v8  ;;  %9802 = vmatprep.subr.bf16.mxu1 %v13432_v14  ;;  %v3164_v32 = vld [vmem:[%s13370_s13 + $0x10] sm:$0xff]  ;;  %v3165_v46 = vld [vmem:[%s13370_s13 + $0x18] sm:$0xff] }
 0x4c0   : > { %v10191_v9 = vpop.eup %10190  ;;  %v2226_v7 = vmul.f32 %v10189_v16, %v11198_v0  ;;  %v3168_v8 = vld [vmem:[%s13371_s14 + $0x10] sm:$0xff]  ;;  %v3169_v16 = vld [vmem:[%s13371_s14 + $0x18] sm:$0xff] }
 0x4c1   : > { %v2225_v27 = vmul.f32 %v10191_v9, %v11196_v63  ;;  %9825 = vmatpush3.bf16.xpose.msk.msra.mxu0 %vm11341_vm13, %v9823_v3  ;;  %v2907_v63 = vld [vmem:[%s13367_s10] sm:$0xff] }
 0x4c2   : > { %2866 = vperm.xlu1 %10023, %v2801_v41   ;;  %9826 = vmatprep.subr.bf16.mxu0 %v13432_v14  ;;  %v8548_v3 = vld [vmem:[%s13412_s4 + $0x60] sm:$0xff]  ;;  %v8549_v41 = vld [vmem:[%s13412_s4 + $0x68] sm:$0xff] }
 0x4c3   : > { %v10193_v10 = vpop.eup %10192  ;;  %2885 = vperm.xlu0 %10022, %v2804_v31   ;;  %v9803_v38 = vpack.c.bf16 %v2226_v7, %v2225_v27  ;;  %v8552_v9 = vld [vmem:[%s13412_s4 + $0x80] sm:$0xff]  ;;  %v8553_v7 = vld [vmem:[%s13412_s4 + $0x88] sm:$0xff]  ;;  %v8550_v31 = vld [vmem:[%s13412_s4 + $0x70] sm:$0xff] }
 0x4c4   : > { %v10195_v0 = vpop.eup %10194  ;;  %v2238_v51 = vmul.f32 %v10193_v10, %v11206_v35  ;;  %v2909_v35 = vld [vmem:[%s13367_s10 + $0x10] sm:$0xff]  ;;  %v8551_v27 = vld [vmem:[%s13412_s4 + $0x78] sm:$0xff] }
 0x4c5   : > { %v2237_v45 = vmul.f32 %v10195_v0, %v11204_v12  ;;  %v946_v12 = vadd.f32 %v10854_v44, %v11038_v4  ;;  %v2912_v44 = vld [vmem:[%s13367_s10 + $0x28] sm:$0xff]  ;;  %v2913_v4 = vld [vmem:[%s13367_s10 + $0x30] sm:$0xff] }
 0x4c6   : > { %9805 = vmatpush3.bf16.xpose.msk.msra.mxu1 %vm11341_vm13, %v9803_v38  ;;  %2890 = vperm.xlu1 %10023, %v2805_v22  }
 0x4c7   : > { %2917 = vperm.xlu0 %10022, %v2907_v63   ;;  %v9827_v1 = vpack.c.bf16 %v2238_v51, %v2237_v45  ;;  %9830 = vmatprep.subr.bf16.mxu1 %v13432_v14 }
 0x4c9   : > { %9829 = vmatpush3.bf16.xpose.msk.msra.mxu0 %vm11341_vm13, %v9827_v1 }
 0x4ca   : > { %2922 = vperm.xlu1 %10023, %v2908_v37   ;;  %9854 = vmatprep.subr.bf16.mxu0 %v13432_v14 }
 0x4cb   : > { %2927 = vperm.xlu0 %10022, %v2909_v35  }
 0x4cd   : > { %9399 = vmatmul.mubr.msk.f32.vlgmr.msra.gmra.mrb[34].mxu1 %vm1733_vm10, %v946_v12 }
 0x4ce   : > { %2932 = vperm.xlu1 %10023, %v2910_v24   ;;  %9452 = vmatprep.mubr.msk.f32.mxu1 %vm10511_vm12, %v13435_v30 }
 0x4cf   : > { %2937 = vperm.xlu0 %10022, %v2911_v62  }
 0x4d0   : > { %9426 = vmatmul.mubr.msk.f32.vlgmr.msra.gmra.mrb[30].mxu0 %vm1733_vm10, %v949_v56 }
 0x4d1   : > { %9479 = vmatprep.mubr.msk.f32.mxu0 %vm10511_vm12, %v13435_v30 }
 0x4d2   : > { %2942 = vperm.xlu1 %10023, %v2912_v44  }
 0x4d3   : > { %2947 = vperm.xlu0 %10022, %v2913_v4  }
 0x4d6   : > { %2952 = vperm.xlu1 %10023, %v2914_v26  }
 0x4d7   : > { %3074 = vperm.xlu0 %10022, %v3068_v34  }
 0x4da   : > { %3079 = vperm.xlu1 %10023, %v3069_v53  }
 0x4db   : > { %3084 = vperm.xlu0 %10022, %v3070_v2  }
 0x4de   : > { %3089 = vperm.xlu1 %10023, %v3071_v20  }
 0x4df   : > { %3214 = vperm.xlu0 %10022, %v3162_v47  }
 0x4e2   : > { %3219 = vperm.xlu1 %10023, %v3163_v19  }
 0x4e3   : > { %3238 = vperm.xlu0 %10022, %v3166_v5  }
 0x4e6   : > { %3243 = vperm.xlu1 %10023, %v3167_v21  }
 0x4e7   : > { %3224 = vperm.xlu0 %10022, %v3164_v32  }
 0x4ea   : > { %3229 = vperm.xlu1 %10023, %v3165_v46  }
 0x4eb   : > { %3248 = vperm.xlu0 %10022, %v3168_v8  }
 0x4ee   : > { %3253 = vperm.xlu1 %10023, %v3169_v16  }
 0x4ef   : > { %3290 = vperm.xlu0 %10022, %v8548_v3  }
 0x4f2   : > { %3295 = vperm.xlu1 %10023, %v8549_v41  }
 0x4f3   : > { %3310 = vperm.xlu0 %10022, %v8552_v9  }
 0x4f6   : > { %3315 = vperm.xlu1 %10023, %v8553_v7  }
 0x4f7   : > { %3300 = vperm.xlu0 %10022, %v8550_v31  }
 0x4f9   : > { %v2100_v10 = vpop.xlane.xlu0 %2099 }
 0x4fa   : > { %10196 = vrcp.f32 %v2100_v10  ;;  %3305 = vperm.xlu1 %10023, %v8551_v27   ;;  %v2097_v38 = vpop.xlane.xlu1 %2096 }
 0x4fb   : > { %10198 = vrcp.f32 %v2097_v38 }
 0x4fd   : > { %v2136_v22 = vpop.xlane.xlu0 %2135 }
 0x4fe   : > { %10200 = vrcp.f32 %v2136_v22  ;;  %v2133_v0 = vpop.xlane.xlu1 %2132 }
 0x4ff   : > { %10202 = vrcp.f32 %v2133_v0 }
 0x501   : > { %v2106_v51 = vpop.xlane.xlu0 %2105 }
 0x502   : > { %10204 = vrcp.f32 %v2106_v51  ;;  %v2103_v63 = vpop.xlane.xlu1 %2102 }
 0x503   : > { %10206 = vrcp.f32 %v2103_v63 }
 0x504   : > { %v10197_v45 = vpop.eup %10196 }
 0x505   : > { %v10199_v1 = vpop.eup %10198  ;;  %v2240_v37 = vmul.f32 %v10197_v45, %v11224_v52  ;;  %v2142_v35 = vpop.xlane.xlu0 %2141 }
 0x506   : > { %v2239_v12 = vmul.f32 %v10199_v1, %v11226_v42  ;;  %10208 = vrcp.f32 %v2142_v35  ;;  %v2139_v24 = vpop.xlane.xlu1 %2138 }
 0x507   : > { %10210 = vrcp.f32 %v2139_v24 }
 0x508   : > { %v10201_v62 = vpop.eup %10200  ;;  %v9831_v11 = vpack.c.bf16 %v2240_v37, %v2239_v12 }
 0x509   : > { %v10203_v29 = vpop.eup %10202  ;;  %v2252_v56 = vmul.f32 %v10201_v62, %v11234_v40  ;;  %v2112_v44 = vpop.xlane.xlu0 %2111 }
 0x50a   : > { %v2251_v4 = vmul.f32 %v10203_v29, %v11236_v59  ;;  %10212 = vrcp.f32 %v2112_v44  ;;  %v2109_v26 = vpop.xlane.xlu1 %2108  ;;  %9833 = vmatpush3.bf16.xpose.msk.msra.mxu1 %vm11341_vm13, %v9831_v11 }
 0x50b   : > { %10214 = vrcp.f32 %v2109_v26  ;;  %9834 = vmatprep.subr.bf16.mxu1 %v13432_v14 }
 0x50c   : > { %v10205_v52 = vpop.eup %10204  ;;  %v9855_v42 = vpack.c.bf16 %v2252_v56, %v2251_v4 }
 0x50d   : > { %v10207_v34 = vpop.eup %10206  ;;  %v2242_v53 = vmul.f32 %v10205_v52, %v11244_v55  ;;  %v2148_v2 = vpop.xlane.xlu0 %2147 }
 0x50e   : > { %v2241_v20 = vmul.f32 %v10207_v34, %v11246_v17  ;;  %10216 = vrcp.f32 %v2148_v2  ;;  %v2145_v40 = vpop.xlane.xlu1 %2144  ;;  %9857 = vmatpush3.bf16.xpose.msk.msra.mxu0 %vm11341_vm13, %v9855_v42 }
 0x50f   : > { %10218 = vrcp.f32 %v2145_v40  ;;  %9858 = vmatprep.subr.bf16.mxu0 %v13432_v14 }
 0x510   : > { %v10209_v59 = vpop.eup %10208  ;;  %v9835_v47 = vpack.c.bf16 %v2242_v53, %v2241_v20 }
 0x511   : > { %v10211_v19 = vpop.eup %10210  ;;  %v2254_v5 = vmul.f32 %v10209_v59, %v11254_v28  ;;  %v2118_v21 = vpop.xlane.xlu0 %2117 }
 0x512   : > { %v2253_v32 = vmul.f32 %v10211_v19, %v11256_v33  ;;  %10220 = vrcp.f32 %v2118_v21  ;;  %v2115_v55 = vpop.xlane.xlu1 %2114  ;;  %9837 = vmatpush3.bf16.xpose.msk.msra.mxu1 %vm11341_vm13, %v9835_v47 }
 0x513   : > { %10222 = vrcp.f32 %v2115_v55  ;;  %9838 = vmatprep.subr.bf16.mxu1 %v13432_v14 }
 0x514   : > { %v10213_v17 = vpop.eup %10212  ;;  %v9859_v46 = vpack.c.bf16 %v2254_v5, %v2253_v32  ;;  %v13437_v5 = vld [vmem:[#allocation14_spill] sm:$0xff] }
 0x515   : > { %v10215_v8 = vpop.eup %10214  ;;  %v2244_v16 = vmul.f32 %v10213_v17, %v11264_v43  ;;  %v2154_v3 = vpop.xlane.xlu0 %2153 }
 0x516   : > { %v2243_v41 = vmul.f32 %v10215_v8, %v11266_v39  ;;  %10224 = vrcp.f32 %v2154_v3  ;;  %v2151_v28 = vpop.xlane.xlu1 %2150  ;;  %9861 = vmatpush3.bf16.xpose.msk.msra.mxu0 %vm11341_vm13, %v9859_v46 }
 0x517   : > { %10226 = vrcp.f32 %v2151_v28  ;;  %9862 = vmatprep.subr.bf16.mxu0 %v13432_v14 }
 0x518   : > { %v10217_v33 = vpop.eup %10216  ;;  %v9839_v9 = vpack.c.bf16 %v2244_v16, %v2243_v41 }
 0x519   : > { %v10219_v7 = vpop.eup %10218  ;;  %v2256_v31 = vmul.f32 %v10217_v33, %v11274_v57  ;;  %v2124_v27 = vpop.xlane.xlu0 %2123  ;;  %v10031_v33 = vld [vmem:[%s13362_s5 + $0x8] sm:$0xff]  }
 0x51a   : > { %v2255_v10 = vmul.f32 %v10219_v7, %v11276_v50  ;;  %10228 = vrcp.f32 %v2124_v27  ;;  %v2121_v43 = vpop.xlane.xlu1 %2120  ;;  %9841 = vmatpush3.bf16.xpose.msk.msra.mxu1 %vm11341_vm13, %v9839_v9  ;;  %v10032_v9 = vld [vmem:[%s13366_s9] sm:$0xff]  }
 0x51b   : > { %10230 = vrcp.f32 %v2121_v43  ;;  %9842 = vmatprep.subr.bf16.mxu1 %v13432_v14 }
 0x51c   : > { %v10221_v39 = vpop.eup %10220  ;;  %v9863_v38 = vpack.c.bf16 %v2256_v31, %v2255_v10 }
 0x51d   : > { %v10223_v22 = vpop.eup %10222  ;;  %v2246_v0 = vmul.f32 %v10221_v39, %v11284_v6  ;;  %v2160_v51 = vpop.xlane.xlu0 %2159 }
 0x51e   : > { %v2245_v63 = vmul.f32 %v10223_v22, %v11286_v15  ;;  %10232 = vrcp.f32 %v2160_v51  ;;  %v2157_v57 = vpop.xlane.xlu1 %2156  ;;  %9865 = vmatpush3.bf16.xpose.msk.msra.mxu0 %vm11341_vm13, %v9863_v38 }
 0x51f   : > { %10234 = vrcp.f32 %v2157_v57  ;;  %9866 = vmatprep.subr.bf16.mxu0 %v13432_v14 }
 0x520   : > { %v10225_v50 = vpop.eup %10224  ;;  %v9843_v45 = vpack.c.bf16 %v2246_v0, %v2245_v63  ;;  %v13438_v63 = vld [vmem:[#allocation10_spill] sm:$0xff] }
 0x521   : > { %v10227_v1 = vpop.eup %10226  ;;  %v2258_v37 = vmul.f32 %v10225_v50, %v11294_v13  ;;  %v2130_v35 = vpop.xlane.xlu0 %2129 }
 0x522   : > { %v2257_v12 = vmul.f32 %v10227_v1, %v11296_v25  ;;  %10236 = vrcp.f32 %v2130_v35  ;;  %v2127_v6 = vpop.xlane.xlu1 %2126  ;;  %9845 = vmatpush3.bf16.xpose.msk.msra.mxu1 %vm11341_vm13, %v9843_v45  ;;  %v13439_v1 = vld [vmem:[#allocation12_spill] sm:$0xff]  ;;  %v13440_v35 = vld [vmem:[#allocation9_spill] sm:$0xff] }
 0x523   : > { %10238 = vrcp.f32 %v2127_v6  ;;  %9846 = vmatprep.subr.bf16.mxu1 %v13432_v14 }
 0x524   : > { %v10229_v15 = vpop.eup %10228  ;;  %v9867_v24 = vpack.c.bf16 %v2258_v37, %v2257_v12 }
 0x525   : > { %v10231_v62 = vpop.eup %10230  ;;  %v2248_v11 = vmul.f32 %v10229_v15, %v11304_v58  ;;  %v2166_v29 = vpop.xlane.xlu0 %2165  ;;  %v13441_v15 = vld [vmem:[#allocation11_spill] sm:$0xff] }
 0x526   : > { %v2247_v56 = vmul.f32 %v10231_v62, %v11306_v61  ;;  %10240 = vrcp.f32 %v2166_v29  ;;  %v2163_v13 = vpop.xlane.xlu1 %2162  ;;  %9869 = vmatpush3.bf16.xpose.msk.msra.mxu0 %vm11341_vm13, %v9867_v24 }
 0x527   : > { %10242 = vrcp.f32 %v2163_v13  ;;  %9870 = vmatprep.subr.bf16.mxu0 %v13432_v14 }
 0x528   : > { %v10233_v25 = vpop.eup %10232  ;;  %v9847_v44 = vpack.c.bf16 %v2248_v11, %v2247_v56 }
 0x529   : > { %v10235_v4 = vpop.eup %10234  ;;  %v2260_v26 = vmul.f32 %v10233_v25, %v11312_v23 }
 0x52a   : > { %v2259_v52 = vmul.f32 %v10235_v4, %v11314_v48  ;;  %9849 = vmatpush3.bf16.xpose.msk.msra.mxu1 %vm11341_vm13, %v9847_v44  ;;  %v823_v59 = vpop.permute.xlu1 %822 }
 0x52b   : > { %9850 = vmatprep.subr.bf16.mxu1 %v13432_v14 }
 0x52c   : > { %v10237_v58 = vpop.eup %10236  ;;  %v9871_v61 = vpack.c.bf16 %v2260_v26, %v2259_v52 }
 0x52d   : > { %v10239_v42 = vpop.eup %10238  ;;  %v2250_v34 = vmul.f32 %v10237_v58, %v11320_v49  ;;  %v13436_v49 = vld [vmem:[#allocation13_spill] sm:$0xff] }
 0x52e   : > { %v2249_v53 = vmul.f32 %v10239_v42, %v11322_v18  ;;  %9873 = vmatpush3.bf16.xpose.msk.msra.mxu0 %vm11341_vm13, %v9871_v61  ;;  %v954_v18 = vadd.f32 %v13436_v49, %v823_v59  ;;  %v828_v19 = vpop.permute.xlu0 %827  ;;  %v2712_v7 = vpop.permute.xlu1 %2711 }
 0x52f   : > { %9874 = vmatprep.subr.bf16.mxu0 %v13432_v14  ;;  %v957_v21 = vadd.f32 %v13437_v5, %v828_v19 }
 0x530   : > { %v10241_v23 = vpop.eup %10240  ;;  %v9851_v2 = vpack.c.bf16 %v2250_v34, %v2249_v53 }
 0x531   : > { %v10243_v48 = vpop.eup %10242  ;;  %v2262_v20 = vmul.f32 %v10241_v23, %v11328_v36  ;;  %v10030_v36 = vld [vmem:[%s13362_s5] sm:$0xff]  }
 0x532   : > { %v2261_v40 = vmul.f32 %v10243_v48, %v11330_v54  ;;  %9853 = vmatpush3.bf16.xpose.msk.msra.mxu1 %vm11341_vm13, %v9851_v2  ;;  %v2717_v31 = vpop.permute.xlu1 %2716  ;;  %v2722_v10 = vpop.permute.xlu0 %2721 }
 0x534   : > { %v9875_v47 = vpack.c.bf16 %v2262_v20, %v2261_v40 }
 0x536   : > { %9877 = vmatpush3.bf16.xpose.msk.msra.mxu0 %vm11341_vm13, %v9875_v47  ;;  %v2727_v0 = vpop.permute.xlu1 %2726 }
 0x539   : > { %9453 = vmatmul.mubr.msk.f32.vlgmr.msra.gmra.mrb[36].mxu1 %vm1733_vm10, %v954_v18 }
 0x53a   : > { %9486 = vmatprep.mubr.msk.bf16.mxu1 %vm860_vm8, %v10030_v36 }
 0x53d   : > { %9480 = vmatmul.mubr.msk.f32.vlgmr.msra.gmra.mrb[32].mxu0 %vm1733_vm10, %v957_v21 }
 0x53e   : > { %9494 = vmatprep.mubr.msk.bf16.mxu0 %vm860_vm8, %v10032_v9 }
 0x5a0   : > { %v2368_v54 = vpop.f32.mrb[34].mxu1 }
 0x5a1   : > { %v9400_v32 = vpop.f32.mrb[35].mxu1 }
 0x5a3   : > { %v2477_v55 = vpop.f32.mrb[30].mxu0 }
 0x5a4   : > { %v2703_v17 = vpack.c.bf16 %v2477_v55, %v2368_v54  ;;  %v9427_v46 = vpop.f32.mrb[31].mxu0 }
 0x5a6   : > { %9482 = vmatprep.subr.bf16.mxu1 %v2703_v17 }
 0x5a7   : > { %9483 = vmatpush3.bf16.msra.mxu1 %v2703_v17 }
 0x60c   : > { %v2586_v8 = vpop.f32.mrb[36].mxu1 }
 0x60d   : > { %v9454_v16 = vpop.f32.mrb[37].mxu1 }
 0x60e   : > { %v2852_v16 = vpop.permute.xlu0 %2851 }
 0x610   : > { %v2695_v3 = vpop.f32.mrb[32].mxu0 }
 0x611   : > { %v2704_v41 = vpack.c.bf16 %v2695_v3, %v2586_v8  ;;  %v9481_v28 = vpop.f32.mrb[33].mxu0  ;;  %v2857_v3 = vpop.permute.xlu1 %2856 }
 0x613   : > { %9484 = vmatprep.subr.bf16.mxu1 %v2704_v41 }
 0x614   : > { %9485 = vmatpush3.bf16.msra.mxu1 %v2704_v41 }
 0x615   : > { %v2881_v9 = vpop.permute.xlu1 %2880 }
 0x617   : > { %9487 = vmatmul.mubr.msk.bf16.vlgmr.msra.gmra.mrb[40].mxu1 %vm860_vm8, %v10031_v33  ;;  %v2876_v33 = vpop.permute.xlu0 %2875 }
 0x6ea   : > { %v9488_v27 = vpop.f32.mrb[40].mxu1 }
 0x6eb   : > { %v2779_v43 = vpop.f32.mrb[41].mxu1  ;;  %v2788_v39 = vadd.f32 %v9488_v27, %v2722_v10 }
 0x6ec   : > { %v2780_v38 = vadd.f32 %v2779_v43, %v2712_v7  ;;  %v9489_v22 = vpop.f32.mrb[42].mxu1  ;;  %v2862_v7 = vpop.permute.xlu0 %2861 }
 0x6ed   : > { %v2782_v51 = vpop.f32.mrb[43].mxu1  ;;  %v2791_v50 = vadd.f32 %v9489_v22, %v2727_v0  ;;  %v2796_v37 = vadd.f32 %v2788_v39, %v13439_v1 }
 0x6ee   : > { %v2794_v57 = vadd.f32 %v2780_v38, %v13438_v63  ;;  %v2783_v45 = vadd.f32 %v2782_v51, %v2717_v31  ;;  %v2867_v31 = vpop.permute.xlu1 %2866 }
 0x6ef   : > { %v2797_v24 = vadd.f32 %v2791_v50, %v13441_v15  ;;  %v2809_v29 = vsel %vm1733_vm10, %v2796_v37, 0.0  ;;  %v10033_v15 = vld [vmem:[%s13366_s9 + $0x8] sm:$0xff]  }
 0x6f0   : > { %v2795_v12 = vadd.f32 %v2783_v45, %v13440_v35  ;;  %v2806_v6 = vsel %vm1733_vm10, %v2794_v57, 0.0 }
 0x6f1   : > { %v2811_v13 = vsel %vm1733_vm10, %v2797_v24, 0.0 }
 0x6f2   : > { %v2807_v62 = vsel %vm1733_vm10, %v2795_v12, 0.0  ;;  %v2891_v50 = vpop.permute.xlu1 %2890 }
 0x6f3   : > { %v2808_v11 = vadd.f32 %v2807_v62, %v2806_v6  ;;  %v10035_v62 = vld [vmem:[%s13366_s9 + $0x18] sm:$0xff]  }
 0x6f5   : > { %v2810_v56 = vadd.f32 %v2809_v29, %v2808_v11  ;;  %v10036_v11 = vld [vmem:[%s13368_s11] sm:$0xff]  }
 0x6f6   : > { %9510 = vmatprep.mubr.msk.bf16.mxu1 %vm3102_vm14, %v10036_v11 }
 0x6f7   : > { %v2812_v25 = vadd.f32 %v2811_v13, %v2810_v56  ;;  %v2923_v56 = vpop.permute.xlu1 %2922 }
 0x6f9   : > { %v2813_v44 = vrot.slane %v2812_v25, 4 }
 0x6fb   : > { %v2814_v4 = vadd.f32 %v2813_v44, %v2812_v25  ;;  %v2933_v25 = vpop.permute.xlu1 %2932 }
 0x6fd   : > { %v2815_v26 = vrot.slane %v2814_v4, 2 }
 0x6ff   : > { %v2816_v52 = vadd.f32 %v2815_v26, %v2814_v4 }
 0x701   : > { %v2817_v58 = vrot.slane %v2816_v52, 1 }
 0x703   : > { %v2818_v61 = vadd.f32 %v2817_v58, %v2816_v52 }
 0x705   : > { %v2820_v42 = vmul.f32 0.03125, %v2818_v61 }
 0x707   : > { %v2821_v34 = vsub.f32 %v2794_v57, %v2820_v42  ;;  %v2822_v53 = vsub.f32 %v2795_v12, %v2820_v42  ;;  %v2823_v23 = vsub.f32 %v2796_v37, %v2820_v42  ;;  %v2824_v2 = vsub.f32 %v2797_v24, %v2820_v42  ;;  %v2886_v57 = vpop.permute.xlu0 %2885  ;;  %v10034_v24 = vld [vmem:[%s13366_s9 + $0x10] sm:$0xff]  }
 0x709   : > { %v2825_v48 = vmul.f32 %v2821_v34, %v2821_v34  ;;  %v2826_v20 = vmul.f32 %v2822_v53, %v2822_v53  ;;  %v2827_v40 = vmul.f32 %v2823_v23, %v2823_v23  ;;  %v2828_v59 = vmul.f32 %v2824_v2, %v2824_v2 }
 0x70b   : > { %v2829_v47 = vsel %vm1733_vm10, %v2825_v48, 0.0  ;;  %v2830_v49 = vsel %vm1733_vm10, %v2826_v20, 0.0  ;;  %v2832_v19 = vsel %vm1733_vm10, %v2827_v40, 0.0  ;;  %v2834_v21 = vsel %vm1733_vm10, %v2828_v59, 0.0  ;;  %v2918_v29 = vpop.permute.xlu0 %2917 }
 0x70c   : > { %v2831_v18 = vadd.f32 %v2830_v49, %v2829_v47 }
 0x70e   : > { %v2833_v5 = vadd.f32 %v2832_v19, %v2831_v18 }
 0x70f   : > { %v2928_v13 = vpop.permute.xlu0 %2927 }
 0x710   : > { %v2835_v36 = vadd.f32 %v2834_v21, %v2833_v5 }
 0x712   : > { %v2836_v54 = vrot.slane %v2835_v36, 4 }
 0x713   : > { %v2938_v52 = vpop.permute.xlu0 %2937 }
 0x714   : > { %v2837_v32 = vadd.f32 %v2836_v54, %v2835_v36 }
 0x716   : > { %v2838_v55 = vrot.slane %v2837_v32, 2 }
 0x717   : > { %v2948_v47 = vpop.permute.xlu0 %2947 }
 0x718   : > { %v2839_v17 = vadd.f32 %v2838_v55, %v2837_v32 }
 0x71a   : > { %v2840_v46 = vrot.slane %v2839_v17, 1 }
 0x71c   : > { %v2841_v8 = vadd.f32 %v2840_v46, %v2839_v17 }
 0x71e   : > { %v2842_v41 = vmul.f32 0.03125, %v2841_v8 }
 0x720   : > { %v2843_v28 = vadd.f32 1e-05, %v2842_v41 }
 0x722   : > { %10244 = vrsqrt.f32 %v2843_v28 }
 0x72c   : > { %v10245_v27 = vpop.eup %10244 }
 0x72d   : > { %v2846_v10 = vmul.f32 %v10245_v27, %v2822_v53  ;;  %v2845_v43 = vmul.f32 %v10245_v27, %v2821_v34  ;;  %v2847_v39 = vmul.f32 %v10245_v27, %v2823_v23  ;;  %v2848_v38 = vmul.f32 %v10245_v27, %v2824_v2  ;;  %v2943_v53 = vpop.permute.xlu1 %2942 }
 0x72f   : > { %v2869_v22 = vmul.f32 %v2852_v16, %v2845_v43  ;;  %v2870_v0 = vmul.f32 %v2857_v3, %v2846_v10  ;;  %v2871_v51 = vmul.f32 %v2862_v7, %v2847_v39  ;;  %v2872_v63 = vmul.f32 %v2867_v31, %v2848_v38  ;;  %v3075_v7 = vpop.permute.xlu0 %3074 }
 0x731   : > { %v11618_v45 = vadd.f32 %v2876_v33, %v2869_v22  ;;  %v11620_v1 = vadd.f32 %v2881_v9, %v2870_v0  ;;  %v11622_v37 = vadd.f32 %v2886_v57, %v2871_v51  ;;  %v11624_v35 = vadd.f32 %v2891_v50, %v2872_v63  ;;  %v2953_v21 = vpop.permute.xlu1 %2952  ;;  %v10037_v33 = vld [vmem:[%s13368_s11 + $0x8] sm:$0xff]   ;;  %v10038_v9 = vld [vmem:[%s13421_s3 + $0x30] sm:$0xff]  }
 0x733   : > { %v2897_v12 = vpack.c.bf16 %v11620_v1, %v11618_v45  ;;  %v2898_v6 = vpack.c.bf16 %v11624_v35, %v11622_v37  ;;  %v3085_v10 = vpop.permute.xlu0 %3084 }
 0x735   : > { %9490 = vmatprep.subr.bf16.mxu0 %v2897_v12  ;;  %v3080_v31 = vpop.permute.xlu1 %3079 }
 0x736   : > { %9491 = vmatpush3.bf16.msra.mxu0 %v2897_v12 }
 0x737   : > { %9492 = vmatprep.subr.bf16.mxu0 %v2898_v6 }
 0x739   : > { %v3090_v0 = vpop.permute.xlu1 %3089 }
 0x73a   : > { %9493 = vmatpush3.bf16.msra.mxu0 %v2898_v6 }
 0x73d   : > { %9495 = vmatmul.mubr.msk.bf16.vlgmr.msra.gmra.mrb[36].mxu0 %vm860_vm8, %v10033_v15 }
 0x73e   : > { %9498 = vmatprep.mubr.msk.bf16.mxu0 %vm860_vm8, %v10034_v24 }
 0x745   : > { %9499 = vmatmul.mubr.msk.bf16.gmra.mrb[40].mxu0 %vm860_vm8, %v10035_v62 }
 0x746   : > { %9518 = vmatprep.mubr.msk.bf16.mxu0 %vm860_vm8, %v10038_v9 }
 0x810   : > { %v9496_v44 = vpop.f32.mrb[36].mxu0 }
 0x811   : > { %v3030_v4 = vadd.f32 %v9496_v44, %v2928_v13  ;;  %v3021_v26 = vpop.f32.mrb[37].mxu0 }
 0x812   : > { %v3022_v58 = vadd.f32 %v3021_v26, %v2918_v29  ;;  %v9497_v61 = vpop.f32.mrb[38].mxu0 }
 0x813   : > { %v3033_v42 = vadd.f32 %v9497_v61, %v2933_v25  ;;  %v3024_v34 = vpop.f32.mrb[39].mxu0  ;;  %v3054_v2 = vmax.f32 %v3030_v4, 0.0 }
 0x814   : > { %v3025_v23 = vadd.f32 %v3024_v34, %v2923_v56  ;;  %v3052_v20 = vmax.f32 %v3022_v58, 0.0 }
 0x815   : > { %v3055_v48 = vmax.f32 %v3033_v42, 0.0 }
 0x816   : > { %v3053_v40 = vmax.f32 %v3025_v23, 0.0 }
 0x817   : > { %v3065_v59 = vpack.c.bf16 %v3055_v48, %v3054_v2 }
 0x818   : > { %v3064_v49 = vpack.c.bf16 %v3053_v40, %v3052_v20  ;;  %v9500_v18 = vpop.f32.mrb[40].mxu0 }
 0x819   : > { %v3046_v19 = vadd.f32 %v9500_v18, %v2948_v47  ;;  %v3037_v5 = vpop.f32.mrb[41].mxu0 }
 0x81a   : > { %v3038_v36 = vadd.f32 %v3037_v5, %v2938_v52  ;;  %v9501_v54 = vpop.f32.mrb[42].mxu0  ;;  %9502 = vmatprep.subr.bf16.mxu1 %v3064_v49 }
 0x81b   : > { %v3049_v32 = vadd.f32 %v9501_v54, %v2953_v21  ;;  %v3040_v55 = vpop.f32.mrb[43].mxu0  ;;  %9503 = vmatpush3.bf16.msra.mxu1 %v3064_v49  ;;  %v3058_v46 = vmax.f32 %v3046_v19, 0.0 }
 0x81c   : > { %v3041_v17 = vadd.f32 %v3040_v55, %v2943_v53  ;;  %9504 = vmatprep.subr.bf16.mxu1 %v3065_v59  ;;  %v3056_v16 = vmax.f32 %v3038_v36, 0.0  ;;  %v3215_v55 = vpop.permute.xlu0 %3214 }
 0x81d   : > { %v3059_v8 = vmax.f32 %v3049_v32, 0.0 }
 0x81e   : > { %v3057_v3 = vmax.f32 %v3041_v17, 0.0  ;;  %v3220_v17 = vpop.permute.xlu1 %3219 }
 0x81f   : > { %v3067_v41 = vpack.c.bf16 %v3059_v8, %v3058_v46  ;;  %9505 = vmatpush3.bf16.msra.mxu1 %v3065_v59 }
 0x820   : > { %v3066_v28 = vpack.c.bf16 %v3057_v3, %v3056_v16  ;;  %v3239_v16 = vpop.permute.xlu0 %3238 }
 0x822   : > { %9506 = vmatprep.subr.bf16.mxu1 %v3066_v28  ;;  %v3244_v3 = vpop.permute.xlu1 %3243 }
 0x823   : > { %9507 = vmatpush3.bf16.msra.mxu1 %v3066_v28 }
 0x824   : > { %9508 = vmatprep.subr.bf16.mxu1 %v3067_v41 }
 0x826   : > { %v3230_v28 = vpop.permute.xlu1 %3229 }
 0x827   : > { %9509 = vmatpush3.bf16.msra.mxu1 %v3067_v41  ;;  %v3225_v41 = vpop.permute.xlu0 %3224 }
 0x82a   : > { %9511 = vmatmul.mubr.msk.bf16.vlgmr.msra.gmra.mrb[44].mxu1 %vm3102_vm14, %v10037_v33 }
 0x8fd   : > { %v9512_v27 = vpop.f32.mrb[44].mxu1 }
 0x8fe   : > { %v3143_v43 = vpop.f32.mrb[45].mxu1  ;;  %v3152_v39 = vadd.f32 %v9512_v27, %v3085_v10 }
 0x8ff   : > { %v3144_v38 = vadd.f32 %v3143_v43, %v3075_v7  ;;  %v9513_v22 = vpop.f32.mrb[46].mxu1 }
 0x900   : > { %v3146_v51 = vpop.f32.mrb[47].mxu1  ;;  %v3155_v57 = vadd.f32 %v9513_v22, %v3090_v0  ;;  %v3160_v12 = vadd.f32 %v3152_v39, %v11622_v37  ;;  %v3249_v22 = vpop.permute.xlu0 %3248 }
 0x901   : > { %v3158_v63 = vadd.f32 %v3144_v38, %v11618_v45  ;;  %v3147_v50 = vadd.f32 %v3146_v51, %v3080_v31  ;;  %v3254_v0 = vpop.permute.xlu1 %3253 }
 0x902   : > { %v3161_v24 = vadd.f32 %v3155_v57, %v11624_v35  ;;  %v3173_v29 = vsel %vm1733_vm10, %v3160_v12, 0.0 }
 0x903   : > { %v3159_v6 = vadd.f32 %v3147_v50, %v11620_v1  ;;  %v3170_v15 = vsel %vm1733_vm10, %v3158_v63, 0.0 }
 0x904   : > { %v3175_v13 = vsel %vm1733_vm10, %v3161_v24, 0.0 }
 0x905   : > { %v3171_v62 = vsel %vm1733_vm10, %v3159_v6, 0.0 }
 0x906   : > { %v3172_v11 = vadd.f32 %v3171_v62, %v3170_v15  ;;  %v10039_v15 = vld [vmem:[%s13421_s3 + $0x38] sm:$0xff]   ;;  %v10041_v62 = vld [vmem:[%s13421_s3 + $0x48] sm:$0xff]  }
 0x908   : > { %v3174_v56 = vadd.f32 %v3173_v29, %v3172_v11  ;;  %v10042_v11 = vld [vmem:[%s13421_s3 + $0x50] sm:$0xff]   ;;  %v10043_v29 = vld [vmem:[%s13421_s3 + $0x58] sm:$0xff]  }
 0x90a   : > { %v3176_v25 = vadd.f32 %v3175_v13, %v3174_v56  ;;  %v3291_v13 = vpop.permute.xlu0 %3290 }
 0x90c   : > { %v3177_v45 = vrot.slane %v3176_v25, 4 }
 0x90e   : > { %v3178_v44 = vadd.f32 %v3177_v45, %v3176_v25 }
 0x910   : > { %v3179_v4 = vrot.slane %v3178_v44, 2 }
 0x912   : > { %v3180_v26 = vadd.f32 %v3179_v4, %v3178_v44  ;;  %v3296_v4 = vpop.permute.xlu1 %3295 }
 0x914   : > { %v3181_v37 = vrot.slane %v3180_v26, 1 }
 0x916   : > { %v3182_v52 = vadd.f32 %v3181_v37, %v3180_v26 }
 0x918   : > { %v3183_v1 = vmul.f32 0.03125, %v3182_v52 }
 0x91a   : > { %v3184_v58 = vsub.f32 %v3158_v63, %v3183_v1  ;;  %v3185_v61 = vsub.f32 %v3159_v6, %v3183_v1  ;;  %v3186_v42 = vsub.f32 %v3160_v12, %v3183_v1  ;;  %v3187_v35 = vsub.f32 %v3161_v24, %v3183_v1  ;;  %v10040_v24 = vld [vmem:[%s13421_s3 + $0x40] sm:$0xff]   ;;  %v3311_v1 = vpop.permute.xlu0 %3310  ;;  %s10450_s3 = scalar_lea.vmem %s10449_s30, 32 }
 0x91b   : > { %p10452_p2 = scmp.lt.s32.totalorder %s10450_s3, %s10444_s29 }
 0x91c   : > { %v3188_v34 = vmul.f32 %v3184_v58, %v3184_v58  ;;  %v3189_v53 = vmul.f32 %v3185_v61, %v3185_v61  ;;  %v3190_v23 = vmul.f32 %v3186_v42, %v3186_v42  ;;  %v3191_v2 = vmul.f32 %v3187_v35, %v3187_v35 }
 0x91d   : > { %p10453_p3 = por %p10452_p2, %p10451_p1 }
 0x91e   : > { %v3192_v48 = vsel %vm1733_vm10, %v3188_v34, 0.0  ;;  %v3193_v20 = vsel %vm1733_vm10, %v3189_v53, 0.0  ;;  %v3195_v59 = vsel %vm1733_vm10, %v3190_v23, 0.0  ;;  %v3197_v49 = vsel %vm1733_vm10, %v3191_v2, 0.0  ;;  %v8555_v23 = vld [vmem:[%s13412_s4 + $0x98] sm:$0xff]  ;;  %v8554_v2 = vld [vmem:[%s13412_s4 + $0x90] sm:$0xff] }
 0x91f   : > { %v3194_v40 = vadd.f32 %v3193_v20, %v3192_v48  ;;  %v3301_v48 = vpop.permute.xlu0 %3300  ;;  %p10454_p4 = pnand %p10453_p3, %p10447_p0 }
 0x921   : > { %v3196_v47 = vadd.f32 %v3195_v59, %v3194_v40 }
 0x923   : > { %v3198_v18 = vadd.f32 %v3197_v49, %v3196_v47 }
 0x925   : > { %v3199_v19 = vrot.slane %v3198_v18, 4 }
 0x927   : > { %v3200_v5 = vadd.f32 %v3199_v19, %v3198_v18 }
 0x929   : > { %v3201_v21 = vrot.slane %v3200_v5, 2 }
 0x92b   : > { %v3202_v36 = vadd.f32 %v3201_v21, %v3200_v5 }
 0x92d   : > { %v3203_v54 = vrot.slane %v3202_v36, 1 }
 0x92f   : > { %v3204_v32 = vadd.f32 %v3203_v54, %v3202_v36 }
 0x931   : > { %v3205_v46 = vmul.f32 0.03125, %v3204_v32 }
 0x933   : > { %v3206_v8 = vadd.f32 1e-05, %v3205_v46 }
 0x935   : > { %10246 = vrsqrt.f32 %v3206_v8 }
 0x93f   : > { %v10247_v33 = vpop.eup %10246 }
 0x940   : > { %v3209_v9 = vmul.f32 %v10247_v33, %v3185_v61  ;;  %v3208_v7 = vmul.f32 %v10247_v33, %v3184_v58  ;;  %v3210_v31 = vmul.f32 %v10247_v33, %v3186_v42  ;;  %v3211_v27 = vmul.f32 %v10247_v33, %v3187_v35  ;;  %v3316_v35 = vpop.permute.xlu1 %3315 }
 0x942   : > { %v3232_v10 = vmul.f32 %v3215_v55, %v3208_v7  ;;  %v3233_v43 = vmul.f32 %v3220_v17, %v3209_v9  ;;  %v3234_v39 = vmul.f32 %v3225_v41, %v3210_v31  ;;  %v3235_v38 = vmul.f32 %v3230_v28, %v3211_v27 }
 0x944   : > { %v11666_v51 = vadd.f32 %v3239_v16, %v3232_v10  ;;  %v11668_v63 = vadd.f32 %v3244_v3, %v3233_v43  ;;  %v11670_v57 = vadd.f32 %v3249_v22, %v3234_v39  ;;  %v11672_v50 = vadd.f32 %v3254_v0, %v3235_v38  ;;  %v3306_v40 = vpop.permute.xlu1 %3305  ;;  %v8556_v22 = vld [vmem:[%s13412_s4 + $0xa0] sm:$0xff] }
 0x946   : > { %13442 = vst [vmem:[#allocation16_spill] sm:$0xff] %v11666_v51  ;;  %13443 = vst [vmem:[#allocation15_spill] sm:$0xff] %v11668_v63  ;;  %v3260_v12 = vpack.c.bf16 %v11668_v63, %v11666_v51  ;;  %v3261_v6 = vpack.c.bf16 %v11672_v50, %v11670_v57 }
 0x947   : > { %13444 = vst [vmem:[#allocation13_spill] sm:$0xff] %v11670_v57  ;;  %13445 = vst [vmem:[#allocation14_spill] sm:$0xff] %v11672_v50 }
 0x948   : > { %9514 = vmatprep.subr.bf16.mxu0 %v3260_v12 }
 0x949   : > { %9515 = vmatpush3.bf16.msra.mxu0 %v3260_v12 }
 0x94a   : > { %9516 = vmatprep.subr.bf16.mxu0 %v3261_v6 }
 0x94d   : > { %9517 = vmatpush3.bf16.msra.mxu0 %v3261_v6  ;;  %v8557_v6 = vld [vmem:[%s13412_s4 + $0xa8] sm:$0xff] }
 0x950   : > { %9519 = vmatmul.mubr.msk.bf16.vlgmr.msra.gmra.mrb[44].mxu0 %vm860_vm8, %v10039_v15 }
 0x951   : > { %9522 = vmatprep.mubr.msk.bf16.mxu0 %vm860_vm8, %v10040_v24 }
 0x958   : > { %9523 = vmatmul.mubr.msk.bf16.gmra.mrb[48].mxu0 %vm860_vm8, %v10041_v62 }
 0x959   : > { %9526 = vmatprep.mubr.msk.bf16.mxu0 %vm860_vm8, %v10042_v11 }
 0x960   : > { %9527 = vmatmul.mubr.msk.bf16.gmra.mrb[52].mxu0 %vm860_vm8, %v10043_v29 }
 0xa23   : > { %v9520_v56 = vpop.f32.mrb[44].mxu0 }
 0xa24   : > { %v3430_v25 = vpop.f32.mrb[45].mxu0  ;;  %v3439_v20 = vadd.f32 %v9520_v56, %v3301_v48 }
 0xa25   : > { %v3431_v45 = vadd.f32 %v3430_v25, %v3291_v13  ;;  %v9521_v44 = vpop.f32.mrb[46].mxu0 }
 0xa26   : > { %v3433_v26 = vpop.f32.mrb[47].mxu0  ;;  %v3442_v59 = vadd.f32 %v9521_v44, %v3306_v40 }
 0xa27   : > { %v3434_v37 = vadd.f32 %v3433_v26, %v3296_v4  ;;  %3477 = vxpose.xlu0.b32.start.end [1/1] (short) (narrow) %v3431_v45, 96 }
 0xa29   : > { %3670 = vxpose.xlu1.b32.start.end [1/1] (short) (narrow) %v3434_v37, 96 }
 0xa2b   : > { %v11698_v52 = vpop.f32.mrb[48].mxu0 }
 0xa2c   : > { %v3446_v58 = vpop.f32.mrb[49].mxu0 }
 0xa2d   : > { %v3447_v61 = vadd.f32 %v3446_v58, %v3311_v1  ;;  %v11700_v42 = vpop.f32.mrb[50].mxu0 }
 0xa2e   : > { %v3449_v34 = vpop.f32.mrb[51].mxu0 }
 0xa2f   : > { %v3450_v53 = vadd.f32 %v3449_v34, %v3316_v35  ;;  %9530 = vmatprep.subr.mxu1 %v3447_v61 }
 0xa30   : > { %9531 = vmatpush3.msra.mxu1 %v3447_v61 }
 0xa31   : > { %9550 = vmatprep.subr.mxu0 %v3450_v53 }
 0xa32   : > { %9551 = vmatpush3.msra.mxu0 %v3450_v53 }
 0xa33   : > { %v11730_v10 = vpop.f32.mrb[52].mxu0 }
 0xa34   : > { %13446 = vst [vmem:[#allocation10_spill] sm:$0xff] %v11730_v10  ;;  %v11732_v39 = vpop.f32.mrb[53].mxu0 }
 0xa35   : > { %13447 = vst [vmem:[#allocation12_spill] sm:$0xff] %v11732_v39  ;;  %v11739_v0 = vpop.f32.mrb[54].mxu0 }
 0xa36   : > { %13448 = vst [vmem:[#allocation9_spill] sm:$0xff] %v11739_v0  ;;  %v11741_v12 = vpop.f32.mrb[55].mxu0 }
 0xa37   : > { %13449 = vst [vmem:[#allocation11_spill] sm:$0xff] %v11741_v12 }
 0xa73   : > { %3325 = vperm.xlu1 %10023, %v8555_v23  }
 0xa7c   : > { %3320 = vperm.xlu0 %10022, %v8554_v2  }
 0xa9a   : > { %3863 = vxpose.xlu0.b32.start.end [1/1] (short) (narrow) %v3439_v20, 96 }
 0xa9c   : > { %4056 = vxpose.xlu1.b32.start.end [1/1] (short) (narrow) %v3442_v59, 96 }
 0xaa7   : > { %v3493_v47 = vpop.trf.xlu0 }
 0xaa8   : > { %9532 = vmatprep.mubr.msk.f32.mxu1 %vm992_vm9, %v3493_v47 }
 0xaa9   : > { %v3686_v49 = vpop.trf.xlu1 }
 0xaaa   : > { %9552 = vmatprep.mubr.msk.f32.mxu0 %vm992_vm9, %v3686_v49 }
 0xaab   : > { %v3494_v18 = vpop.trf.xlu0 }
 0xaac   : > { %9533 = vmatmul.mubr.msk.f32.vlgmr.msra.gmra.mrb[38].mxu1 %vm992_vm9, %v3494_v18 }
 0xaad   : > { %v3687_v19 = vpop.trf.xlu1 }
 0xaae   : > { %9553 = vmatmul.mubr.msk.f32.vlgmr.msra.gmra.mrb[34].mxu0 %vm992_vm9, %v3687_v19 }
 0xaaf   : > { %v3495_v5 = vpop.trf.xlu0 }
 0xab0   : > { %9535 = vmatprep.mubr.msk.f32.mxu1 %vm992_vm9, %v3495_v5 }
 0xab1   : > { %v3688_v21 = vpop.trf.xlu1 }
 0xab2   : > { %9555 = vmatprep.mubr.msk.f32.mxu0 %vm992_vm9, %v3688_v21 }
 0xab3   : > { %v3496_v36 = vpop.trf.xlu0 }
 0xab4   : > { %9536 = vmatmul.mubr.msk.f32.gmra.mrb[48].mxu1 %vm992_vm9, %v3496_v36 }
 0xab5   : > { %v3689_v54 = vpop.trf.xlu1 }
 0xab6   : > { %9556 = vmatmul.mubr.msk.f32.gmra.mrb[56].mxu0 %vm992_vm9, %v3689_v54 }
 0xab7   : > { %v3497_v32 = vpop.trf.xlu0 }
 0xab8   : > { %9538 = vmatprep.mubr.msk.f32.mxu1 %vm992_vm9, %v3497_v32 }
 0xab9   : > { %v3690_v55 = vpop.trf.xlu1 }
 0xaba   : > { %9558 = vmatprep.mubr.msk.f32.mxu0 %vm992_vm9, %v3690_v55 }
 0xabb   : > { %v3498_v17 = vpop.trf.xlu0 }
 0xabc   : > { %9539 = vmatmul.mubr.msk.f32.gmra.mrb[50].mxu1 %vm992_vm9, %v3498_v17 }
 0xabd   : > { %v3691_v46 = vpop.trf.xlu1 }
 0xabe   : > { %9559 = vmatmul.mubr.msk.f32.gmra.mrb[58].mxu0 %vm992_vm9, %v3691_v46 }
 0xabf   : > { %v3499_v8 = vpop.trf.xlu0 }
 0xac0   : > { %9541 = vmatprep.mubr.msk.f32.mxu1 %vm992_vm9, %v3499_v8 }
 0xac1   : > { %v3692_v16 = vpop.trf.xlu1 }
 0xac2   : > { %9561 = vmatprep.mubr.msk.f32.mxu0 %vm992_vm9, %v3692_v16 }
 0xac3   : > { %v3500_v3 = vpop.trf.xlu0 }
 0xac4   : > { %9542 = vmatmul.mubr.msk.f32.gmra.mrb[52].mxu1 %vm992_vm9, %v3500_v3 }
 0xac5   : > { %v3693_v41 = vpop.trf.xlu1 }
 0xac6   : > { %9562 = vmatmul.mubr.msk.f32.gmra.mrb[60].mxu0 %vm992_vm9, %v3693_v41 }
 0xac7   : > { %v3501_v28 = vpop.trf.xlu0 }
 0xac8   : > { %9544 = vmatprep.mubr.msk.f32.mxu1 %vm992_vm9, %v3501_v28 }
 0xac9   : > { %v3694_v33 = vpop.trf.xlu1 }
 0xaca   : > { %9564 = vmatprep.mubr.msk.f32.mxu0 %vm992_vm9, %v3694_v33 }
 0xacb   : > { %v3502_v9 = vpop.trf.xlu0 }
 0xacc   : > { %9545 = vmatmul.mubr.msk.f32.gmra.mrb[54].mxu1 %vm992_vm9, %v3502_v9 }
 0xacd   : > { %v3695_v7 = vpop.trf.xlu1 }
 0xace   : > { %9565 = vmatmul.mubr.msk.f32.gmra.mrb[62].mxu0 %vm992_vm9, %v3695_v7 }
 0xacf   : > { %v3503_v31 = vpop.trf.xlu0 }
 0xad0   : > { %9547 = vmatprep.mubr.msk.f32.mxu1 %vm992_vm9, %v3503_v31 }
 0xad1   : > { %v3696_v27 = vpop.trf.xlu1 }
 0xad2   : > { %9567 = vmatprep.mubr.msk.f32.mxu0 %vm992_vm9, %v3696_v27 }
 0xad3   : > { %v3504_v43 = vpop.trf.xlu0 }
 0xad4   : > { %9548 = vmatmul.mubr.msk.f32.gmra.mrb[56].mxu1 %vm992_vm9, %v3504_v43 }
 0xad5   : > { %v3697_v38 = vpop.trf.xlu1 }
 0xad6   : > { %9568 = vmatmul.mubr.msk.f32.gmra.mrb[64].mxu0 %vm992_vm9, %v3697_v38 }
 0xae6   : > { %3330 = vperm.xlu1 %10023, %v8556_v22  }
 0xaef   : > { %3335 = vperm.xlu0 %10022, %v8557_v6  }
 0xaf2   : > { %v3326_v15 = vpop.permute.xlu1 %3325 }
 0xaf3   : > { %v3458_v24 = vadd.f32 %v11700_v42, %v3326_v15 }
 0xaf5   : > { %9590 = vmatprep.subr.mxu0 %v3458_v24 }
 0xaf6   : > { %9591 = vmatpush3.msra.mxu0 %v3458_v24 }
 0xaf7   : > { %9902 = vmatprep.subr.bf16.mxu0 %v13432_v14 }
 0xafb   : > { %v3321_v62 = vpop.permute.xlu0 %3320 }
 0xafc   : > { %v3455_v11 = vadd.f32 %v11698_v52, %v3321_v62 }
 0xafe   : > { %9570 = vmatprep.subr.mxu1 %v3455_v11 }
 0xaff   : > { %9571 = vmatpush3.msra.mxu1 %v3455_v11 }
 0xb00   : > { %9878 = vmatprep.subr.bf16.mxu1 %v13432_v14 }
 0xb1a   : > { %v3879_v29 = vpop.trf.xlu0 }
 0xb1b   : > { %9572 = vmatprep.mubr.msk.f32.mxu1 %vm992_vm9, %v3879_v29 }
 0xb1c   : > { %v4072_v56 = vpop.trf.xlu1 }
 0xb1d   : > { %9592 = vmatprep.mubr.msk.f32.mxu0 %vm992_vm9, %v4072_v56 }
 0xb1e   : > { %v3880_v13 = vpop.trf.xlu0 }
 0xb1f   : > { %9573 = vmatmul.mubr.msk.f32.vlgmr.msra.gmra.mrb[58].mxu1 %vm992_vm9, %v3880_v13 }
 0xb20   : > { %v4073_v25 = vpop.trf.xlu1 }
 0xb21   : > { %9593 = vmatmul.mubr.msk.f32.vlgmr.msra.gmra.mrb[66].mxu0 %vm992_vm9, %v4073_v25 }
 0xb22   : > { %v3881_v45 = vpop.trf.xlu0 }
 0xb23   : > { %9575 = vmatprep.mubr.msk.f32.mxu1 %vm992_vm9, %v3881_v45 }
 0xb24   : > { %v4074_v44 = vpop.trf.xlu1 }
 0xb25   : > { %9595 = vmatprep.mubr.msk.f32.mxu0 %vm992_vm9, %v4074_v44 }
 0xb26   : > { %v3882_v4 = vpop.trf.xlu0 }
 0xb27   : > { %9576 = vmatmul.mubr.msk.f32.gmra.mrb[60].mxu1 %vm992_vm9, %v3882_v4 }
 0xb28   : > { %v4075_v26 = vpop.trf.xlu1 }
 0xb29   : > { %9596 = vmatmul.mubr.msk.f32.gmra.mrb[68].mxu0 %vm992_vm9, %v4075_v26 }
 0xb2a   : > { %v3883_v37 = vpop.trf.xlu0 }
 0xb2b   : > { %9578 = vmatprep.mubr.msk.f32.mxu1 %vm992_vm9, %v3883_v37 }
 0xb2c   : > { %v4076_v52 = vpop.trf.xlu1 }
 0xb2d   : > { %9598 = vmatprep.mubr.msk.f32.mxu0 %vm992_vm9, %v4076_v52 }
 0xb2e   : > { %v3884_v1 = vpop.trf.xlu0 }
 0xb2f   : > { %9579 = vmatmul.mubr.msk.f32.gmra.mrb[62].mxu1 %vm992_vm9, %v3884_v1 }
 0xb30   : > { %v4077_v58 = vpop.trf.xlu1 }
 0xb31   : > { %9599 = vmatmul.mubr.msk.f32.gmra.mrb[70].mxu0 %vm992_vm9, %v4077_v58 }
 0xb32   : > { %v3885_v61 = vpop.trf.xlu0 }
 0xb33   : > { %9581 = vmatprep.mubr.msk.f32.mxu1 %vm992_vm9, %v3885_v61 }
 0xb34   : > { %v4078_v42 = vpop.trf.xlu1 }
 0xb35   : > { %9601 = vmatprep.mubr.msk.f32.mxu0 %vm992_vm9, %v4078_v42 }
 0xb36   : > { %v3886_v35 = vpop.trf.xlu0 }
 0xb37   : > { %9582 = vmatmul.mubr.msk.f32.gmra.mrb[64].mxu1 %vm992_vm9, %v3886_v35 }
 0xb38   : > { %v4079_v34 = vpop.trf.xlu1 }
 0xb39   : > { %9602 = vmatmul.mubr.msk.f32.gmra.mrb[72].mxu0 %vm992_vm9, %v4079_v34 }
 0xb3a   : > { %v3887_v53 = vpop.trf.xlu0 }
 0xb3b   : > { %9584 = vmatprep.mubr.msk.f32.mxu1 %vm992_vm9, %v3887_v53 }
 0xb3c   : > { %v4080_v23 = vpop.trf.xlu1 }
 0xb3d   : > { %9604 = vmatprep.mubr.msk.f32.mxu0 %vm992_vm9, %v4080_v23 }
 0xb3e   : > { %v3888_v2 = vpop.trf.xlu0 }
 0xb3f   : > { %9585 = vmatmul.mubr.msk.f32.gmra.mrb[66].mxu1 %vm992_vm9, %v3888_v2 }
 0xb40   : > { %v4081_v48 = vpop.trf.xlu1 }
 0xb41   : > { %9605 = vmatmul.mubr.msk.f32.gmra.mrb[74].mxu0 %vm992_vm9, %v4081_v48 }
 0xb42   : > { %v3889_v20 = vpop.trf.xlu0 }
 0xb43   : > { %9587 = vmatprep.mubr.msk.f32.mxu1 %vm992_vm9, %v3889_v20 }
 0xb44   : > { %v4082_v40 = vpop.trf.xlu1 }
 0xb45   : > { %9607 = vmatprep.mubr.msk.f32.mxu0 %vm992_vm9, %v4082_v40 }
 0xb46   : > { %v3890_v59 = vpop.trf.xlu0 }
 0xb47   : > { %9588 = vmatmul.mubr.msk.f32.gmra.mrb[68].mxu1 %vm992_vm9, %v3890_v59 }
 0xb48   : > { %v4083_v47 = vpop.trf.xlu1  ;;  %9634 = vmatprep.mubr.msk.f32.mxu1 %vm10511_vm12, %v13435_v30 }
 0xb49   : > { %9608 = vmatmul.mubr.msk.f32.gmra.mrb[76].mxu0 %vm992_vm9, %v4083_v47 }
 0xb4a   : > { %9661 = vmatprep.mubr.msk.f32.mxu0 %vm10511_vm12, %v13435_v30 }
 0xb7f   : > { %v11778_v49 = vpop.f32.mrb[38].mxu1 }
 0xb80   : > { %v11780_v18 = vpop.f32.mrb[39].mxu1  ;;  %v4252_v19 = vsel %vm1733_vm10, %v11778_v49, -inf }
 0xb81   : > { %4253 = vmax.xlane.f32.xlu1 %v4252_v19  ;;  %v4249_v5 = vsel %vm1733_vm10, %v11780_v18, -inf  ;;  %v11786_v21 = vpop.f32.mrb[34].mxu0 }
 0xb82   : > { %4250 = vmax.xlane.f32.xlu0 %v4249_v5  ;;  %v11788_v36 = vpop.f32.mrb[35].mxu0  ;;  %v4288_v54 = vsel %vm1733_vm10, %v11786_v21, -inf }
 0xb83   : > { %v4285_v55 = vsel %vm1733_vm10, %v11788_v36, -inf }
 0xb86   : > { %4289 = vmax.xlane.f32.xlu0 %v4288_v54 }
 0xb87   : > { %v11792_v32 = vpop.f32.mrb[48].mxu1 }
 0xb88   : > { %v11796_v17 = vpop.f32.mrb[49].mxu1  ;;  %v4258_v3 = vsel %vm1733_vm10, %v11792_v32, -inf }
 0xb89   : > { %v4255_v46 = vsel %vm1733_vm10, %v11796_v17, -inf  ;;  %v11800_v8 = vpop.f32.mrb[56].mxu0 }
 0xb8a   : > { %4286 = vmax.xlane.f32.xlu0 %v4285_v55  ;;  %4256 = vmax.xlane.f32.xlu1 %v4255_v46  ;;  %v11802_v16 = vpop.f32.mrb[57].mxu0  ;;  %v4294_v33 = vsel %vm1733_vm10, %v11800_v8, -inf }
 0xb8b   : > { %v4291_v41 = vsel %vm1733_vm10, %v11802_v16, -inf }
 0xb8e   : > { %4259 = vmax.xlane.f32.xlu0 %v4258_v3  ;;  %4292 = vmax.xlane.f32.xlu1 %v4291_v41 }
 0xb8f   : > { %v11808_v28 = vpop.f32.mrb[50].mxu1 }
 0xb90   : > { %v11812_v9 = vpop.f32.mrb[51].mxu1  ;;  %v4264_v43 = vsel %vm1733_vm10, %v11808_v28, -inf }
 0xb91   : > { %v4261_v7 = vsel %vm1733_vm10, %v11812_v9, -inf  ;;  %v11816_v31 = vpop.f32.mrb[58].mxu0 }
 0xb92   : > { %4295 = vmax.xlane.f32.xlu0 %v4294_v33  ;;  %4262 = vmax.xlane.f32.xlu1 %v4261_v7  ;;  %v11818_v27 = vpop.f32.mrb[59].mxu0  ;;  %v4300_v6 = vsel %vm1733_vm10, %v11816_v31, -inf }
 0xb93   : > { %v4297_v38 = vsel %vm1733_vm10, %v11818_v27, -inf }
 0xb96   : > { %4265 = vmax.xlane.f32.xlu0 %v4264_v43  ;;  %4298 = vmax.xlane.f32.xlu1 %v4297_v38 }
 0xb97   : > { %v11824_v22 = vpop.f32.mrb[52].mxu1 }
 0xb98   : > { %v11828_v15 = vpop.f32.mrb[53].mxu1  ;;  %v4270_v29 = vsel %vm1733_vm10, %v11824_v22, -inf }
 0xb99   : > { %v4267_v24 = vsel %vm1733_vm10, %v11828_v15, -inf  ;;  %v11832_v62 = vpop.f32.mrb[60].mxu0 }
 0xb9a   : > { %4301 = vmax.xlane.f32.xlu0 %v4300_v6  ;;  %4268 = vmax.xlane.f32.xlu1 %v4267_v24  ;;  %v11834_v11 = vpop.f32.mrb[61].mxu0  ;;  %v4306_v25 = vsel %vm1733_vm10, %v11832_v62, -inf }
 0xb9b   : > { %v4303_v56 = vsel %vm1733_vm10, %v11834_v11, -inf }
 0xb9e   : > { %4271 = vmax.xlane.f32.xlu0 %v4270_v29  ;;  %4304 = vmax.xlane.f32.xlu1 %v4303_v56 }
 0xb9f   : > { %v11840_v13 = vpop.f32.mrb[54].mxu1 }
 0xba0   : > { %v11844_v45 = vpop.f32.mrb[55].mxu1  ;;  %v4276_v37 = vsel %vm1733_vm10, %v11840_v13, -inf }
 0xba1   : > { %v4273_v44 = vsel %vm1733_vm10, %v11844_v45, -inf  ;;  %v11848_v4 = vpop.f32.mrb[62].mxu0 }
 0xba2   : > { %4307 = vmax.xlane.f32.xlu0 %v4306_v25  ;;  %4274 = vmax.xlane.f32.xlu1 %v4273_v44  ;;  %v11850_v26 = vpop.f32.mrb[63].mxu0  ;;  %v4312_v58 = vsel %vm1733_vm10, %v11848_v4, -inf }
 0xba3   : > { %v4309_v52 = vsel %vm1733_vm10, %v11850_v26, -inf }
 0xba6   : > { %4277 = vmax.xlane.f32.xlu0 %v4276_v37  ;;  %4310 = vmax.xlane.f32.xlu1 %v4309_v52 }
 0xba7   : > { %v11856_v1 = vpop.f32.mrb[56].mxu1 }
 0xba8   : > { %v11860_v61 = vpop.f32.mrb[57].mxu1  ;;  %v4282_v53 = vsel %vm1767_vm11, %v11856_v1, -inf }
 0xba9   : > { %v4279_v42 = vsel %vm1733_vm10, %v11860_v61, -inf  ;;  %v11864_v35 = vpop.f32.mrb[64].mxu0 }
 0xbaa   : > { %4313 = vmax.xlane.f32.xlu0 %v4312_v58  ;;  %4280 = vmax.xlane.f32.xlu1 %v4279_v42  ;;  %v11866_v34 = vpop.f32.mrb[65].mxu0  ;;  %v4318_v2 = vsel %vm1767_vm11, %v11864_v35, -inf  ;;  %v11922_v58 = vpop.permute.xlu1 %3330 }
 0xbab   : > { %v4315_v23 = vsel %vm1733_vm10, %v11866_v34, -inf  ;;  %13450 = vst [vmem:[#allocation17_spill] sm:$0xff] %v11922_v58 }
 0xbae   : > { %4283 = vmax.xlane.f32.xlu0 %v4282_v53  ;;  %4316 = vmax.xlane.f32.xlu1 %v4315_v23  ;;  %v11926_v53 = vpop.permute.xlu0 %3335 }
 0xbaf   : > { %13451 = vst [vmem:[#allocation18_spill] sm:$0xff] %v11926_v53 }
 0xbb2   : > { %4319 = vmax.xlane.f32.xlu0 %v4318_v2 }
 0xbf2   : > { %v11874_v48 = vpop.f32.mrb[58].mxu1 }
 0xbf3   : > { %v11876_v20 = vpop.f32.mrb[59].mxu1  ;;  %v4324_v40 = vsel %vm1733_vm10, %v11874_v48, -inf }
 0xbf4   : > { %4325 = vmax.xlane.f32.xlu0 %v4324_v40  ;;  %v4321_v59 = vsel %vm1733_vm10, %v11876_v20, -inf  ;;  %v11882_v47 = vpop.f32.mrb[66].mxu0 }
 0xbf5   : > { %4322 = vmax.xlane.f32.xlu1 %v4321_v59  ;;  %v11884_v19 = vpop.f32.mrb[67].mxu0  ;;  %v4360_v5 = vsel %vm1733_vm10, %v11882_v47, -inf }
 0xbf6   : > { %v4357_v54 = vsel %vm1733_vm10, %v11884_v19, -inf }
 0xbf8   : > { %4361 = vmax.xlane.f32.xlu0 %v4360_v5 }
 0xbf9   : > { %4358 = vmax.xlane.f32.xlu1 %v4357_v54 }
 0xbfa   : > { %v11890_v55 = vpop.f32.mrb[60].mxu1 }
 0xbfb   : > { %v11892_v46 = vpop.f32.mrb[61].mxu1  ;;  %v4330_v3 = vsel %vm1733_vm10, %v11890_v55, -inf }
 0xbfc   : > { %4331 = vmax.xlane.f32.xlu0 %v4330_v3  ;;  %v4327_v41 = vsel %vm1733_vm10, %v11892_v46, -inf  ;;  %v11898_v33 = vpop.f32.mrb[68].mxu0 }
 0xbfd   : > { %4328 = vmax.xlane.f32.xlu1 %v4327_v41  ;;  %v11900_v7 = vpop.f32.mrb[69].mxu0  ;;  %v4366_v43 = vsel %vm1733_vm10, %v11898_v33, -inf }
 0xbfe   : > { %v4363_v38 = vsel %vm1733_vm10, %v11900_v7, -inf }
 0xc00   : > { %4367 = vmax.xlane.f32.xlu0 %v4366_v43 }
 0xc01   : > { %4364 = vmax.xlane.f32.xlu1 %v4363_v38 }
 0xc02   : > { %v11906_v6 = vpop.f32.mrb[62].mxu1 }
 0xc03   : > { %v11908_v24 = vpop.f32.mrb[63].mxu1  ;;  %v4336_v29 = vsel %vm1733_vm10, %v11906_v6, -inf }
 0xc04   : > { %4337 = vmax.xlane.f32.xlu0 %v4336_v29  ;;  %v4333_v56 = vsel %vm1733_vm10, %v11908_v24, -inf  ;;  %v11914_v25 = vpop.f32.mrb[70].mxu0 }
 0xc05   : > { %4334 = vmax.xlane.f32.xlu1 %v4333_v56  ;;  %v11916_v44 = vpop.f32.mrb[71].mxu0  ;;  %v4372_v37 = vsel %vm1733_vm10, %v11914_v25, -inf }
 0xc06   : > { %v4369_v52 = vsel %vm1733_vm10, %v11916_v44, -inf }
 0xc08   : > { %4373 = vmax.xlane.f32.xlu0 %v4372_v37 }
 0xc09   : > { %4370 = vmax.xlane.f32.xlu1 %v4369_v52 }
 0xc0a   : > { %v11924_v42 = vpop.f32.mrb[64].mxu1 }
 0xc0b   : > { %v11928_v23 = vpop.f32.mrb[65].mxu1  ;;  %v4342_v2 = vsel %vm1733_vm10, %v11924_v42, -inf }
 0xc0c   : > { %4343 = vmax.xlane.f32.xlu0 %v4342_v2  ;;  %v4339_v40 = vsel %vm1733_vm10, %v11928_v23, -inf  ;;  %v11934_v59 = vpop.f32.mrb[72].mxu0 }
 0xc0d   : > { %4340 = vmax.xlane.f32.xlu1 %v4339_v40  ;;  %v11936_v5 = vpop.f32.mrb[73].mxu0  ;;  %v4378_v54 = vsel %vm1733_vm10, %v11934_v59, -inf }
 0xc0e   : > { %v4254_v3 = vpop.xlane.xlu1 %4253  ;;  %v4375_v41 = vsel %vm1733_vm10, %v11936_v5, -inf }
 0xc0f   : > { %v4394_v43 = vsub.f32 %v11778_v49, %v4254_v3  ;;  %v4251_v38 = vpop.xlane.xlu0 %4250 }
 0xc10   : > { %v4393_v29 = vsub.f32 %v11780_v18, %v4251_v38  ;;  %4379 = vmax.xlane.f32.xlu0 %v4378_v54 }
 0xc11   : > { %4376 = vmax.xlane.f32.xlu1 %v4375_v41  ;;  %v4443_v56 = vmul.f32 1.442695, %v4394_v43 }
 0xc12   : > { %v11944_v37 = vpop.f32.mrb[66].mxu1  ;;  %v4441_v52 = vmul.f32 1.442695, %v4393_v29 }
 0xc13   : > { %v11946_v2 = vpop.f32.mrb[67].mxu1  ;;  %v4290_v40 = vpop.xlane.xlu0 %4289  ;;  %v4348_v50 = vsel %vm1733_vm10, %v11944_v37, -inf  ;;  %10248 = vpow2.f32 %v4443_v56 }
 0xc14   : > { %v4406_v63 = vsub.f32 %v11786_v21, %v4290_v40  ;;  %4349 = vmax.xlane.f32.xlu0 %v4348_v50  ;;  %v4345_v49 = vsel %vm1733_vm10, %v11946_v2, -inf  ;;  %v11953_v3 = vpop.f32.mrb[74].mxu0  ;;  %10250 = vpow2.f32 %v4441_v52 }
 0xc15   : > { %4346 = vmax.xlane.f32.xlu1 %v4345_v49  ;;  %v11955_v18 = vpop.f32.mrb[75].mxu0  ;;  %v4384_v54 = vsel %vm1733_vm10, %v11953_v3, -inf }
 0xc16   : > { %v4467_v41 = vmul.f32 1.442695, %v4406_v63  ;;  %v4381_v43 = vsel %vm1733_vm10, %v11955_v18, -inf }
 0xc17   : > { %v4257_v38 = vpop.xlane.xlu1 %4256  ;;  %v4287_v21 = vpop.xlane.xlu0 %4286 }
 0xc18   : > { %v4395_v50 = vsub.f32 %v11796_v17, %v4257_v38  ;;  %v4405_v29 = vsub.f32 %v11788_v36, %v4287_v21  ;;  %4385 = vmax.xlane.f32.xlu0 %v4384_v54  ;;  %10252 = vpow2.f32 %v4467_v41 }
 0xc19   : > { %4382 = vmax.xlane.f32.xlu1 %v4381_v43 }
 0xc1a   : > { %v4465_v40 = vmul.f32 1.442695, %v4405_v29  ;;  %v11963_v49 = vpop.f32.mrb[68].mxu1  ;;  %v4445_v57 = vmul.f32 1.442695, %v4395_v50 }
 0xc1b   : > { %v4293_v51 = vpop.xlane.xlu1 %4292  ;;  %v11965_v56 = vpop.f32.mrb[69].mxu1  ;;  %v4354_v63 = vsel %vm1767_vm11, %v11963_v49, -inf }
 0xc1c   : > { %v4407_v52 = vsub.f32 %v11802_v16, %v4293_v51  ;;  %v4260_v0 = vpop.xlane.xlu0 %4259  ;;  %4355 = vmax.xlane.f32.xlu0 %v4354_v63  ;;  %v4351_v36 = vsel %vm1733_vm10, %v11965_v56, -inf  ;;  %v11972_v17 = vpop.f32.mrb[76].mxu0  ;;  %10254 = vpow2.f32 %v4465_v40 }
 0xc1d   : > { %v4396_v54 = vsub.f32 %v11792_v32, %v4260_v0  ;;  %4352 = vmax.xlane.f32.xlu1 %v4351_v36  ;;  %v11975_v41 = vpop.f32.mrb[77].mxu0  ;;  %v4390_v43 = vsel %vm1767_vm11, %v11972_v17, -inf  ;;  %10256 = vpow2.f32 %v4445_v57  ;;  %v11981_v50 = vpop.eup %10248 }
 0xc1e   : > { %v4387_v38 = vsel %vm1733_vm10, %v11975_v41, -inf  ;;  %v4469_v51 = vmul.f32 1.442695, %v4407_v52  ;;  %v11984_v0 = vpop.eup %10250  ;;  %v4540_v57 = vsel %vm1733_vm10, %v11981_v50, 0.0 }
 0xc1f   : > { %v4447_v16 = vmul.f32 1.442695, %v4396_v54  ;;  %v4263_v21 = vpop.xlane.xlu1 %4262 }
 0xc20   : > { %v4397_v29 = vsub.f32 %v11812_v9, %v4263_v21  ;;  %v4296_v40 = vpop.xlane.xlu0 %4295  ;;  %4391 = vmax.xlane.f32.xlu0 %v4390_v43  ;;  %v4537_v43 = vsel %vm1733_vm10, %v11984_v0, 0.0 }
 0xc21   : > { %10258 = vpow2.f32 %v4447_v16  ;;  %v4408_v32 = vsub.f32 %v11800_v8, %v4296_v40  ;;  %4388 = vmax.xlane.f32.xlu1 %v4387_v38 }
 0xc22   : > { %10260 = vpow2.f32 %v4469_v51  ;;  %v4449_v63 = vmul.f32 1.442695, %v4397_v29  ;;  %v11989_v52 = vpop.eup %10252 }
 0xc23   : > { %v4471_v36 = vmul.f32 1.442695, %v4408_v32  ;;  %v4299_v10 = vpop.xlane.xlu1 %4298  ;;  %v4576_v29 = vsel %vm1733_vm10, %v11989_v52, 0.0 }
 0xc24   : > { %v4409_v54 = vsub.f32 %v11818_v27, %v4299_v10  ;;  %v4266_v9 = vpop.xlane.xlu0 %4265  ;;  %4541 = vadd.xlane.f32.xlu0 %v4540_v57 }
 0xc25   : > { %10262 = vpow2.f32 %v4471_v36  ;;  %v4398_v8 = vsub.f32 %v11808_v28, %v4266_v9  ;;  %4538 = vadd.xlane.f32.xlu1 %v4537_v43 }
 0xc26   : > { %v11995_v38 = vpop.eup %10254  ;;  %10264 = vpow2.f32 %v4449_v63  ;;  %v4473_v51 = vmul.f32 1.442695, %v4409_v54 }
 0xc27   : > { %v4451_v16 = vmul.f32 1.442695, %v4398_v8  ;;  %v4269_v21 = vpop.xlane.xlu1 %4268  ;;  %v4573_v40 = vsel %vm1733_vm10, %v11995_v38, 0.0  ;;  %v12002_v32 = vpop.eup %10256 }
 0xc28   : > { %v4399_v10 = vsub.f32 %v11828_v15, %v4269_v21  ;;  %v4302_v27 = vpop.xlane.xlu0 %4301  ;;  %4577 = vadd.xlane.f32.xlu0 %v4576_v29  ;;  %v4543_v8 = vsel %vm1733_vm10, %v12002_v32, 0.0 }
 0xc29   : > { %10266 = vpow2.f32 %v4451_v16  ;;  %v4410_v28 = vsub.f32 %v11816_v31, %v4302_v27  ;;  %4574 = vadd.xlane.f32.xlu1 %v4573_v40 }
 0xc2a   : > { %10268 = vpow2.f32 %v4473_v51  ;;  %v4453_v36 = vmul.f32 1.442695, %v4399_v10 }
 0xc2b   : > { %v12005_v63 = vpop.eup %10258  ;;  %v4475_v57 = vmul.f32 1.442695, %v4410_v28  ;;  %v4305_v54 = vpop.xlane.xlu1 %4304 }
 0xc2c   : > { %v4411_v9 = vsub.f32 %v11834_v11, %v4305_v54  ;;  %v4272_v15 = vpop.xlane.xlu0 %4271  ;;  %v4546_v43 = vsel %vm1733_vm10, %v12005_v63, 0.0  ;;  %v12012_v21 = vpop.eup %10260 }
 0xc2d   : > { %10270 = vpow2.f32 %v4475_v57  ;;  %v4400_v31 = vsub.f32 %v11824_v22, %v4272_v15  ;;  %4547 = vadd.xlane.f32.xlu0 %v4546_v43  ;;  %4544 = vadd.xlane.f32.xlu1 %v4543_v8  ;;  %v4579_v28 = vsel %vm1733_vm10, %v12012_v21, 0.0 }
 0xc2e   : > { %10272 = vpow2.f32 %v4453_v36  ;;  %v4477_v16 = vmul.f32 1.442695, %v4411_v9 }
 0xc2f   : > { %v12015_v51 = vpop.eup %10262  ;;  %v4455_v29 = vmul.f32 1.442695, %v4400_v31  ;;  %v4275_v11 = vpop.xlane.xlu1 %4274 }
 0xc30   : > { %v4401_v10 = vsub.f32 %v11844_v45, %v4275_v11  ;;  %v4308_v27 = vpop.xlane.xlu0 %4307  ;;  %v4582_v40 = vsel %vm1733_vm10, %v12015_v51, 0.0  ;;  %v12022_v57 = vpop.eup %10264 }
 0xc31   : > { %10274 = vpow2.f32 %v4455_v29  ;;  %v4412_v22 = vsub.f32 %v11832_v62, %v4308_v27  ;;  %4583 = vadd.xlane.f32.xlu0 %v4582_v40  ;;  %4580 = vadd.xlane.f32.xlu1 %v4579_v28  ;;  %v4549_v31 = vsel %vm1733_vm10, %v12022_v57, 0.0 }
 0xc32   : > { %10276 = vpow2.f32 %v4477_v16  ;;  %v4457_v54 = vmul.f32 1.442695, %v4401_v10 }
 0xc33   : > { %v12025_v36 = vpop.eup %10266  ;;  %v4479_v9 = vmul.f32 1.442695, %v4412_v22  ;;  %v4311_v45 = vpop.xlane.xlu1 %4310 }
 0xc34   : > { %v4413_v15 = vsub.f32 %v11850_v26, %v4311_v45  ;;  %v4278_v43 = vpop.xlane.xlu0 %4277  ;;  %v4552_v8 = vsel %vm1733_vm10, %v12025_v36, 0.0  ;;  %v12032_v29 = vpop.eup %10268 }
 0xc35   : > { %10278 = vpow2.f32 %v4479_v9  ;;  %v4402_v62 = vsub.f32 %v11840_v13, %v4278_v43  ;;  %4553 = vadd.xlane.f32.xlu0 %v4552_v8  ;;  %4550 = vadd.xlane.f32.xlu1 %v4549_v31  ;;  %v4585_v22 = vsel %vm1733_vm10, %v12032_v29, 0.0 }
 0xc36   : > { %10280 = vpow2.f32 %v4457_v54  ;;  %v4481_v11 = vmul.f32 1.442695, %v4413_v15 }
 0xc37   : > { %v12035_v16 = vpop.eup %10270  ;;  %v4459_v10 = vmul.f32 1.442695, %v4402_v62  ;;  %v4281_v26 = vpop.xlane.xlu1 %4280 }
 0xc38   : > { %v4403_v27 = vsub.f32 %v11860_v61, %v4281_v26  ;;  %v4314_v40 = vpop.xlane.xlu0 %4313  ;;  %v4588_v28 = vsel %vm1733_vm10, %v12035_v16, 0.0  ;;  %v12042_v9 = vpop.eup %10272 }
 0xc39   : > { %10282 = vpow2.f32 %v4459_v10  ;;  %v4414_v13 = vsub.f32 %v11848_v4, %v4314_v40  ;;  %4589 = vadd.xlane.f32.xlu0 %v4588_v28  ;;  %4586 = vadd.xlane.f32.xlu1 %v4585_v22  ;;  %v4555_v62 = vsel %vm1733_vm10, %v12042_v9, 0.0 }
 0xc3a   : > { %10284 = vpow2.f32 %v4481_v11  ;;  %v4461_v45 = vmul.f32 1.442695, %v4403_v27 }
 0xc3b   : > { %v12045_v54 = vpop.eup %10274  ;;  %v4483_v15 = vmul.f32 1.442695, %v4414_v13  ;;  %v4317_v61 = vpop.xlane.xlu1 %4316 }
 0xc3c   : > { %v4415_v43 = vsub.f32 %v11866_v34, %v4317_v61  ;;  %v4284_v8 = vpop.xlane.xlu0 %4283  ;;  %v4558_v31 = vsel %vm1733_vm10, %v12045_v54, 0.0  ;;  %v12052_v10 = vpop.eup %10276 }
 0xc3d   : > { %10286 = vpow2.f32 %v4483_v15  ;;  %v4404_v4 = vsub.f32 %v11856_v1, %v4284_v8  ;;  %4559 = vadd.xlane.f32.xlu0 %v4558_v31  ;;  %4556 = vadd.xlane.f32.xlu1 %v4555_v62  ;;  %v4591_v28 = vsel %vm1733_vm10, %v12052_v10, 0.0 }
 0xc3e   : > { %10288 = vpow2.f32 %v4461_v45  ;;  %v4485_v26 = vmul.f32 1.442695, %v4415_v43 }
 0xc3f   : > { %v12055_v11 = vpop.eup %10278  ;;  %v4463_v27 = vmul.f32 1.442695, %v4404_v4 }
 0xc40   : > { %v4320_v34 = vpop.xlane.xlu0 %4319  ;;  %v4594_v40 = vsel %vm1733_vm10, %v12055_v11, 0.0  ;;  %v12061_v22 = vpop.eup %10280 }
 0xc41   : > { %10290 = vpow2.f32 %v4463_v27  ;;  %v4416_v13 = vsub.f32 %v11864_v35, %v4320_v34  ;;  %4595 = vadd.xlane.f32.xlu0 %v4594_v40  ;;  %4592 = vadd.xlane.f32.xlu1 %v4591_v28  ;;  %v4561_v61 = vsel %vm1733_vm10, %v12061_v22, 0.0 }
 0xc42   : > { %10292 = vpow2.f32 %v4485_v26 }
 0xc43   : > { %v12064_v1 = vpop.eup %10282  ;;  %v4487_v45 = vmul.f32 1.442695, %v4416_v13 }
 0xc44   : > { %v4564_v15 = vsel %vm1733_vm10, %v12064_v1, 0.0  ;;  %v12070_v43 = vpop.eup %10284 }
 0xc45   : > { %10294 = vpow2.f32 %v4487_v45  ;;  %4565 = vadd.xlane.f32.xlu0 %v4564_v15  ;;  %4562 = vadd.xlane.f32.xlu1 %v4561_v61  ;;  %v4597_v31 = vsel %vm1733_vm10, %v12070_v43, 0.0 }
 0xc47   : > { %v12072_v8 = vpop.eup %10286 }
 0xc48   : > { %v4600_v35 = vsel %vm1733_vm10, %v12072_v8, 0.0  ;;  %v12078_v62 = vpop.eup %10288 }
 0xc49   : > { %4601 = vadd.xlane.f32.xlu0 %v4600_v35  ;;  %4598 = vadd.xlane.f32.xlu1 %v4597_v31  ;;  %v4567_v27 = vsel %vm1733_vm10, %v12078_v62, 0.0 }
 0xc4b   : > { %v12080_v4 = vpop.eup %10290 }
 0xc4c   : > { %v4570_v26 = vsel %vm1767_vm11, %v12080_v4, 0.0  ;;  %v12086_v34 = vpop.eup %10292 }
 0xc4d   : > { %4571 = vadd.xlane.f32.xlu0 %v4570_v26  ;;  %4568 = vadd.xlane.f32.xlu1 %v4567_v27  ;;  %v4603_v13 = vsel %vm1733_vm10, %v12086_v34, 0.0 }
 0xc4f   : > { %v12088_v40 = vpop.eup %10294 }
 0xc50   : > { %v4606_v28 = vsel %vm1767_vm11, %v12088_v40, 0.0 }
 0xc51   : > { %4607 = vadd.xlane.f32.xlu0 %v4606_v28  ;;  %4604 = vadd.xlane.f32.xlu1 %v4603_v13 }
 0xc81   : > { %v4326_v45 = vpop.xlane.xlu0 %4325 }
 0xc82   : > { %v4418_v15 = vsub.f32 %v11874_v48, %v4326_v45  ;;  %v4323_v61 = vpop.xlane.xlu1 %4322 }
 0xc83   : > { %v4417_v35 = vsub.f32 %v11876_v20, %v4323_v61 }
 0xc84   : > { %v4491_v31 = vmul.f32 1.442695, %v4418_v15 }
 0xc85   : > { %v4489_v30 = vmul.f32 1.442695, %v4417_v35  ;;  %v4362_v26 = vpop.xlane.xlu0 %4361 }
 0xc86   : > { %10296 = vpow2.f32 %v4491_v31  ;;  %v4430_v27 = vsub.f32 %v11882_v47, %v4362_v26  ;;  %v4359_v12 = vpop.xlane.xlu1 %4358 }
 0xc87   : > { %10298 = vpow2.f32 %v4489_v30  ;;  %v4429_v53 = vsub.f32 %v11884_v19, %v4359_v12 }
 0xc88   : > { %v4515_v39 = vmul.f32 1.442695, %v4430_v27 }
 0xc89   : > { %v4513_v58 = vmul.f32 1.442695, %v4429_v53  ;;  %v4332_v28 = vpop.xlane.xlu0 %4331 }
 0xc8a   : > { %10300 = vpow2.f32 %v4515_v39  ;;  %v4420_v13 = vsub.f32 %v11890_v55, %v4332_v28  ;;  %v4329_v48 = vpop.xlane.xlu1 %4328 }
 0xc8b   : > { %10302 = vpow2.f32 %v4513_v58  ;;  %v4419_v20 = vsub.f32 %v11892_v46, %v4329_v48 }
 0xc8c   : > { %v4495_v45 = vmul.f32 1.442695, %v4420_v13 }
 0xc8d   : > { %v4493_v15 = vmul.f32 1.442695, %v4419_v20  ;;  %v4368_v61 = vpop.xlane.xlu0 %4367 }
 0xc8e   : > { %10304 = vpow2.f32 %v4495_v45  ;;  %v4432_v47 = vsub.f32 %v11898_v33, %v4368_v61  ;;  %v4365_v35 = vpop.xlane.xlu1 %4364 }
 0xc8f   : > { %10306 = vpow2.f32 %v4493_v15  ;;  %v4431_v30 = vsub.f32 %v11900_v7, %v4365_v35 }
 0xc90   : > { %v12102_v12 = vpop.eup %10296  ;;  %v4519_v19 = vmul.f32 1.442695, %v4432_v47 }
 0xc91   : > { %v12104_v39 = vpop.eup %10298  ;;  %v4517_v55 = vmul.f32 1.442695, %v4431_v30  ;;  %v4338_v53 = vpop.xlane.xlu0 %4337  ;;  %v4612_v46 = vsel %vm1733_vm10, %v12102_v12, 0.0 }
 0xc92   : > { %10308 = vpow2.f32 %v4519_v19  ;;  %v4422_v58 = vsub.f32 %v11906_v6, %v4338_v53  ;;  %v4335_v31 = vpop.xlane.xlu1 %4334  ;;  %4613 = vadd.xlane.f32.xlu0 %v4612_v46  ;;  %v4609_v33 = vsel %vm1733_vm10, %v12104_v39, 0.0 }
 0xc93   : > { %10310 = vpow2.f32 %v4517_v55  ;;  %v4421_v7 = vsub.f32 %v11908_v24, %v4335_v31  ;;  %4610 = vadd.xlane.f32.xlu1 %v4609_v33 }
 0xc94   : > { %v12112_v26 = vpop.eup %10300  ;;  %v4499_v27 = vmul.f32 1.442695, %v4422_v58 }
 0xc95   : > { %v12114_v28 = vpop.eup %10302  ;;  %v4497_v13 = vmul.f32 1.442695, %v4421_v7  ;;  %v4374_v48 = vpop.xlane.xlu0 %4373  ;;  %v4648_v20 = vsel %vm1733_vm10, %v12112_v26, 0.0 }
 0xc96   : > { %10312 = vpow2.f32 %v4499_v27  ;;  %v4434_v6 = vsub.f32 %v11914_v25, %v4374_v48  ;;  %v4371_v45 = vpop.xlane.xlu1 %4370  ;;  %4649 = vadd.xlane.f32.xlu0 %v4648_v20  ;;  %v4645_v15 = vsel %vm1733_vm10, %v12114_v28, 0.0 }
 0xc97   : > { %10314 = vpow2.f32 %v4497_v13  ;;  %v4433_v24 = vsub.f32 %v11916_v44, %v4371_v45  ;;  %4646 = vadd.xlane.f32.xlu1 %v4645_v15 }
 0xc98   : > { %v12122_v61 = vpop.eup %10304  ;;  %v4523_v47 = vmul.f32 1.442695, %v4434_v6 }
 0xc99   : > { %v12124_v35 = vpop.eup %10306  ;;  %v4521_v30 = vmul.f32 1.442695, %v4433_v24  ;;  %v4344_v19 = vpop.xlane.xlu0 %4343  ;;  %v4618_v55 = vsel %vm1733_vm10, %v12122_v61, 0.0 }
 0xc9a   : > { %10316 = vpow2.f32 %v4523_v47  ;;  %v4424_v25 = vsub.f32 %v11924_v42, %v4344_v19  ;;  %v4341_v53 = vpop.xlane.xlu1 %4340  ;;  %4619 = vadd.xlane.f32.xlu0 %v4618_v55  ;;  %v4615_v46 = vsel %vm1733_vm10, %v12124_v35, 0.0 }
 0xc9b   : > { %10318 = vpow2.f32 %v4521_v30  ;;  %v4423_v44 = vsub.f32 %v11928_v23, %v4341_v53  ;;  %4616 = vadd.xlane.f32.xlu1 %v4615_v46 }
 0xc9c   : > { %v12132_v58 = vpop.eup %10308  ;;  %v4503_v31 = vmul.f32 1.442695, %v4424_v25 }
 0xc9d   : > { %v12134_v33 = vpop.eup %10310  ;;  %v4501_v7 = vmul.f32 1.442695, %v4423_v44  ;;  %v4380_v27 = vpop.xlane.xlu0 %4379  ;;  %v4654_v13 = vsel %vm1733_vm10, %v12132_v58, 0.0 }
 0xc9e   : > { %10320 = vpow2.f32 %v4503_v31  ;;  %v4436_v42 = vsub.f32 %v11934_v59, %v4380_v27  ;;  %v4377_v48 = vpop.xlane.xlu1 %4376  ;;  %4655 = vadd.xlane.f32.xlu0 %v4654_v13  ;;  %v4651_v20 = vsel %vm1733_vm10, %v12134_v33, 0.0 }
 0xc9f   : > { %10322 = vpow2.f32 %v4501_v7  ;;  %v4435_v23 = vsub.f32 %v11936_v5, %v4377_v48  ;;  %4652 = vadd.xlane.f32.xlu1 %v4651_v20 }
 0xca0   : > { %v12142_v6 = vpop.eup %10312  ;;  %v4527_v45 = vmul.f32 1.442695, %v4436_v42 }
 0xca1   : > { %v12144_v15 = vpop.eup %10314  ;;  %v4525_v24 = vmul.f32 1.442695, %v4435_v23  ;;  %v4350_v47 = vpop.xlane.xlu0 %4349  ;;  %v4624_v30 = vsel %vm1733_vm10, %v12142_v6, 0.0 }
 0xca2   : > { %10324 = vpow2.f32 %v4527_v45  ;;  %v4426_v59 = vsub.f32 %v11944_v37, %v4350_v47  ;;  %v4347_v19 = vpop.xlane.xlu1 %4346  ;;  %4625 = vadd.xlane.f32.xlu0 %v4624_v30  ;;  %v4621_v55 = vsel %vm1733_vm10, %v12144_v15, 0.0 }
 0xca3   : > { %10326 = vpow2.f32 %v4525_v24  ;;  %v4425_v5 = vsub.f32 %v11946_v2, %v4347_v19  ;;  %4622 = vadd.xlane.f32.xlu1 %v4621_v55 }
 0xca4   : > { %v12152_v25 = vpop.eup %10316  ;;  %v4507_v53 = vmul.f32 1.442695, %v4426_v59 }
 0xca5   : > { %v12154_v46 = vpop.eup %10318  ;;  %v4505_v44 = vmul.f32 1.442695, %v4425_v5  ;;  %v4386_v31 = vpop.xlane.xlu0 %4385  ;;  %v4660_v7 = vsel %vm1733_vm10, %v12152_v25, 0.0 }
 0xca6   : > { %10328 = vpow2.f32 %v4507_v53  ;;  %v4438_v37 = vsub.f32 %v11953_v3, %v4386_v31  ;;  %v4383_v27 = vpop.xlane.xlu1 %4382  ;;  %4661 = vadd.xlane.f32.xlu0 %v4660_v7  ;;  %v4657_v13 = vsel %vm1733_vm10, %v12154_v46, 0.0 }
 0xca7   : > { %10330 = vpow2.f32 %v4505_v44  ;;  %v4437_v2 = vsub.f32 %v11955_v18, %v4383_v27  ;;  %4658 = vadd.xlane.f32.xlu1 %v4657_v13 }
 0xca8   : > { %v12162_v42 = vpop.eup %10320  ;;  %v4531_v48 = vmul.f32 1.442695, %v4438_v37 }
 0xca9   : > { %v12164_v20 = vpop.eup %10322  ;;  %v4529_v23 = vmul.f32 1.442695, %v4437_v2  ;;  %v4356_v45 = vpop.xlane.xlu0 %4355  ;;  %v4630_v24 = vsel %vm1733_vm10, %v12162_v42, 0.0 }
 0xcaa   : > { %10332 = vpow2.f32 %v4531_v48  ;;  %v4428_v3 = vsub.f32 %v11963_v49, %v4356_v45  ;;  %v4353_v47 = vpop.xlane.xlu1 %4352  ;;  %4631 = vadd.xlane.f32.xlu0 %v4630_v24  ;;  %v4627_v30 = vsel %vm1733_vm10, %v12164_v20, 0.0 }
 0xcab   : > { %10334 = vpow2.f32 %v4529_v23  ;;  %v4427_v18 = vsub.f32 %v11965_v56, %v4353_v47  ;;  %4628 = vadd.xlane.f32.xlu1 %v4627_v30 }
 0xcac   : > { %v12172_v59 = vpop.eup %10324  ;;  %v4511_v19 = vmul.f32 1.442695, %v4428_v3 }
 0xcad   : > { %v12174_v55 = vpop.eup %10326  ;;  %v4509_v5 = vmul.f32 1.442695, %v4427_v18  ;;  %v4392_v53 = vpop.xlane.xlu0 %4391  ;;  %v4666_v44 = vsel %vm1733_vm10, %v12172_v59, 0.0 }
 0xcae   : > { %10336 = vpow2.f32 %v4511_v19  ;;  %v4440_v49 = vsub.f32 %v11972_v17, %v4392_v53  ;;  %v4389_v31 = vpop.xlane.xlu1 %4388  ;;  %4667 = vadd.xlane.f32.xlu0 %v4666_v44  ;;  %v4663_v7 = vsel %vm1733_vm10, %v12174_v55, 0.0 }
 0xcaf   : > { %10338 = vpow2.f32 %v4509_v5  ;;  %v4439_v56 = vsub.f32 %v11975_v41, %v4389_v31  ;;  %4664 = vadd.xlane.f32.xlu1 %v4663_v7 }
 0xcb0   : > { %v12182_v37 = vpop.eup %10328  ;;  %v4535_v27 = vmul.f32 1.442695, %v4440_v49 }
 0xcb1   : > { %v12184_v13 = vpop.eup %10330  ;;  %v4533_v2 = vmul.f32 1.442695, %v4439_v56  ;;  %v4542_v48 = vpop.xlane.xlu0 %4541  ;;  %v4636_v23 = vsel %vm1733_vm10, %v12182_v37, 0.0 }
 0xcb2   : > { %10340 = vpow2.f32 %v4535_v27  ;;  %v4539_v17 = vpop.xlane.xlu1 %4538  ;;  %4637 = vadd.xlane.f32.xlu0 %v4636_v23  ;;  %v4633_v45 = vsel %vm1733_vm10, %v12184_v13, 0.0 }
 0xcb3   : > { %10342 = vpow2.f32 %v4533_v2  ;;  %4634 = vadd.xlane.f32.xlu1 %v4633_v45 }
 0xcb4   : > { %v12190_v41 = vpop.eup %10332  ;;  %10344 = vrcp.f32 %v4542_v48 }
 0xcb5   : > { %v12192_v24 = vpop.eup %10334  ;;  %10346 = vrcp.f32 %v4539_v17  ;;  %v4578_v3 = vpop.xlane.xlu0 %4577  ;;  %v4672_v47 = vsel %vm1733_vm10, %v12190_v41, 0.0 }
 0xcb6   : > { %10348 = vrcp.f32 %v4578_v3  ;;  %v4575_v30 = vpop.xlane.xlu1 %4574  ;;  %4673 = vadd.xlane.f32.xlu0 %v4672_v47  ;;  %v4669_v18 = vsel %vm1733_vm10, %v12192_v24, 0.0 }
 0xcb7   : > { %10350 = vrcp.f32 %v4575_v30  ;;  %4670 = vadd.xlane.f32.xlu1 %v4669_v18 }
 0xcb8   : > { %v12198_v19 = vpop.eup %10336 }
 0xcb9   : > { %v12200_v5 = vpop.eup %10338  ;;  %v4642_v53 = vsel %vm1767_vm11, %v12198_v19, 0.0 }
 0xcba   : > { %v4548_v44 = vpop.xlane.xlu0 %4547  ;;  %v4545_v49 = vpop.xlane.xlu1 %4544  ;;  %4643 = vadd.xlane.f32.xlu0 %v4642_v53  ;;  %v4639_v31 = vsel %vm1733_vm10, %v12200_v5, 0.0 }
 0xcbb   : > { %10352 = vrcp.f32 %v4548_v44  ;;  %4640 = vadd.xlane.f32.xlu1 %v4639_v31 }
 0xcbc   : > { %v12206_v7 = vpop.eup %10340  ;;  %10354 = vrcp.f32 %v4545_v49 }
 0xcbd   : > { %v12208_v56 = vpop.eup %10342  ;;  %v4678_v27 = vsel %vm1767_vm11, %v12206_v7, 0.0 }
 0xcbe   : > { %v10345_v2 = vpop.eup %10344  ;;  %v4584_v48 = vpop.xlane.xlu0 %4583  ;;  %4679 = vadd.xlane.f32.xlu0 %v4678_v27  ;;  %v4675_v17 = vsel %vm1733_vm10, %v12208_v56, 0.0 }
 0xcbf   : > { %v4581_v23 = vpop.xlane.xlu1 %4580  ;;  %v10347_v45 = vpop.eup %10346  ;;  %v4730_v3 = vmul.f32 %v10345_v2, %v11981_v50  ;;  %10356 = vrcp.f32 %v4584_v48  ;;  %4676 = vadd.xlane.f32.xlu1 %v4675_v17 }
 0xcc0   : > { %v10349_v47 = vpop.eup %10348  ;;  %v4729_v30 = vmul.f32 %v10347_v45, %v11984_v0  ;;  %10358 = vrcp.f32 %v4581_v23 }
 0xcc1   : > { %v10351_v18 = vpop.eup %10350  ;;  %v4742_v53 = vmul.f32 %v10349_v47, %v11989_v52 }
 0xcc2   : > { %v4741_v44 = vmul.f32 %v10351_v18, %v11995_v38  ;;  %v4554_v49 = vpop.xlane.xlu0 %4553  ;;  %v9879_v27 = vpack.c.bf16 %v4730_v3, %v4729_v30 }
 0xcc3   : > { %v4551_v31 = vpop.xlane.xlu1 %4550  ;;  %10360 = vrcp.f32 %v4554_v49 }
 0xcc4   : > { %10362 = vrcp.f32 %v4551_v31  ;;  %9881 = vmatpush3.bf16.xpose.msk.msra.mxu1 %vm11341_vm13, %v9879_v27  ;;  %v9903_v50 = vpack.c.bf16 %v4742_v53, %v4741_v44  ;;  %v8558_v44 = vld [vmem:[%s13412_s4 + $0xb0] sm:$0xff] }
 0xcc5   : > { %v10353_v2 = vpop.eup %10352  ;;  %9882 = vmatprep.subr.bf16.mxu1 %v13432_v14 }
 0xcc6   : > { %v10355_v48 = vpop.eup %10354  ;;  %v4732_v0 = vmul.f32 %v10353_v2, %v12005_v63  ;;  %v4590_v23 = vpop.xlane.xlu0 %4589  ;;  %9905 = vmatpush3.bf16.xpose.msk.msra.mxu0 %vm11341_vm13, %v9903_v50 }
 0xcc7   : > { %v4587_v17 = vpop.xlane.xlu1 %4586  ;;  %v4731_v52 = vmul.f32 %v10355_v48, %v12002_v32  ;;  %10364 = vrcp.f32 %v4590_v23  ;;  %9906 = vmatprep.subr.bf16.mxu0 %v13432_v14  ;;  %v8676_v48 = vld [vmem:[%s13363_s6 + $0x20] sm:$0xff] }
 0xcc8   : > { %10366 = vrcp.f32 %v4587_v17 }
 0xcc9   : > { %v10357_v38 = vpop.eup %10356  ;;  %v9883_v45 = vpack.c.bf16 %v4732_v0, %v4731_v52 }
 0xcca   : > { %v10359_v3 = vpop.eup %10358  ;;  %v4744_v47 = vmul.f32 %v10357_v38, %v12015_v51  ;;  %v4560_v30 = vpop.xlane.xlu0 %4559 }
 0xccb   : > { %v4557_v18 = vpop.xlane.xlu1 %4556  ;;  %v4743_v63 = vmul.f32 %v10359_v3, %v12012_v21  ;;  %10368 = vrcp.f32 %v4560_v30 }
 0xccc   : > { %10370 = vrcp.f32 %v4557_v18  ;;  %9885 = vmatpush3.bf16.xpose.msk.msra.mxu1 %vm11341_vm13, %v9883_v45  ;;  %v8678_v18 = vld [vmem:[%s13363_s6 + $0x30] sm:$0xff] }
 0xccd   : > { %v10361_v53 = vpop.eup %10360  ;;  %v9907_v32 = vpack.c.bf16 %v4744_v47, %v4743_v63  ;;  %9886 = vmatprep.subr.bf16.mxu1 %v13432_v14 }
 0xcce   : > { %v10363_v49 = vpop.eup %10362  ;;  %v4734_v51 = vmul.f32 %v10361_v53, %v12025_v36  ;;  %v4596_v31 = vpop.xlane.xlu0 %4595 }
 0xccf   : > { %v4593_v27 = vpop.xlane.xlu1 %4592  ;;  %v4733_v21 = vmul.f32 %v10363_v49, %v12022_v57  ;;  %10372 = vrcp.f32 %v4596_v31  ;;  %9909 = vmatpush3.bf16.xpose.msk.msra.mxu0 %vm11341_vm13, %v9907_v32  ;;  %v8559_v57 = vld [vmem:[%s13412_s4 + $0xb8] sm:$0xff]  ;;  %v8684_v31 = vld [vmem:[%s13364_s7 + $0x20] sm:$0xff] }
 0xcd0   : > { %10374 = vrcp.f32 %v4593_v27  ;;  %3340 = vperm.xlu1 %10023, %v8558_v44   ;;  %9910 = vmatprep.subr.bf16.mxu0 %v13432_v14 }
 0xcd1   : > { %v10365_v50 = vpop.eup %10364  ;;  %v9887_v2 = vpack.c.bf16 %v4734_v51, %v4733_v21 }
 0xcd2   : > { %v10367_v0 = vpop.eup %10366  ;;  %v4746_v36 = vmul.f32 %v10365_v50, %v12035_v16  ;;  %v4566_v23 = vpop.xlane.xlu0 %4565  ;;  %v8677_v16 = vld [vmem:[%s13363_s6 + $0x28] sm:$0xff] }
 0xcd3   : > { %v4563_v17 = vpop.xlane.xlu1 %4562  ;;  %v4745_v52 = vmul.f32 %v10367_v0, %v12032_v29  ;;  %10376 = vrcp.f32 %v4566_v23 }
 0xcd4   : > { %10378 = vrcp.f32 %v4563_v17  ;;  %9889 = vmatpush3.bf16.xpose.msk.msra.mxu1 %vm11341_vm13, %v9887_v2  ;;  %5227 = vperm.xlu1 %10023, %v8676_v48  }
 0xcd5   : > { %v10369_v38 = vpop.eup %10368  ;;  %3345 = vperm.xlu0 %10022, %v8559_v57   ;;  %v9911_v45 = vpack.c.bf16 %v4746_v36, %v4745_v52  ;;  %9890 = vmatprep.subr.bf16.mxu1 %v13432_v14  ;;  %v8688_v36 = vld [vmem:[%s13365_s8 + $0x20] sm:$0xff] }
 0xcd6   : > { %v10371_v3 = vpop.eup %10370  ;;  %v4736_v47 = vmul.f32 %v10369_v38, %v12045_v54  ;;  %v4602_v30 = vpop.xlane.xlu0 %4601  ;;  %v8679_v54 = vld [vmem:[%s13363_s6 + $0x38] sm:$0xff] }
 0xcd7   : > { %v4599_v29 = vpop.xlane.xlu1 %4598  ;;  %v4735_v63 = vmul.f32 %v10371_v3, %v12042_v9  ;;  %10380 = vrcp.f32 %v4602_v30  ;;  %9913 = vmatpush3.bf16.xpose.msk.msra.mxu0 %vm11341_vm13, %v9911_v45 }
 0xcd8   : > { %10382 = vrcp.f32 %v4599_v29  ;;  %5232 = vperm.xlu1 %10023, %v8677_v16   ;;  %9914 = vmatprep.subr.bf16.mxu0 %v13432_v14 }
 0xcd9   : > { %v10373_v53 = vpop.eup %10372  ;;  %5237 = vperm.xlu0 %10022, %v8678_v18   ;;  %v9891_v32 = vpack.c.bf16 %v4736_v47, %v4735_v63  ;;  %v8687_v47 = vld [vmem:[%s13364_s7 + $0x38] sm:$0xff] }
 0xcda   : > { %v10375_v44 = vpop.eup %10374  ;;  %v4748_v49 = vmul.f32 %v10373_v53, %v12055_v11  ;;  %v4572_v51 = vpop.xlane.xlu0 %4571  ;;  %v8685_v11 = vld [vmem:[%s13364_s7 + $0x28] sm:$0xff]  ;;  %v8691_v53 = vld [vmem:[%s13365_s8 + $0x38] sm:$0xff] }
 0xcdb   : > { %v4569_v9 = vpop.xlane.xlu1 %4568  ;;  %v4747_v27 = vmul.f32 %v10375_v44, %v12052_v10  ;;  %10384 = vrcp.f32 %v4572_v51  ;;  %v13453_v51 = vld [vmem:[#allocation12_spill] sm:$0xff] }
 0xcdc   : > { %10386 = vrcp.f32 %v4569_v9  ;;  %9893 = vmatpush3.bf16.xpose.msk.msra.mxu1 %vm11341_vm13, %v9891_v32  ;;  %5242 = vperm.xlu1 %10023, %v8679_v54  }
 0xcdd   : > { %v10377_v21 = vpop.eup %10376  ;;  %5368 = vperm.xlu0 %10022, %v8684_v31   ;;  %v9915_v50 = vpack.c.bf16 %v4748_v49, %v4747_v27  ;;  %9894 = vmatprep.subr.bf16.mxu1 %v13432_v14  ;;  %v8701_v49 = vld [vmem:[%s13367_s10 + $0x48] sm:$0xff]  ;;  %v8703_v31 = vld [vmem:[%s13367_s10 + $0x58] sm:$0xff]  ;;  %v8704_v27 = vld [vmem:[%s13367_s10 + $0x60] sm:$0xff] }
 0xcde   : > { %v10379_v2 = vpop.eup %10378  ;;  %v4738_v48 = vmul.f32 %v10377_v21, %v12064_v1  ;;  %v4608_v0 = vpop.xlane.xlu0 %4607  ;;  %v8689_v1 = vld [vmem:[%s13365_s8 + $0x28] sm:$0xff]  ;;  %v13454_v21 = vld [vmem:[#allocation18_spill] sm:$0xff] }
 0xcdf   : > { %v4605_v10 = vpop.xlane.xlu1 %4604  ;;  %v4737_v23 = vmul.f32 %v10379_v2, %v12061_v22  ;;  %10388 = vrcp.f32 %v4608_v0  ;;  %9917 = vmatpush3.bf16.xpose.msk.msra.mxu0 %vm11341_vm13, %v9915_v50  ;;  %v8686_v22 = vld [vmem:[%s13364_s7 + $0x30] sm:$0xff]  ;;  %v13455_v50 = vld [vmem:[#allocation11_spill] sm:$0xff]  ;;  %v13456_v2 = vmov 0.0  }
 0xce0   : > { %10390 = vrcp.f32 %v4605_v10  ;;  %5373 = vperm.xlu1 %10023, %v8685_v11   ;;  %9918 = vmatprep.subr.bf16.mxu0 %v13432_v14  ;;  %v3466_v11 = vadd.f32 %v13455_v50, %v13454_v21  ;;  %v8706_v0 = vld [vmem:[%s13367_s10 + $0x70] sm:$0xff]  ;;  %v8707_v10 = vld [vmem:[%s13367_s10 + $0x78] sm:$0xff] }
 0xce1   : > { %v10381_v17 = vpop.eup %10380  ;;  %5392 = vperm.xlu0 %10022, %v8688_v36   ;;  %v9895_v57 = vpack.c.bf16 %v4738_v48, %v4737_v23  ;;  %v8705_v48 = vld [vmem:[%s13367_s10 + $0x68] sm:$0xff]  ;;  %v8720_v36 = vld [vmem:[%s13369_s12 + $0x20] sm:$0xff] }
 0xce2   : > { %v10383_v52 = vpop.eup %10382  ;;  %v4750_v38 = vmul.f32 %v10381_v17, %v12072_v8  ;;  %v8721_v23 = vld [vmem:[%s13369_s12 + $0x28] sm:$0xff]  ;;  %v8722_v17 = vld [vmem:[%s13369_s12 + $0x30] sm:$0xff] }
 0xce3   : > { %v4749_v45 = vmul.f32 %v10383_v52, %v12070_v43  ;;  %v8690_v43 = vld [vmem:[%s13365_s8 + $0x30] sm:$0xff]  ;;  %v8729_v52 = vld [vmem:[%s13370_s13 + $0x28] sm:$0xff] }
 0xce4   : > { %9897 = vmatpush3.bf16.xpose.msk.msra.mxu1 %vm11341_vm13, %v9895_v57  ;;  %5397 = vperm.xlu1 %10023, %v8689_v1   ;;  %v8723_v57 = vld [vmem:[%s13369_s12 + $0x38] sm:$0xff]  ;;  %v8728_v1 = vld [vmem:[%s13370_s13 + $0x20] sm:$0xff] }
 0xce5   : > { %v10385_v16 = vpop.eup %10384  ;;  %5378 = vperm.xlu0 %10022, %v8686_v22   ;;  %v9919_v3 = vpack.c.bf16 %v4750_v38, %v4749_v45  ;;  %9898 = vmatprep.subr.bf16.mxu1 %v13432_v14  ;;  %v8732_v38 = vld [vmem:[%s13371_s14 + $0x20] sm:$0xff]  ;;  %v8733_v22 = vld [vmem:[%s13371_s14 + $0x28] sm:$0xff]  ;;  %v8730_v45 = vld [vmem:[%s13370_s13 + $0x30] sm:$0xff] }
 0xce6   : > { %v10387_v8 = vpop.eup %10386  ;;  %v4740_v30 = vmul.f32 %v10385_v16, %v12080_v4  ;;  %v8731_v16 = vld [vmem:[%s13370_s13 + $0x38] sm:$0xff] }
 0xce7   : > { %v4739_v29 = vmul.f32 %v10387_v8, %v12078_v62  ;;  %9921 = vmatpush3.bf16.xpose.msk.msra.mxu0 %vm11341_vm13, %v9919_v3  ;;  %v8700_v62 = vld [vmem:[%s13367_s10 + $0x40] sm:$0xff]  ;;  %v8734_v3 = vld [vmem:[%s13371_s14 + $0x30] sm:$0xff] }
 0xce8   : > { %5383 = vperm.xlu1 %10023, %v8687_v47   ;;  %9922 = vmatprep.subr.bf16.mxu0 %v13432_v14  ;;  %v8735_v47 = vld [vmem:[%s13371_s14 + $0x38] sm:$0xff] }
 0xce9   : > { %v10389_v18 = vpop.eup %10388  ;;  %5402 = vperm.xlu0 %10022, %v8690_v43   ;;  %v9899_v63 = vpack.c.bf16 %v4740_v30, %v4739_v29 }
 0xcea   : > { %v10391_v4 = vpop.eup %10390  ;;  %v4752_v32 = vmul.f32 %v10389_v18, %v12088_v40  ;;  %v8702_v40 = vld [vmem:[%s13367_s10 + $0x50] sm:$0xff] }
 0xceb   : > { %v4751_v54 = vmul.f32 %v10391_v4, %v12086_v34  ;;  %v13452_v34 = vld [vmem:[#allocation17_spill] sm:$0xff] }
 0xcec   : > { %9901 = vmatpush3.bf16.xpose.msk.msra.mxu1 %vm11341_vm13, %v9899_v63  ;;  %5407 = vperm.xlu1 %10023, %v8691_v53   ;;  %v3463_v9 = vadd.f32 %v13453_v51, %v13452_v34 }
 0xced   : > { %5436 = vperm.xlu0 %10022, %v8700_v62   ;;  %v9923_v44 = vpack.c.bf16 %v4752_v32, %v4751_v54  ;;  %9926 = vmatprep.subr.bf16.mxu1 %v13432_v14 }
 0xcef   : > { %9925 = vmatpush3.bf16.xpose.msk.msra.mxu0 %vm11341_vm13, %v9923_v44 }
 0xcf0   : > { %5441 = vperm.xlu1 %10023, %v8701_v49   ;;  %9950 = vmatprep.subr.bf16.mxu0 %v13432_v14 }
 0xcf1   : > { %5446 = vperm.xlu0 %10022, %v8702_v40  }
 0xcf3   : > { %9635 = vmatmul.mubr.msk.f32.vlgmr.msra.gmra.mrb[70].mxu1 %vm1733_vm10, %v3463_v9 }
 0xcf4   : > { %5451 = vperm.xlu1 %10023, %v8703_v31   ;;  %9688 = vmatprep.mubr.msk.f32.mxu1 %vm10511_vm12, %v13456_v2 }
 0xcf5   : > { %5456 = vperm.xlu0 %10022, %v8704_v27  }
 0xcf6   : > { %9662 = vmatmul.mubr.msk.f32.vlgmr.msra.gmra.mrb[78].mxu0 %vm1733_vm10, %v3466_v11 }
 0xcf7   : > { %9715 = vmatprep.mubr.msk.f32.mxu0 %vm10511_vm12, %v13456_v2 }
 0xcf8   : > { %5461 = vperm.xlu1 %10023, %v8705_v48  }
 0xcf9   : > { %5466 = vperm.xlu0 %10022, %v8706_v0  }
 0xcfc   : > { %5471 = vperm.xlu1 %10023, %v8707_v10  }
 0xcfd   : > { %5595 = vperm.xlu0 %10022, %v8720_v36  }
 0xd00   : > { %5600 = vperm.xlu1 %10023, %v8721_v23  }
 0xd01   : > { %5605 = vperm.xlu0 %10022, %v8722_v17  }
 0xd04   : > { %5610 = vperm.xlu1 %10023, %v8723_v57  }
 0xd05   : > { %5736 = vperm.xlu0 %10022, %v8728_v1  }
 0xd08   : > { %5741 = vperm.xlu1 %10023, %v8729_v52  }
 0xd09   : > { %5760 = vperm.xlu0 %10022, %v8732_v38  }
 0xd0c   : > { %5765 = vperm.xlu1 %10023, %v8733_v22  }
 0xd0d   : > { %5746 = vperm.xlu0 %10022, %v8730_v45  }
 0xd10   : > { %5751 = vperm.xlu1 %10023, %v8731_v16  }
 0xd11   : > { %5770 = vperm.xlu0 %10022, %v8734_v3  }
 0xd14   : > { %5775 = vperm.xlu1 %10023, %v8735_v47  }
 0xd1f   : > { %v4614_v8 = vpop.xlane.xlu0 %4613 }
 0xd20   : > { %10392 = vrcp.f32 %v4614_v8  ;;  %v4611_v30 = vpop.xlane.xlu1 %4610 }
 0xd21   : > { %10394 = vrcp.f32 %v4611_v30 }
 0xd23   : > { %v4650_v43 = vpop.xlane.xlu0 %4649 }
 0xd24   : > { %10396 = vrcp.f32 %v4650_v43  ;;  %v4647_v29 = vpop.xlane.xlu1 %4646 }
 0xd25   : > { %10398 = vrcp.f32 %v4647_v29 }
 0xd27   : > { %v4620_v18 = vpop.xlane.xlu0 %4619 }
 0xd28   : > { %10400 = vrcp.f32 %v4620_v18  ;;  %v4617_v63 = vpop.xlane.xlu1 %4616 }
 0xd29   : > { %10402 = vrcp.f32 %v4617_v63 }
 0xd2a   : > { %v10393_v53 = vpop.eup %10392 }
 0xd2b   : > { %v10395_v4 = vpop.eup %10394  ;;  %v4754_v32 = vmul.f32 %v10393_v53, %v12102_v12  ;;  %v4656_v62 = vpop.xlane.xlu0 %4655 }
 0xd2c   : > { %v4753_v54 = vmul.f32 %v10395_v4, %v12104_v39  ;;  %10404 = vrcp.f32 %v4656_v62  ;;  %v4653_v44 = vpop.xlane.xlu1 %4652 }
 0xd2d   : > { %10406 = vrcp.f32 %v4653_v44 }
 0xd2e   : > { %v10397_v49 = vpop.eup %10396  ;;  %v9927_v40 = vpack.c.bf16 %v4754_v32, %v4753_v54 }
 0xd2f   : > { %v10399_v34 = vpop.eup %10398  ;;  %v4766_v51 = vmul.f32 %v10397_v49, %v12112_v26  ;;  %v4626_v9 = vpop.xlane.xlu0 %4625 }
 0xd30   : > { %v4765_v31 = vmul.f32 %v10399_v34, %v12114_v28  ;;  %10408 = vrcp.f32 %v4626_v9  ;;  %v4623_v27 = vpop.xlane.xlu1 %4622  ;;  %9929 = vmatpush3.bf16.xpose.msk.msra.mxu1 %vm11341_vm13, %v9927_v40 }
 0xd31   : > { %10410 = vrcp.f32 %v4623_v27  ;;  %9930 = vmatprep.subr.bf16.mxu1 %v13432_v14 }
 0xd32   : > { %v10401_v12 = vpop.eup %10400  ;;  %v9951_v39 = vpack.c.bf16 %v4766_v51, %v4765_v31 }
 0xd33   : > { %v10403_v21 = vpop.eup %10402  ;;  %v4756_v50 = vmul.f32 %v10401_v12, %v12122_v61  ;;  %v4662_v11 = vpop.xlane.xlu0 %4661 }
 0xd34   : > { %v4755_v2 = vmul.f32 %v10403_v21, %v12124_v35  ;;  %10412 = vrcp.f32 %v4662_v11  ;;  %v4659_v26 = vpop.xlane.xlu1 %4658  ;;  %9953 = vmatpush3.bf16.xpose.msk.msra.mxu0 %vm11341_vm13, %v9951_v39 }
 0xd35   : > { %10414 = vrcp.f32 %v4659_v26  ;;  %9954 = vmatprep.subr.bf16.mxu0 %v13432_v14 }
 0xd36   : > { %v10405_v28 = vpop.eup %10404  ;;  %v9931_v48 = vpack.c.bf16 %v4756_v50, %v4755_v2 }
 0xd37   : > { %v10407_v0 = vpop.eup %10406  ;;  %v4768_v10 = vmul.f32 %v10405_v28, %v12132_v58  ;;  %v4632_v36 = vpop.xlane.xlu0 %4631 }
 0xd38   : > { %v4767_v23 = vmul.f32 %v10407_v0, %v12134_v33  ;;  %10416 = vrcp.f32 %v4632_v36  ;;  %v4629_v61 = vpop.xlane.xlu1 %4628  ;;  %9933 = vmatpush3.bf16.xpose.msk.msra.mxu1 %vm11341_vm13, %v9931_v48 }
 0xd39   : > { %10418 = vrcp.f32 %v4629_v61  ;;  %9934 = vmatprep.subr.bf16.mxu1 %v13432_v14 }
 0xd3a   : > { %v10409_v35 = vpop.eup %10408  ;;  %v9955_v17 = vpack.c.bf16 %v4768_v10, %v4767_v23 }
 0xd3b   : > { %v10411_v57 = vpop.eup %10410  ;;  %v4758_v1 = vmul.f32 %v10409_v35, %v12142_v6  ;;  %v4668_v52 = vpop.xlane.xlu0 %4667 }
 0xd3c   : > { %v4757_v38 = vmul.f32 %v10411_v57, %v12144_v15  ;;  %10420 = vrcp.f32 %v4668_v52  ;;  %v4665_v58 = vpop.xlane.xlu1 %4664  ;;  %9957 = vmatpush3.bf16.xpose.msk.msra.mxu0 %vm11341_vm13, %v9955_v17 }
 0xd3d   : > { %10422 = vrcp.f32 %v4665_v58  ;;  %9958 = vmatprep.subr.bf16.mxu0 %v13432_v14  ;;  %v10046_v58 = vld [vmem:[%s13366_s9 + $0x20] sm:$0xff]  }
 0xd3e   : > { %v10413_v33 = vpop.eup %10412  ;;  %v9935_v22 = vpack.c.bf16 %v4758_v1, %v4757_v38  ;;  %v10045_v38 = vld [vmem:[%s13362_s5 + $0x18] sm:$0xff]  }
 0xd3f   : > { %v10415_v45 = vpop.eup %10414  ;;  %v4770_v16 = vmul.f32 %v10413_v33, %v12152_v25  ;;  %v4638_v3 = vpop.xlane.xlu0 %4637 }
 0xd40   : > { %v4769_v47 = vmul.f32 %v10415_v45, %v12154_v46  ;;  %10424 = vrcp.f32 %v4638_v3  ;;  %v4635_v6 = vpop.xlane.xlu1 %4634  ;;  %9937 = vmatpush3.bf16.xpose.msk.msra.mxu1 %vm11341_vm13, %v9935_v22 }
 0xd41   : > { %10426 = vrcp.f32 %v4635_v6  ;;  %9938 = vmatprep.subr.bf16.mxu1 %v13432_v14 }
 0xd42   : > { %v10417_v15 = vpop.eup %10416  ;;  %v9959_v8 = vpack.c.bf16 %v4770_v16, %v4769_v47 }
 0xd43   : > { %v10419_v30 = vpop.eup %10418  ;;  %v4760_v43 = vmul.f32 %v10417_v15, %v12162_v42  ;;  %v4674_v29 = vpop.xlane.xlu0 %4673 }
 0xd44   : > { %v4759_v18 = vmul.f32 %v10419_v30, %v12164_v20  ;;  %10428 = vrcp.f32 %v4674_v29  ;;  %v4671_v25 = vpop.xlane.xlu1 %4670  ;;  %9961 = vmatpush3.bf16.xpose.msk.msra.mxu0 %vm11341_vm13, %v9959_v8 }
 0xd45   : > { %10430 = vrcp.f32 %v4671_v25  ;;  %9962 = vmatprep.subr.bf16.mxu0 %v13432_v14 }
 0xd46   : > { %v10421_v46 = vpop.eup %10420  ;;  %v9939_v63 = vpack.c.bf16 %v4760_v43, %v4759_v18  ;;  %v13460_v43 = vld [vmem:[#allocation16_spill] sm:$0xff] }
 0xd47   : > { %v10423_v53 = vpop.eup %10422  ;;  %v4772_v4 = vmul.f32 %v10421_v46, %v12172_v59  ;;  %v4644_v32 = vpop.xlane.xlu0 %4643  ;;  %v13461_v46 = vld [vmem:[#allocation13_spill] sm:$0xff] }
 0xd48   : > { %v4771_v62 = vmul.f32 %v10423_v53, %v12174_v55  ;;  %10432 = vrcp.f32 %v4644_v32  ;;  %v4641_v42 = vpop.xlane.xlu1 %4640  ;;  %9941 = vmatpush3.bf16.xpose.msk.msra.mxu1 %vm11341_vm13, %v9939_v63  ;;  %v13462_v53 = vld [vmem:[#allocation15_spill] sm:$0xff] }
 0xd49   : > { %10434 = vrcp.f32 %v4641_v42  ;;  %9942 = vmatprep.subr.bf16.mxu1 %v13432_v14 }
 0xd4a   : > { %v10425_v20 = vpop.eup %10424  ;;  %v9963_v54 = vpack.c.bf16 %v4772_v4, %v4771_v62  ;;  %v13463_v62 = vld [vmem:[#allocation14_spill] sm:$0xff] }
 0xd4b   : > { %v10427_v44 = vpop.eup %10426  ;;  %v4762_v49 = vmul.f32 %v10425_v20, %v12182_v37  ;;  %v4680_v40 = vpop.xlane.xlu0 %4679 }
 0xd4c   : > { %v4761_v34 = vmul.f32 %v10427_v44, %v12184_v13  ;;  %10436 = vrcp.f32 %v4680_v40  ;;  %v4677_v59 = vpop.xlane.xlu1 %4676  ;;  %9965 = vmatpush3.bf16.xpose.msk.msra.mxu0 %vm11341_vm13, %v9963_v54 }
 0xd4d   : > { %10438 = vrcp.f32 %v4677_v59  ;;  %9966 = vmatprep.subr.bf16.mxu0 %v13432_v14 }
 0xd4e   : > { %v10429_v55 = vpop.eup %10428  ;;  %v9943_v51 = vpack.c.bf16 %v4762_v49, %v4761_v34 }
 0xd4f   : > { %v10431_v9 = vpop.eup %10430  ;;  %v4774_v31 = vmul.f32 %v10429_v55, %v12190_v41 }
 0xd50   : > { %v4773_v27 = vmul.f32 %v10431_v9, %v12192_v24  ;;  %9945 = vmatpush3.bf16.xpose.msk.msra.mxu1 %vm11341_vm13, %v9943_v51  ;;  %v3341_v26 = vpop.permute.xlu1 %3340 }
 0xd51   : > { %9946 = vmatprep.subr.bf16.mxu1 %v13432_v14 }
 0xd52   : > { %v10433_v37 = vpop.eup %10432  ;;  %v9967_v13 = vpack.c.bf16 %v4774_v31, %v4773_v27 }
 0xd53   : > { %v10435_v12 = vpop.eup %10434  ;;  %v4764_v39 = vmul.f32 %v10433_v37, %v12198_v19  ;;  %v13457_v19 = vld [vmem:[#allocation10_spill] sm:$0xff] }
 0xd54   : > { %v4763_v21 = vmul.f32 %v10435_v12, %v12200_v5  ;;  %9969 = vmatpush3.bf16.xpose.msk.msra.mxu0 %vm11341_vm13, %v9967_v13  ;;  %v3471_v5 = vadd.f32 %v13457_v19, %v3341_v26  ;;  %v3346_v48 = vpop.permute.xlu0 %3345  ;;  %v5228_v33 = vpop.permute.xlu1 %5227 }
 0xd55   : > { %9970 = vmatprep.subr.bf16.mxu0 %v13432_v14  ;;  %v13458_v14 = vld [vmem:[#allocation9_spill] sm:$0xff] }
 0xd56   : > { %v10437_v41 = vpop.eup %10436  ;;  %v9947_v50 = vpack.c.bf16 %v4764_v39, %v4763_v21  ;;  %v3474_v0 = vadd.f32 %v13458_v14, %v3346_v48 }
 0xd57   : > { %v10439_v24 = vpop.eup %10438  ;;  %v4776_v11 = vmul.f32 %v10437_v41, %v12206_v7  ;;  %v13459_v7 = vmov 0  }
 0xd58   : > { %v4775_v2 = vmul.f32 %v10439_v24, %v12208_v56  ;;  %9949 = vmatpush3.bf16.xpose.msk.msra.mxu1 %vm11341_vm13, %v9947_v50  ;;  %v10044_v56 = vld [vmem:[%s13362_s5 + $0x10] sm:$0xff]   ;;  %v5233_v22 = vpop.permute.xlu1 %5232  ;;  %v5238_v16 = vpop.permute.xlu0 %5237 }
 0xd5a   : > { %v9971_v28 = vpack.c.bf16 %v4776_v11, %v4775_v2 }
 0xd5c   : > { %9973 = vmatpush3.bf16.xpose.msk.msra.mxu0 %vm11341_vm13, %v9971_v28  ;;  %v5243_v8 = vpop.permute.xlu1 %5242 }
 0xd5f   : > { %9689 = vmatmul.mubr.msk.f32.vlgmr.msra.gmra.mrb[72].mxu1 %vm1733_vm10, %v3471_v5 }
 0xd60   : > { %9722 = vmatprep.mubr.msk.bf16.mxu1 %vm860_vm8, %v10044_v56 }
 0xd63   : > { %9716 = vmatmul.mubr.msk.f32.vlgmr.msra.gmra.mrb[80].mxu0 %vm1733_vm10, %v3474_v0 }
 0xd64   : > { %7042 = vmatprep.mubr.bf16.mxu0 %v13459_v7 }
 0xdc6   : > { %v4882_v10 = vpop.f32.mrb[70].mxu1 }
 0xdc7   : > { %v9636_v60 = vpop.f32.mrb[71].mxu1 }
 0xdc9   : > { %v4991_v36 = vpop.f32.mrb[78].mxu0 }
 0xdca   : > { %v5218_v23 = vpack.c.bf16 %v4991_v36, %v4882_v10  ;;  %v9663_v61 = vpop.f32.mrb[79].mxu0 }
 0xdcb   : > { %v5369_v61 = vpop.permute.xlu0 %5368 }
 0xdcc   : > { %9718 = vmatprep.subr.bf16.mxu1 %v5218_v23 }
 0xdcd   : > { %9719 = vmatpush3.bf16.msra.mxu1 %v5218_v23 }
 0xe32   : > { %v5100_v35 = vpop.f32.mrb[72].mxu1 }
 0xe33   : > { %v9690_v17 = vpop.f32.mrb[73].mxu1 }
 0xe36   : > { %v5209_v57 = vpop.f32.mrb[80].mxu0 }
 0xe37   : > { %v5219_v1 = vpack.c.bf16 %v5209_v57, %v5100_v35  ;;  %v9717_v52 = vpop.f32.mrb[81].mxu0  ;;  %v5374_v35 = vpop.permute.xlu1 %5373 }
 0xe39   : > { %9720 = vmatprep.subr.bf16.mxu1 %v5219_v1 }
 0xe3a   : > { %9721 = vmatpush3.bf16.msra.mxu1 %v5219_v1  ;;  %v5393_v1 = vpop.permute.xlu0 %5392 }
 0xe3b   : > { %v5398_v52 = vpop.permute.xlu1 %5397 }
 0xe3d   : > { %9723 = vmatmul.mubr.msk.bf16.vlgmr.msra.gmra.mrb[76].mxu1 %vm860_vm8, %v10045_v38 }
 0xe3e   : > { %9730 = vmatprep.mubr.msk.bf16.mxu1 %vm860_vm8, %v10046_v58  ;;  %v5379_v38 = vpop.permute.xlu0 %5378 }
 0xe3f   : > { %v5384_v58 = vpop.permute.xlu1 %5383 }
 0xf10   : > { %v9724_v45 = vpop.f32.mrb[76].mxu1 }
 0xf11   : > { %v5295_v3 = vpop.f32.mrb[77].mxu1  ;;  %v5304_v47 = vadd.f32 %v9724_v45, %v5238_v16 }
 0xf12   : > { %v5296_v6 = vadd.f32 %v5295_v3, %v5228_v33  ;;  %v9725_v15 = vpop.f32.mrb[78].mxu1 }
 0xf13   : > { %v5298_v30 = vpop.f32.mrb[79].mxu1  ;;  %v5307_v18 = vadd.f32 %v9725_v15, %v5243_v8  ;;  %v5312_v63 = vadd.f32 %v5304_v47, %v13461_v46 }
 0xf14   : > { %v5310_v29 = vadd.f32 %v5296_v6, %v13460_v43  ;;  %v5299_v25 = vadd.f32 %v5298_v30, %v5233_v22  ;;  %v5403_v30 = vpop.permute.xlu0 %5402  ;;  %v5408_v43 = vpop.permute.xlu1 %5407 }
 0xf15   : > { %v5313_v42 = vadd.f32 %v5307_v18, %v13463_v62  ;;  %v5327_v44 = vsel %vm1733_vm10, %v5312_v63, 0.0  ;;  %v10049_v62 = vld [vmem:[%s13366_s9 + $0x38] sm:$0xff]  }
 0xf16   : > { %v5311_v4 = vadd.f32 %v5299_v25, %v13462_v53  ;;  %v5324_v32 = vsel %vm1733_vm10, %v5310_v29, 0.0 }
 0xf17   : > { %v5329_v40 = vsel %vm1733_vm10, %v5313_v42, 0.0 }
 0xf18   : > { %v5325_v20 = vsel %vm1733_vm10, %v5311_v4, 0.0 }
 0xf19   : > { %v5326_v54 = vadd.f32 %v5325_v20, %v5324_v32  ;;  %v10048_v32 = vld [vmem:[%s13366_s9 + $0x30] sm:$0xff]   ;;  %v5437_v20 = vpop.permute.xlu0 %5436 }
 0xf1b   : > { %v5328_v49 = vadd.f32 %v5327_v44, %v5326_v54  ;;  %v5442_v54 = vpop.permute.xlu1 %5441 }
 0xf1d   : > { %v5330_v34 = vadd.f32 %v5329_v40, %v5328_v49  ;;  %v5447_v44 = vpop.permute.xlu0 %5446 }
 0xf1f   : > { %v5331_v59 = vrot.slane %v5330_v34, 4  ;;  %v5452_v49 = vpop.permute.xlu1 %5451 }
 0xf21   : > { %v5332_v55 = vadd.f32 %v5331_v59, %v5330_v34 }
 0xf23   : > { %v5333_v51 = vrot.slane %v5332_v55, 2 }
 0xf25   : > { %v5334_v9 = vadd.f32 %v5333_v51, %v5332_v55  ;;  %v5457_v55 = vpop.permute.xlu0 %5456 }
 0xf27   : > { %v5335_v31 = vrot.slane %v5334_v9, 1 }
 0xf29   : > { %v5336_v27 = vadd.f32 %v5335_v31, %v5334_v9 }
 0xf2b   : > { %v5337_v37 = vmul.f32 0.03125, %v5336_v27 }
 0xf2d   : > { %v5338_v13 = vsub.f32 %v5310_v29, %v5337_v37  ;;  %v5339_v12 = vsub.f32 %v5311_v4, %v5337_v37  ;;  %v5340_v39 = vsub.f32 %v5312_v63, %v5337_v37  ;;  %v5341_v21 = vsub.f32 %v5313_v42, %v5337_v37  ;;  %v10047_v4 = vld [vmem:[%s13366_s9 + $0x28] sm:$0xff]   ;;  %v10050_v42 = vld [vmem:[%s13368_s11 + $0x10] sm:$0xff]   ;;  %v5462_v37 = vpop.permute.xlu1 %5461 }
 0xf2f   : > { %v5342_v41 = vmul.f32 %v5338_v13, %v5338_v13  ;;  %v5343_v50 = vmul.f32 %v5339_v12, %v5339_v12  ;;  %v5344_v24 = vmul.f32 %v5340_v39, %v5340_v39  ;;  %v5345_v11 = vmul.f32 %v5341_v21, %v5341_v21 }
 0xf31   : > { %v5346_v2 = vsel %vm1733_vm10, %v5342_v41, 0.0  ;;  %v5347_v26 = vsel %vm1733_vm10, %v5343_v50, 0.0  ;;  %v5349_v19 = vsel %vm1733_vm10, %v5344_v24, 0.0  ;;  %v5351_v48 = vsel %vm1733_vm10, %v5345_v11, 0.0  ;;  %v5467_v24 = vpop.permute.xlu0 %5466 }
 0xf32   : > { %v5348_v28 = vadd.f32 %v5347_v26, %v5346_v2 }
 0xf34   : > { %v5350_v5 = vadd.f32 %v5349_v19, %v5348_v28  ;;  %v5472_v19 = vpop.permute.xlu1 %5471 }
 0xf36   : > { %v5352_v14 = vadd.f32 %v5351_v48, %v5350_v5 }
 0xf38   : > { %v5353_v0 = vrot.slane %v5352_v14, 4 }
 0xf3a   : > { %v5354_v56 = vadd.f32 %v5353_v0, %v5352_v14 }
 0xf3c   : > { %v5355_v10 = vrot.slane %v5354_v56, 2 }
 0xf3e   : > { %v5356_v60 = vadd.f32 %v5355_v10, %v5354_v56 }
 0xf40   : > { %v5357_v36 = vrot.slane %v5356_v60, 1 }
 0xf42   : > { %v5358_v23 = vadd.f32 %v5357_v36, %v5356_v60 }
 0xf44   : > { %v5359_v17 = vmul.f32 0.03125, %v5358_v23 }
 0xf46   : > { %v5360_v57 = vadd.f32 1e-05, %v5359_v17  ;;  %v10051_v17 = vld [vmem:[%s13368_s11 + $0x18] sm:$0xff]  }
 0xf48   : > { %10440 = vrsqrt.f32 %v5360_v57  ;;  %v5784_v57 = vld [vmem:[%s13372_s15] sm:$0xff] }
 0xf52   : > { %v10441_v33 = vpop.eup %10440 }
 0xf53   : > { %v5363_v22 = vmul.f32 %v10441_v33, %v5339_v12  ;;  %v5362_v45 = vmul.f32 %v10441_v33, %v5338_v13  ;;  %v5364_v16 = vmul.f32 %v10441_v33, %v5340_v39  ;;  %v5365_v3 = vmul.f32 %v10441_v33, %v5341_v21 }
 0xf55   : > { %v5386_v47 = vmul.f32 %v5369_v61, %v5362_v45  ;;  %v5387_v6 = vmul.f32 %v5374_v35, %v5363_v22  ;;  %v5388_v15 = vmul.f32 %v5379_v38, %v5364_v16  ;;  %v5389_v8 = vmul.f32 %v5384_v58, %v5365_v3  ;;  %v5801_v58 = vld [vmem:[%s13372_s15 + $0x88] sm:$0xff]  ;;  %v5816_v16 = vld [vmem:[%s13372_s15 + $0x100] sm:$0xff] }
 0xf56   : > { %v5832_v3 = vld [vmem:[%s13372_s15 + $0x180] sm:$0xff] }
 0xf57   : > { %v12473_v29 = vadd.f32 %v5393_v1, %v5386_v47  ;;  %v12475_v18 = vadd.f32 %v5398_v52, %v5387_v6  ;;  %v12477_v25 = vadd.f32 %v5403_v30, %v5388_v15  ;;  %v12479_v46 = vadd.f32 %v5408_v43, %v5389_v8  ;;  %v5800_v1 = vld [vmem:[%s13372_s15 + $0x80] sm:$0xff]  ;;  %v5785_v52 = vld [vmem:[%s13372_s15 + $0x8] sm:$0xff] }
 0xf58   : > { %v8737_v38 = vcombine.high %v5784_v57, %v5800_v1  ;;  %v8736_v33 = vcombine.low %v5784_v57, %v5800_v1  ;;  %v8738_v22 = vcombine.low %v5785_v52, %v5801_v58  ;;  %v8739_v45 = vcombine.high %v5785_v52, %v5801_v58  ;;  %v5817_v47 = vld [vmem:[%s13372_s15 + $0x108] sm:$0xff]  ;;  %v12606_v1 = vld [vmem:[%s13372_s15 + $0x98] sm:$0xff]  ;;  %v5596_v58 = vpop.permute.xlu0 %5595 }
 0xf59   : > { %v5414_v63 = vpack.c.bf16 %v12475_v18, %v12473_v29  ;;  %v5415_v53 = vpack.c.bf16 %v12479_v46, %v12477_v25  ;;  %v8769_v6 = vcombine.high %v5816_v16, %v5832_v3  ;;  %v5833_v15 = vld [vmem:[%s13372_s15 + $0x188] sm:$0xff]  ;;  %v8768_v8 = vcombine.low %v5816_v16, %v5832_v3 }
 0xf5a   : > { %7010 = vmatprep.subr.bf16.mxu0 %v8737_v38  ;;  %v8770_v30 = vcombine.low %v5817_v47, %v5833_v15  ;;  %v8771_v43 = vcombine.high %v5817_v47, %v5833_v15 }
 0xf5b   : > { %9726 = vmatprep.subr.bf16.mxu1 %v5414_v63  ;;  %7011 = vmatpush1.bf16.msra.mxu0 %v8736_v33  ;;  %v5601_v33 = vpop.permute.xlu1 %5600 }
 0xf5c   : > { %9727 = vmatpush3.bf16.msra.mxu1 %v5414_v63  ;;  %7012 = vmatprep.subr.bf16.mxu0 %v8769_v6  ;;  %v5848_v63 = vld [vmem:[%s13372_s15 + $0x200] sm:$0xff] }
 0xf5d   : > { %9728 = vmatprep.subr.bf16.mxu1 %v5415_v53 }
 0xf5f   : > { %7013 = vmatpush1.bf16.msra.mxu0 %v8768_v8  ;;  %v5611_v15 = vpop.permute.xlu1 %5610 }
 0xf60   : > { %9729 = vmatpush3.bf16.msra.mxu1 %v5415_v53  ;;  %v5864_v53 = vld [vmem:[%s13372_s15 + $0x280] sm:$0xff] }
 0xf63   : > { %9731 = vmatmul.mubr.msk.bf16.vlgmr.msra.gmra.mrb[80].mxu1 %vm860_vm8, %v10047_v4  ;;  %v5849_v4 = vld [vmem:[%s13372_s15 + $0x208] sm:$0xff] }
 0xf64   : > { %9734 = vmatprep.mubr.msk.bf16.mxu1 %vm860_vm8, %v10048_v32  ;;  %v8801_v32 = vcombine.high %v5848_v63, %v5864_v53 }
 0xf66   : > { %7014 = vmatprep.subr.bf16.mxu0 %v8801_v32 }
 0xf6b   : > { %9735 = vmatmul.mubr.msk.bf16.gmra.mrb[84].mxu1 %vm860_vm8, %v10049_v62  ;;  %v5865_v62 = vld [vmem:[%s13372_s15 + $0x288] sm:$0xff] }
 0xf6c   : > { %9746 = vmatprep.mubr.msk.bf16.mxu1 %vm3102_vm14, %v10050_v42  ;;  %v8800_v42 = vcombine.low %v5848_v63, %v5864_v53 }
 0xf6e   : > { %7015 = vmatpush1.bf16.msra.mxu0 %v8800_v42 }
0x1036   : > { %v9732_v40 = vpop.f32.mrb[80].mxu1 }
0x1037   : > { %v5549_v34 = vadd.f32 %v9732_v40, %v5447_v44  ;;  %v5540_v59 = vpop.f32.mrb[81].mxu1  ;;  %v5880_v44 = vld [vmem:[%s13372_s15 + $0x300] sm:$0xff]  ;;  %v5881_v40 = vld [vmem:[%s13372_s15 + $0x308] sm:$0xff] }
0x1038   : > { %v5541_v51 = vadd.f32 %v5540_v59, %v5437_v20  ;;  %v9733_v9 = vpop.f32.mrb[82].mxu1  ;;  %v8802_v20 = vcombine.low %v5849_v4, %v5865_v62  ;;  %v5897_v59 = vld [vmem:[%s13372_s15 + $0x388] sm:$0xff] }
0x1039   : > { %v5552_v31 = vadd.f32 %v9733_v9, %v5452_v49  ;;  %v5543_v27 = vpop.f32.mrb[83].mxu1  ;;  %v5573_v12 = vmax.f32 %v5549_v34, 0.0  ;;  %v5896_v49 = vld [vmem:[%s13372_s15 + $0x380] sm:$0xff]  ;;  %v8835_v9 = vcombine.high %v5881_v40, %v5897_v59 }
0x103a   : > { %v5544_v13 = vadd.f32 %v5543_v27, %v5442_v54  ;;  %v5571_v21 = vmax.f32 %v5541_v51, 0.0  ;;  %v8803_v54 = vcombine.high %v5849_v4, %v5865_v62  ;;  %v8833_v34 = vcombine.high %v5880_v44, %v5896_v49  ;;  %v5928_v27 = vld [vmem:[%s13372_s15 + $0x480] sm:$0xff] }
0x103b   : > { %v5574_v39 = vmax.f32 %v5552_v31, 0.0  ;;  %v8834_v51 = vcombine.low %v5881_v40, %v5897_v59  ;;  %v5912_v31 = vld [vmem:[%s13372_s15 + $0x400] sm:$0xff] }
0x103c   : > { %v5572_v41 = vmax.f32 %v5544_v13, 0.0  ;;  %7016 = vmatprep.subr.bf16.mxu0 %v8833_v34  ;;  %v8865_v13 = vcombine.high %v5912_v31, %v5928_v27 }
0x103d   : > { %v5585_v50 = vpack.c.bf16 %v5574_v39, %v5573_v12  ;;  %v5929_v12 = vld [vmem:[%s13372_s15 + $0x488] sm:$0xff]  ;;  %v8864_v39 = vcombine.low %v5912_v31, %v5928_v27 }
0x103e   : > { %v5584_v11 = vpack.c.bf16 %v5572_v41, %v5571_v21  ;;  %v9736_v2 = vpop.f32.mrb[84].mxu1 }
0x103f   : > { %v5565_v26 = vadd.f32 %v9736_v2, %v5467_v24  ;;  %v5556_v28 = vpop.f32.mrb[85].mxu1  ;;  %v5960_v24 = vld [vmem:[%s13372_s15 + $0x580] sm:$0xff] }
0x1040   : > { %v5557_v5 = vadd.f32 %v5556_v28, %v5457_v55  ;;  %v9737_v48 = vpop.f32.mrb[86].mxu1  ;;  %9738 = vmatprep.subr.bf16.mxu1 %v5584_v11  ;;  %v8832_v55 = vcombine.low %v5880_v44, %v5896_v49 }
0x1041   : > { %v5568_v14 = vadd.f32 %v9737_v48, %v5472_v19  ;;  %v5559_v0 = vpop.f32.mrb[87].mxu1  ;;  %9739 = vmatpush3.bf16.msra.mxu1 %v5584_v11  ;;  %v5577_v10 = vmax.f32 %v5565_v26, 0.0  ;;  %v5945_v11 = vld [vmem:[%s13372_s15 + $0x508] sm:$0xff]  ;;  %v10513_v19 = vmov 65535  }
0x1042   : > { %v5560_v56 = vadd.f32 %v5559_v0, %v5462_v37  ;;  %9740 = vmatprep.subr.bf16.mxu1 %v5585_v50  ;;  %v5575_v36 = vmax.f32 %v5557_v5, 0.0  ;;  %7017 = vmatpush1.bf16.msra.mxu0 %v8832_v55  ;;  %v5913_v37 = vld [vmem:[%s13372_s15 + $0x408] sm:$0xff]  ;;  %v6912_v5 = vsel %vm6910_vm15, 4294967295, %v10513_v19 }
0x1043   : > { %v5578_v60 = vmax.f32 %v5568_v14, 0.0  ;;  %v8866_v21 = vcombine.low %v5913_v37, %v5929_v12  ;;  %v8867_v41 = vcombine.high %v5913_v37, %v5929_v12  ;;  %7018 = vmatprep.subr.bf16.mxu0 %v8865_v13  ;;  %v5961_v26 = vld [vmem:[%s13372_s15 + $0x588] sm:$0xff]  ;;  %v12578_v0 = vsel %vm6911_vm0, %v6912_v5, 0 }
0x1044   : > { %v5576_v23 = vmax.f32 %v5560_v56, 0.0  ;;  %v8898_v48 = vcombine.low %v5945_v11, %v5961_v26  ;;  %v8899_v14 = vcombine.high %v5945_v11, %v5961_v26 }
0x1045   : > { %v5587_v61 = vpack.c.bf16 %v5578_v60, %v5577_v10  ;;  %9741 = vmatpush3.bf16.msra.mxu1 %v5585_v50  ;;  %v5944_v50 = vld [vmem:[%s13372_s15 + $0x500] sm:$0xff] }
0x1046   : > { %v5586_v35 = vpack.c.bf16 %v5576_v23, %v5575_v36  ;;  %v8897_v2 = vcombine.high %v5944_v50, %v5960_v24  ;;  %7019 = vmatpush1.bf16.msra.mxu0 %v8864_v39  ;;  %v8896_v28 = vcombine.low %v5944_v50, %v5960_v24  ;;  %v6924_v10 = vand.u32 %v8899_v14, %v12578_v0  ;;  %v12587_v23 = vld [vmem:[%s13372_s15 + $0x10] sm:$0xff] }
0x1047   : > { %v6921_v36 = vand.u32 %v8898_v48, %v12578_v0 }
0x1048   : > { %9742 = vmatprep.subr.bf16.mxu1 %v5586_v35  ;;  %v6918_v56 = vand.u32 %v8897_v2, %v12578_v0  ;;  %v6915_v60 = vand.u32 %v8896_v28, %v12578_v0 }
0x1049   : > { %9743 = vmatpush3.bf16.msra.mxu1 %v5586_v35  ;;  %v12597_v35 = vld [vmem:[%s13372_s15 + $0x18] sm:$0xff] }
0x104a   : > { %9744 = vmatprep.subr.bf16.mxu1 %v5587_v61  ;;  %7020 = vmatprep.subr.bf16.mxu0 %v6918_v56  ;;  %v8742_v52 = vcombine.low %v12597_v35, %v12606_v1  ;;  %v8743_v38 = vcombine.high %v12597_v35, %v12606_v1  ;;  %v5899_v35 = vld [vmem:[%s13372_s15 + $0x398] sm:$0xff] }
0x104b   : > { %7021 = vmatpush1.bf16.msra.mxu0 %v6915_v60  ;;  %v5742_v60 = vpop.permute.xlu1 %5741 }
0x104d   : > { %9745 = vmatpush3.bf16.msra.mxu1 %v5587_v61  ;;  %v12592_v61 = vld [vmem:[%s13372_s15 + $0x90] sm:$0xff] }
0x104e   : > { %7057 = vmatprep.subr.bf16.mxu1 %v8739_v45  ;;  %v8741_v57 = vcombine.high %v12587_v23, %v12592_v61  ;;  %v5606_v45 = vpop.permute.xlu0 %5605 }
0x1050   : > { %9747 = vmatmul.mubr.msk.bf16.vlgmr.msra.gmra.mrb[88].mxu1 %vm3102_vm14, %v10051_v17  ;;  %v8740_v17 = vcombine.low %v12587_v23, %v12592_v61  ;;  %7104 = vmatprep.subr.bf16.mxu0 %v8741_v57  ;;  %v5898_v23 = vld [vmem:[%s13372_s15 + $0x390] sm:$0xff]  ;;  %v5883_v61 = vld [vmem:[%s13372_s15 + $0x318] sm:$0xff] }
0x1051   : > { %7089 = vmatprep.mubr.bf16.mxu1 %v13459_v7  ;;  %7058 = vmatpush1.bf16.msra.mxu1 %v8738_v22 }
0x1052   : > { %7059 = vmatprep.subr.bf16.mxu1 %v8771_v43 }
0x1055   : > { %7060 = vmatpush1.bf16.msra.mxu1 %v8770_v30 }
0x1056   : > { %7061 = vmatprep.subr.bf16.mxu1 %v8803_v54 }
0x1059   : > { %7062 = vmatpush1.bf16.msra.mxu1 %v8802_v20 }
0x105a   : > { %7063 = vmatprep.subr.bf16.mxu1 %v8835_v9 }
0x105d   : > { %7064 = vmatpush1.bf16.msra.mxu1 %v8834_v51 }
0x105e   : > { %7065 = vmatprep.subr.bf16.mxu1 %v8867_v41 }
0x1061   : > { %7066 = vmatpush1.bf16.msra.mxu1 %v8866_v21 }
0x1062   : > { %7067 = vmatprep.subr.bf16.mxu1 %v6924_v10  ;;  %v5737_v10 = vpop.permute.xlu0 %5736 }
0x1065   : > { %7068 = vmatpush1.bf16.msra.mxu1 %v6921_v36 }
0x1066   : > { %7151 = vmatprep.subr.bf16.mxu1 %v8743_v38  ;;  %v5761_v38 = vpop.permute.xlu0 %5760 }
0x1123   : > { %v9748_v22 = vpop.f32.mrb[88].mxu1 }
0x1124   : > { %v5663_v16 = vpop.f32.mrb[89].mxu1  ;;  %v5672_v3 = vadd.f32 %v9748_v22, %v5606_v45 }
0x1125   : > { %v5664_v47 = vadd.f32 %v5663_v16, %v5596_v58  ;;  %v9749_v6 = vpop.f32.mrb[90].mxu1  ;;  %v5766_v58 = vpop.permute.xlu1 %5765 }
0x1126   : > { %v5666_v8 = vpop.f32.mrb[91].mxu1  ;;  %v5675_v43 = vadd.f32 %v9749_v6, %v5611_v15  ;;  %v5680_v53 = vadd.f32 %v5672_v3, %v12477_v25 }
0x1127   : > { %v5678_v30 = vadd.f32 %v5664_v47, %v12473_v29  ;;  %v5667_v63 = vadd.f32 %v5666_v8, %v5601_v33  ;;  %v5747_v33 = vpop.permute.xlu0 %5746 }
0x1128   : > { %v5681_v62 = vadd.f32 %v5675_v43, %v12479_v46  ;;  %v5695_v54 = vsel %vm1733_vm10, %v5680_v53, 0.0 }
0x1129   : > { %v5679_v4 = vadd.f32 %v5667_v63, %v12475_v18  ;;  %v5692_v32 = vsel %vm1733_vm10, %v5678_v30, 0.0  ;;  %v5752_v22 = vpop.permute.xlu1 %5751  ;;  %v5818_v63 = vld [vmem:[%s13372_s15 + $0x110] sm:$0xff] }
0x112a   : > { %v5697_v49 = vsel %vm1733_vm10, %v5681_v62, 0.0 }
0x112b   : > { %v5693_v42 = vsel %vm1733_vm10, %v5679_v4, 0.0 }
0x112c   : > { %v5694_v20 = vadd.f32 %v5693_v42, %v5692_v32  ;;  %v5834_v32 = vld [vmem:[%s13372_s15 + $0x190] sm:$0xff]  ;;  %v5835_v42 = vld [vmem:[%s13372_s15 + $0x198] sm:$0xff] }
0x112e   : > { %v5696_v44 = vadd.f32 %v5695_v54, %v5694_v20 }
0x1130   : > { %v5698_v40 = vadd.f32 %v5697_v49, %v5696_v44 }
0x1132   : > { %v5699_v29 = vrot.slane %v5698_v40, 4 }
0x1134   : > { %v5700_v34 = vadd.f32 %v5699_v29, %v5698_v40 }
0x1136   : > { %v5701_v59 = vrot.slane %v5700_v34, 2 }
0x1138   : > { %v5702_v55 = vadd.f32 %v5701_v59, %v5700_v34  ;;  %v8773_v34 = vcombine.high %v5818_v63, %v5834_v32 }
0x113a   : > { %v5703_v25 = vrot.slane %v5702_v55, 1 }
0x113c   : > { %v5704_v51 = vadd.f32 %v5703_v25, %v5702_v55  ;;  %v5850_v55 = vld [vmem:[%s13372_s15 + $0x210] sm:$0xff] }
0x113d   : > { %v5866_v25 = vld [vmem:[%s13372_s15 + $0x290] sm:$0xff] }
0x113e   : > { %v5705_v18 = vmul.f32 0.03125, %v5704_v51  ;;  %v5851_v51 = vld [vmem:[%s13372_s15 + $0x218] sm:$0xff] }
0x1140   : > { %v5706_v9 = vsub.f32 %v5678_v30, %v5705_v18  ;;  %v5707_v31 = vsub.f32 %v5679_v4, %v5705_v18  ;;  %v5708_v27 = vsub.f32 %v5680_v53, %v5705_v18  ;;  %v5709_v46 = vsub.f32 %v5681_v62, %v5705_v18  ;;  %v5771_v53 = vpop.permute.xlu0 %5770  ;;  %v5776_v4 = vpop.permute.xlu1 %5775  ;;  %v5819_v62 = vld [vmem:[%s13372_s15 + $0x118] sm:$0xff] }
0x1141   : > { %v8775_v59 = vcombine.high %v5819_v62, %v5835_v42  ;;  %v5867_v18 = vld [vmem:[%s13372_s15 + $0x298] sm:$0xff] }
0x1142   : > { %v5710_v37 = vmul.f32 %v5706_v9, %v5706_v9  ;;  %v5711_v13 = vmul.f32 %v5707_v31, %v5707_v31  ;;  %v5712_v12 = vmul.f32 %v5708_v27, %v5708_v27  ;;  %v5713_v39 = vmul.f32 %v5709_v46, %v5709_v46 }
0x1143   : > { %v8806_v1 = vcombine.low %v5851_v51, %v5867_v18 }
0x1144   : > { %v5714_v21 = vsel %vm1733_vm10, %v5710_v37, 0.0  ;;  %v5715_v41 = vsel %vm1733_vm10, %v5711_v13, 0.0  ;;  %v5717_v24 = vsel %vm1733_vm10, %v5712_v12, 0.0  ;;  %v5719_v2 = vsel %vm1733_vm10, %v5713_v39, 0.0  ;;  %v5882_v37 = vld [vmem:[%s13372_s15 + $0x310] sm:$0xff] }
0x1145   : > { %v5716_v50 = vadd.f32 %v5715_v41, %v5714_v21  ;;  %v5930_v13 = vld [vmem:[%s13372_s15 + $0x490] sm:$0xff]  ;;  %v8837_v12 = vcombine.high %v5882_v37, %v5898_v23  ;;  %v8839_v39 = vcombine.high %v5883_v61, %v5899_v35  ;;  %v5915_v21 = vld [vmem:[%s13372_s15 + $0x418] sm:$0xff] }
0x1146   : > { %v5931_v41 = vld [vmem:[%s13372_s15 + $0x498] sm:$0xff] }
0x1147   : > { %v5718_v11 = vadd.f32 %v5717_v24, %v5716_v50  ;;  %v5946_v50 = vld [vmem:[%s13372_s15 + $0x510] sm:$0xff] }
0x1148   : > { %v5962_v24 = vld [vmem:[%s13372_s15 + $0x590] sm:$0xff] }
0x1149   : > { %v5720_v26 = vadd.f32 %v5719_v2, %v5718_v11  ;;  %v5947_v11 = vld [vmem:[%s13372_s15 + $0x518] sm:$0xff] }
0x114a   : > { %v5963_v2 = vld [vmem:[%s13372_s15 + $0x598] sm:$0xff] }
0x114b   : > { %v5721_v28 = vrot.slane %v5720_v26, 4 }
0x114d   : > { %v5722_v19 = vadd.f32 %v5721_v28, %v5720_v26  ;;  %v8836_v26 = vcombine.low %v5882_v37, %v5898_v23  ;;  %v8838_v28 = vcombine.low %v5883_v61, %v5899_v35  ;;  %v5917_v61 = vld [vmem:[%s13372_s15 + $0x428] sm:$0xff] }
0x114e   : > { %v5933_v35 = vld [vmem:[%s13372_s15 + $0x4a8] sm:$0xff] }
0x114f   : > { %v5723_v5 = vrot.slane %v5722_v19, 2 }
0x1151   : > { %v5724_v48 = vadd.f32 %v5723_v5, %v5722_v19  ;;  %v8871_v5 = vcombine.high %v5915_v21, %v5931_v41 }
0x1153   : > { %v5725_v14 = vrot.slane %v5724_v48, 1 }
0x1155   : > { %v5726_v56 = vadd.f32 %v5725_v14, %v5724_v48  ;;  %v8901_v48 = vcombine.high %v5946_v50, %v5962_v24  ;;  %v8903_v14 = vcombine.high %v5947_v11, %v5963_v2 }
0x1157   : > { %v5727_v36 = vmul.f32 0.03125, %v5726_v56 }
0x1159   : > { %v5728_v57 = vadd.f32 1e-05, %v5727_v36  ;;  %v8902_v36 = vcombine.low %v5947_v11, %v5963_v2  ;;  %v8874_v2 = vcombine.low %v5917_v61, %v5933_v35 }
0x115b   : > { %10442 = vrsqrt.f32 %v5728_v57  ;;  %v6930_v57 = vand.u32 %v8901_v48, %v12578_v0  ;;  %v5790_v48 = vld [vmem:[%s13372_s15 + $0x30] sm:$0xff] }
0x1165   : > { %v10443_v45 = vpop.eup %10442 }
0x1166   : > { %v5730_v16 = vmul.f32 %v10443_v45, %v5706_v9  ;;  %v5731_v3 = vmul.f32 %v10443_v45, %v5707_v31  ;;  %v5732_v47 = vmul.f32 %v10443_v45, %v5708_v27  ;;  %v5733_v6 = vmul.f32 %v10443_v45, %v5709_v46  ;;  %v5805_v45 = vld [vmem:[%s13372_s15 + $0xa8] sm:$0xff] }
0x1167   : > { %v8772_v9 = vcombine.low %v5818_v63, %v5834_v32  ;;  %v8774_v31 = vcombine.low %v5819_v62, %v5835_v42  ;;  %v8805_v27 = vcombine.high %v5850_v55, %v5866_v25  ;;  %v8807_v46 = vcombine.high %v5851_v51, %v5867_v18  ;;  %v5852_v62 = vld [vmem:[%s13372_s15 + $0x220] sm:$0xff]  ;;  %v5885_v51 = vld [vmem:[%s13372_s15 + $0x328] sm:$0xff] }
0x1168   : > { %v5754_v15 = vmul.f32 %v5737_v10, %v5730_v16  ;;  %v5755_v8 = vmul.f32 %v5742_v60, %v5731_v3  ;;  %v5756_v30 = vmul.f32 %v5747_v33, %v5732_v47  ;;  %v5757_v43 = vmul.f32 %v5752_v22, %v5733_v6  ;;  %v5804_v33 = vld [vmem:[%s13372_s15 + $0xa0] sm:$0xff]  ;;  %v5789_v22 = vld [vmem:[%s13372_s15 + $0x28] sm:$0xff] }
0x1169   : > { %v8870_v10 = vcombine.low %v5915_v21, %v5931_v41  ;;  %v8900_v60 = vcombine.low %v5946_v50, %v5962_v24  ;;  %v6933_v3 = vand.u32 %v8902_v36, %v12578_v0  ;;  %v8747_v6 = vcombine.high %v5789_v22, %v5805_v45  ;;  %v5868_v42 = vld [vmem:[%s13372_s15 + $0x2a0] sm:$0xff]  ;;  %v5901_v18 = vld [vmem:[%s13372_s15 + $0x3a8] sm:$0xff] }
0x116a   : > { %v5778_v20 = vadd.f32 %v5761_v38, %v5754_v15  ;;  %v5779_v54 = vadd.f32 %v5766_v58, %v5755_v8  ;;  %v5780_v44 = vadd.f32 %v5771_v53, %v5756_v30  ;;  %v5781_v49 = vadd.f32 %v5776_v4, %v5757_v43  ;;  %v5788_v58 = vld [vmem:[%s13372_s15 + $0x20] sm:$0xff]  ;;  %v5821_v30 = vld [vmem:[%s13372_s15 + $0x128] sm:$0xff] }
0x116b   : > { %v6936_v38 = vand.u32 %v8903_v14, %v12578_v0  ;;  %v6927_v16 = vand.u32 %v8900_v60, %v12578_v0  ;;  %v8745_v47 = vcombine.high %v5788_v58, %v5804_v33  ;;  %v5820_v15 = vld [vmem:[%s13372_s15 + $0x120] sm:$0xff]  ;;  %v5837_v43 = vld [vmem:[%s13372_s15 + $0x1a8] sm:$0xff]  ;;  %v8744_v63 = vcombine.low %v5788_v58, %v5804_v33  ;;  %v5806_v14 = vld [vmem:[%s13372_s15 + $0xb0] sm:$0xff] }
0x116c   : > { %v12636_v40 = vpack.c.bf16 %v5779_v54, %v5778_v20  ;;  %v12638_v29 = vpack.c.bf16 %v5781_v49, %v5780_v44  ;;  %v5836_v8 = vld [vmem:[%s13372_s15 + $0x1a0] sm:$0xff]  ;;  %v8746_v53 = vcombine.low %v5789_v22, %v5805_v45  ;;  %v8779_v32 = vcombine.high %v5821_v30, %v5837_v43  ;;  %v5853_v20 = vld [vmem:[%s13372_s15 + $0x228] sm:$0xff]  ;;  %v5822_v58 = vld [vmem:[%s13372_s15 + $0x130] sm:$0xff] }
0x116d   : > { %v8777_v4 = vcombine.high %v5820_v15, %v5836_v8  ;;  %v5869_v54 = vld [vmem:[%s13372_s15 + $0x2a8] sm:$0xff]  ;;  %v8776_v44 = vcombine.low %v5820_v15, %v5836_v8  ;;  %v8778_v49 = vcombine.low %v5821_v30, %v5837_v43  ;;  %v8843_v23 = vcombine.high %v5885_v51, %v5901_v18  ;;  %v5838_v33 = vld [vmem:[%s13372_s15 + $0x1b0] sm:$0xff]  ;;  %v5823_v22 = vld [vmem:[%s13372_s15 + $0x138] sm:$0xff] }
0x116e   : > { %8928 = vmatmul.mubr.msk.bf16.vlgmr.msra.gmra.mrb[84].mxu0 %vm1733_vm10, %v12636_v40  ;;  %8930 = vmatmul.mubr.msk.bf16.vlgmr.msra.gmra.mrb[92].mxu1 %vm1733_vm10, %v12636_v40  ;;  %v8875_v41 = vcombine.high %v5917_v61, %v5933_v35  ;;  %v5839_v45 = vld [vmem:[%s13372_s15 + $0x1b8] sm:$0xff]  ;;  %v5854_v15 = vld [vmem:[%s13372_s15 + $0x230] sm:$0xff] }
0x116f   : > { %7105 = vmatpush1.bf16.msra.mxu0 %v8740_v17  ;;  %7152 = vmatpush1.bf16.msra.mxu1 %v8742_v52  ;;  %v8804_v17 = vcombine.low %v5850_v55, %v5866_v25  ;;  %v5914_v52 = vld [vmem:[%s13372_s15 + $0x410] sm:$0xff]  ;;  %v5884_v55 = vld [vmem:[%s13372_s15 + $0x320] sm:$0xff]  ;;  %v5855_v30 = vld [vmem:[%s13372_s15 + $0x238] sm:$0xff] }
0x1170   : > { %7106 = vmatprep.subr.bf16.mxu0 %v8773_v34  ;;  %7153 = vmatprep.subr.bf16.mxu1 %v8775_v59  ;;  %v8869_v19 = vcombine.high %v5914_v52, %v5930_v13  ;;  %v8868_v56 = vcombine.low %v5914_v52, %v5930_v13  ;;  %v8809_v34 = vcombine.high %v5852_v62, %v5868_v42  ;;  %v5900_v25 = vld [vmem:[%s13372_s15 + $0x3a0] sm:$0xff]  ;;  %v5949_v52 = vld [vmem:[%s13372_s15 + $0x528] sm:$0xff]  ;;  %v5870_v8 = vld [vmem:[%s13372_s15 + $0x2b0] sm:$0xff] }
0x1171   : > { %7050 = vmatprep.mubr.bf16.mxu0 %v13459_v7  ;;  %7097 = vmatprep.mubr.bf16.mxu1 %v13459_v7  ;;  %v8811_v59 = vcombine.high %v5853_v20, %v5869_v54  ;;  %v8841_v37 = vcombine.high %v5884_v55, %v5900_v25  ;;  %v5965_v13 = vld [vmem:[%s13372_s15 + $0x5a8] sm:$0xff]  ;;  %v5871_v43 = vld [vmem:[%s13372_s15 + $0x2b8] sm:$0xff] }
0x1172   : > { %v8907_v24 = vcombine.high %v5949_v52, %v5965_v13 }
0x1173   : > { %7107 = vmatpush1.bf16.msra.mxu0 %v8772_v9  ;;  %7154 = vmatpush1.bf16.msra.mxu1 %v8774_v31  ;;  %v8808_v9 = vcombine.low %v5852_v62, %v5868_v42  ;;  %v8810_v31 = vcombine.low %v5853_v20, %v5869_v54  ;;  %v5886_v62 = vld [vmem:[%s13372_s15 + $0x330] sm:$0xff]  ;;  %v5887_v20 = vld [vmem:[%s13372_s15 + $0x338] sm:$0xff] }
0x1174   : > { %7108 = vmatprep.subr.bf16.mxu0 %v8805_v27  ;;  %7155 = vmatprep.subr.bf16.mxu1 %v8807_v46  ;;  %v5916_v27 = vld [vmem:[%s13372_s15 + $0x420] sm:$0xff]  ;;  %v5902_v42 = vld [vmem:[%s13372_s15 + $0x3b0] sm:$0xff]  ;;  %v5903_v54 = vld [vmem:[%s13372_s15 + $0x3b8] sm:$0xff] }
0x1175   : > { %v5932_v46 = vld [vmem:[%s13372_s15 + $0x4a0] sm:$0xff] }
0x1176   : > { %8929 = vmatmul.mubr.msk.bf16.gmra.mrb[88].mxu0 %vm1733_vm10, %v12638_v29  ;;  %8931 = vmatmul.mubr.msk.bf16.gmra.mrb[96].mxu1 %vm1733_vm10, %v12638_v29  ;;  %v8873_v21 = vcombine.high %v5916_v27, %v5932_v46  ;;  %v8872_v11 = vcombine.low %v5916_v27, %v5932_v46  ;;  %v5951_v27 = vld [vmem:[%s13372_s15 + $0x538] sm:$0xff] }
0x1177   : > { %7109 = vmatpush1.bf16.msra.mxu0 %v8804_v17  ;;  %7156 = vmatpush1.bf16.msra.mxu1 %v8806_v1  ;;  %v5948_v17 = vld [vmem:[%s13372_s15 + $0x520] sm:$0xff]  ;;  %v5967_v46 = vld [vmem:[%s13372_s15 + $0x5b8] sm:$0xff] }
0x1178   : > { %7110 = vmatprep.subr.bf16.mxu0 %v8837_v12  ;;  %7157 = vmatprep.subr.bf16.mxu1 %v8839_v39  ;;  %v5964_v1 = vld [vmem:[%s13372_s15 + $0x5a0] sm:$0xff]  ;;  %v8840_v12 = vcombine.low %v5884_v55, %v5900_v25  ;;  %v8842_v39 = vcombine.low %v5885_v51, %v5901_v18  ;;  %v8845_v55 = vcombine.high %v5886_v62, %v5902_v42  ;;  %v5919_v51 = vld [vmem:[%s13372_s15 + $0x438] sm:$0xff] }
0x1179   : > { %7136 = vmatprep.mubr.bf16.mxu0 %v13459_v7  ;;  %7183 = vmatprep.mubr.bf16.mxu1 %v13459_v7  ;;  %v8905_v50 = vcombine.high %v5948_v17, %v5964_v1  ;;  %v8847_v25 = vcombine.high %v5887_v20, %v5903_v54  ;;  %v5935_v18 = vld [vmem:[%s13372_s15 + $0x4b8] sm:$0xff] }
0x117a   : > { %v8879_v35 = vcombine.high %v5919_v51, %v5935_v18 }
0x117b   : > { %7111 = vmatpush1.bf16.msra.mxu0 %v8836_v26  ;;  %7158 = vmatpush1.bf16.msra.mxu1 %v8838_v28  ;;  %v8904_v26 = vcombine.low %v5948_v17, %v5964_v1  ;;  %v8906_v28 = vcombine.low %v5949_v52, %v5965_v13  ;;  %v8911_v1 = vcombine.high %v5951_v27, %v5967_v46 }
0x117c   : > { %7112 = vmatprep.subr.bf16.mxu0 %v8869_v19  ;;  %7159 = vmatprep.subr.bf16.mxu1 %v8871_v5  ;;  %v6942_v19 = vand.u32 %v8905_v50, %v12578_v0  ;;  %v6948_v5 = vand.u32 %v8907_v24, %v12578_v0  ;;  %v8878_v13 = vcombine.low %v5919_v51, %v5935_v18  ;;  %v5792_v50 = vld [vmem:[%s13372_s15 + $0x40] sm:$0xff] }
0x117d   : > { %v6939_v60 = vand.u32 %v8904_v26, %v12578_v0  ;;  %v6945_v36 = vand.u32 %v8906_v28, %v12578_v0  ;;  %v5808_v24 = vld [vmem:[%s13372_s15 + $0xc0] sm:$0xff] }
0x117f   : > { %7113 = vmatpush1.bf16.msra.mxu0 %v8868_v56  ;;  %7160 = vmatpush1.bf16.msra.mxu1 %v8870_v10  ;;  %v5791_v56 = vld [vmem:[%s13372_s15 + $0x38] sm:$0xff] }
0x1180   : > { %7114 = vmatprep.subr.bf16.mxu0 %v6930_v57  ;;  %7161 = vmatprep.subr.bf16.mxu1 %v6936_v38  ;;  %v5807_v10 = vld [vmem:[%s13372_s15 + $0xb8] sm:$0xff]  ;;  %v8749_v57 = vcombine.high %v5790_v48, %v5806_v14 }
0x1181   : > { %v8751_v38 = vcombine.high %v5791_v56, %v5807_v10 }
0x1183   : > { %7115 = vmatpush1.bf16.msra.mxu0 %v6927_v16  ;;  %7162 = vmatpush1.bf16.msra.mxu1 %v6933_v3  ;;  %v8748_v16 = vcombine.low %v5790_v48, %v5806_v14  ;;  %v8750_v3 = vcombine.low %v5791_v56, %v5807_v10  ;;  %v5824_v48 = vld [vmem:[%s13372_s15 + $0x140] sm:$0xff]  ;;  %v5825_v56 = vld [vmem:[%s13372_s15 + $0x148] sm:$0xff] }
0x1184   : > { %7198 = vmatprep.subr.bf16.mxu0 %v8745_v47  ;;  %7245 = vmatprep.subr.bf16.mxu1 %v8747_v6  ;;  %v8781_v47 = vcombine.high %v5822_v58, %v5838_v33  ;;  %v8783_v6 = vcombine.high %v5823_v22, %v5839_v45  ;;  %v5840_v14 = vld [vmem:[%s13372_s15 + $0x1c0] sm:$0xff]  ;;  %v5841_v10 = vld [vmem:[%s13372_s15 + $0x1c8] sm:$0xff] }
0x1186   : > { %8932 = vmatmul.mubr.msk.bf16.vlgmr.msra.gmra.mrb[92].mxu0 %vm1733_vm10, %v12636_v40  ;;  %8934 = vmatmul.mubr.msk.bf16.vlgmr.msra.gmra.mrb[100].mxu1 %vm1733_vm10, %v12636_v40 }
0x1187   : > { %7199 = vmatpush1.bf16.msra.mxu0 %v8744_v63  ;;  %7246 = vmatpush1.bf16.msra.mxu1 %v8746_v53  ;;  %v8780_v63 = vcombine.low %v5822_v58, %v5838_v33  ;;  %v8782_v53 = vcombine.low %v5823_v22, %v5839_v45  ;;  %v5856_v58 = vld [vmem:[%s13372_s15 + $0x240] sm:$0xff]  ;;  %v5857_v22 = vld [vmem:[%s13372_s15 + $0x248] sm:$0xff] }
0x1188   : > { %7200 = vmatprep.subr.bf16.mxu0 %v8777_v4  ;;  %7247 = vmatprep.subr.bf16.mxu1 %v8779_v32  ;;  %v8813_v4 = vcombine.high %v5854_v15, %v5870_v8  ;;  %v8815_v32 = vcombine.high %v5855_v30, %v5871_v43  ;;  %v5872_v33 = vld [vmem:[%s13372_s15 + $0x2c0] sm:$0xff]  ;;  %v5873_v45 = vld [vmem:[%s13372_s15 + $0x2c8] sm:$0xff] }
0x1189   : > { %7144 = vmatprep.mubr.bf16.mxu0 %v13459_v7  ;;  %7191 = vmatprep.mubr.bf16.mxu1 %v13459_v7 }
0x118b   : > { %7201 = vmatpush1.bf16.msra.mxu0 %v8776_v44  ;;  %7248 = vmatpush1.bf16.msra.mxu1 %v8778_v49  ;;  %v8812_v44 = vcombine.low %v5854_v15, %v5870_v8  ;;  %v8814_v49 = vcombine.low %v5855_v30, %v5871_v43  ;;  %v5888_v15 = vld [vmem:[%s13372_s15 + $0x340] sm:$0xff]  ;;  %v5889_v30 = vld [vmem:[%s13372_s15 + $0x348] sm:$0xff] }
0x118c   : > { %7202 = vmatprep.subr.bf16.mxu0 %v8809_v34  ;;  %7249 = vmatprep.subr.bf16.mxu1 %v8811_v59  ;;  %v5918_v34 = vld [vmem:[%s13372_s15 + $0x430] sm:$0xff]  ;;  %v5904_v8 = vld [vmem:[%s13372_s15 + $0x3c0] sm:$0xff]  ;;  %v5905_v43 = vld [vmem:[%s13372_s15 + $0x3c8] sm:$0xff] }
0x118d   : > { %v5934_v59 = vld [vmem:[%s13372_s15 + $0x4b0] sm:$0xff] }
0x118e   : > { %8933 = vmatmul.mubr.msk.bf16.gmra.mrb[96].mxu0 %vm1733_vm10, %v12638_v29  ;;  %8935 = vmatmul.mubr.msk.bf16.gmra.mrb[104].mxu1 %vm1733_vm10, %v12638_v29  ;;  %v8877_v61 = vcombine.high %v5918_v34, %v5934_v59  ;;  %v8876_v52 = vcombine.low %v5918_v34, %v5934_v59  ;;  %v5953_v34 = vld [vmem:[%s13372_s15 + $0x548] sm:$0xff] }
0x118f   : > { %7203 = vmatpush1.bf16.msra.mxu0 %v8808_v9  ;;  %7250 = vmatpush1.bf16.msra.mxu1 %v8810_v31  ;;  %v5950_v9 = vld [vmem:[%s13372_s15 + $0x530] sm:$0xff]  ;;  %v5969_v59 = vld [vmem:[%s13372_s15 + $0x5c8] sm:$0xff] }
0x1190   : > { %7204 = vmatprep.subr.bf16.mxu0 %v8841_v37  ;;  %7251 = vmatprep.subr.bf16.mxu1 %v8843_v23  ;;  %v5966_v31 = vld [vmem:[%s13372_s15 + $0x5b0] sm:$0xff]  ;;  %v8844_v37 = vcombine.low %v5886_v62, %v5902_v42  ;;  %v8846_v23 = vcombine.low %v5887_v20, %v5903_v54  ;;  %v8849_v62 = vcombine.high %v5888_v15, %v5904_v8  ;;  %v5921_v20 = vld [vmem:[%s13372_s15 + $0x448] sm:$0xff] }
0x1191   : > { %7230 = vmatprep.mubr.bf16.mxu0 %v13459_v7  ;;  %7277 = vmatprep.mubr.bf16.mxu1 %v13459_v7  ;;  %v8909_v17 = vcombine.high %v5950_v9, %v5966_v31  ;;  %v8851_v42 = vcombine.high %v5889_v30, %v5905_v43  ;;  %v5937_v54 = vld [vmem:[%s13372_s15 + $0x4c8] sm:$0xff] }
0x1192   : > { %v8883_v18 = vcombine.high %v5921_v20, %v5937_v54 }
0x1193   : > { %7205 = vmatpush1.bf16.msra.mxu0 %v8840_v12  ;;  %7252 = vmatpush1.bf16.msra.mxu1 %v8842_v39  ;;  %v8908_v12 = vcombine.low %v5950_v9, %v5966_v31  ;;  %v8910_v39 = vcombine.low %v5951_v27, %v5967_v46  ;;  %v8915_v31 = vcombine.high %v5953_v34, %v5969_v59 }
0x1194   : > { %7206 = vmatprep.subr.bf16.mxu0 %v8873_v21  ;;  %7253 = vmatprep.subr.bf16.mxu1 %v8875_v41  ;;  %v6954_v21 = vand.u32 %v8909_v17, %v12578_v0  ;;  %v6960_v41 = vand.u32 %v8911_v1, %v12578_v0  ;;  %v8882_v46 = vcombine.low %v5921_v20, %v5937_v54  ;;  %v5794_v17 = vld [vmem:[%s13372_s15 + $0x50] sm:$0xff] }
0x1195   : > { %v6951_v26 = vand.u32 %v8908_v12, %v12578_v0  ;;  %v6957_v28 = vand.u32 %v8910_v39, %v12578_v0  ;;  %v5810_v1 = vld [vmem:[%s13372_s15 + $0xd0] sm:$0xff] }
0x1197   : > { %7207 = vmatpush1.bf16.msra.mxu0 %v8872_v11  ;;  %7254 = vmatpush1.bf16.msra.mxu1 %v8874_v2  ;;  %v5793_v11 = vld [vmem:[%s13372_s15 + $0x48] sm:$0xff] }
0x1198   : > { %7208 = vmatprep.subr.bf16.mxu0 %v6942_v19  ;;  %7255 = vmatprep.subr.bf16.mxu1 %v6948_v5  ;;  %v5809_v2 = vld [vmem:[%s13372_s15 + $0xc8] sm:$0xff]  ;;  %v8753_v19 = vcombine.high %v5792_v50, %v5808_v24 }
0x1199   : > { %v8755_v5 = vcombine.high %v5793_v11, %v5809_v2 }
0x119b   : > { %7209 = vmatpush1.bf16.msra.mxu0 %v6939_v60  ;;  %7256 = vmatpush1.bf16.msra.mxu1 %v6945_v36  ;;  %v8752_v60 = vcombine.low %v5792_v50, %v5808_v24  ;;  %v8754_v36 = vcombine.low %v5793_v11, %v5809_v2  ;;  %v5826_v50 = vld [vmem:[%s13372_s15 + $0x150] sm:$0xff]  ;;  %v5827_v11 = vld [vmem:[%s13372_s15 + $0x158] sm:$0xff] }
0x119c   : > { %7292 = vmatprep.subr.bf16.mxu0 %v8749_v57  ;;  %7339 = vmatprep.subr.bf16.mxu1 %v8751_v38  ;;  %v8785_v57 = vcombine.high %v5824_v48, %v5840_v14  ;;  %v8787_v38 = vcombine.high %v5825_v56, %v5841_v10  ;;  %v5842_v24 = vld [vmem:[%s13372_s15 + $0x1d0] sm:$0xff]  ;;  %v5843_v2 = vld [vmem:[%s13372_s15 + $0x1d8] sm:$0xff] }
0x119e   : > { %8936 = vmatmul.mubr.msk.bf16.vlgmr.msra.gmra.mrb[100].mxu0 %vm1733_vm10, %v12636_v40  ;;  %8938 = vmatmul.mubr.msk.bf16.vlgmr.msra.gmra.mrb[108].mxu1 %vm1733_vm10, %v12636_v40 }
0x119f   : > { %7293 = vmatpush1.bf16.msra.mxu0 %v8748_v16  ;;  %7340 = vmatpush1.bf16.msra.mxu1 %v8750_v3  ;;  %v8784_v16 = vcombine.low %v5824_v48, %v5840_v14  ;;  %v8786_v3 = vcombine.low %v5825_v56, %v5841_v10  ;;  %v5858_v48 = vld [vmem:[%s13372_s15 + $0x250] sm:$0xff]  ;;  %v5859_v56 = vld [vmem:[%s13372_s15 + $0x258] sm:$0xff] }
0x11a0   : > { %7294 = vmatprep.subr.bf16.mxu0 %v8781_v47  ;;  %7341 = vmatprep.subr.bf16.mxu1 %v8783_v6  ;;  %v8817_v47 = vcombine.high %v5856_v58, %v5872_v33  ;;  %v8819_v6 = vcombine.high %v5857_v22, %v5873_v45  ;;  %v5874_v14 = vld [vmem:[%s13372_s15 + $0x2d0] sm:$0xff]  ;;  %v5875_v10 = vld [vmem:[%s13372_s15 + $0x2d8] sm:$0xff] }
0x11a1   : > { %7238 = vmatprep.mubr.bf16.mxu0 %v13459_v7  ;;  %7285 = vmatprep.mubr.bf16.mxu1 %v13459_v7 }
0x11a3   : > { %7295 = vmatpush1.bf16.msra.mxu0 %v8780_v63  ;;  %7342 = vmatpush1.bf16.msra.mxu1 %v8782_v53  ;;  %v8816_v63 = vcombine.low %v5856_v58, %v5872_v33  ;;  %v8818_v53 = vcombine.low %v5857_v22, %v5873_v45  ;;  %v5890_v58 = vld [vmem:[%s13372_s15 + $0x350] sm:$0xff]  ;;  %v5891_v22 = vld [vmem:[%s13372_s15 + $0x358] sm:$0xff] }
0x11a4   : > { %7296 = vmatprep.subr.bf16.mxu0 %v8813_v4  ;;  %7343 = vmatprep.subr.bf16.mxu1 %v8815_v32  ;;  %v5920_v4 = vld [vmem:[%s13372_s15 + $0x440] sm:$0xff]  ;;  %v5906_v33 = vld [vmem:[%s13372_s15 + $0x3d0] sm:$0xff]  ;;  %v5907_v45 = vld [vmem:[%s13372_s15 + $0x3d8] sm:$0xff] }
0x11a5   : > { %v5936_v32 = vld [vmem:[%s13372_s15 + $0x4c0] sm:$0xff] }
0x11a6   : > { %8937 = vmatmul.mubr.msk.bf16.gmra.mrb[104].mxu0 %vm1733_vm10, %v12638_v29  ;;  %8939 = vmatmul.mubr.msk.bf16.gmra.mrb[112].mxu1 %vm1733_vm10, %v12638_v29  ;;  %v8881_v51 = vcombine.high %v5920_v4, %v5936_v32  ;;  %v8880_v27 = vcombine.low %v5920_v4, %v5936_v32  ;;  %v5955_v4 = vld [vmem:[%s13372_s15 + $0x558] sm:$0xff] }
0x11a7   : > { %7297 = vmatpush1.bf16.msra.mxu0 %v8812_v44  ;;  %7344 = vmatpush1.bf16.msra.mxu1 %v8814_v49  ;;  %v5952_v44 = vld [vmem:[%s13372_s15 + $0x540] sm:$0xff]  ;;  %v5971_v32 = vld [vmem:[%s13372_s15 + $0x5d8] sm:$0xff] }
0x11a8   : > { %7298 = vmatprep.subr.bf16.mxu0 %v8845_v55  ;;  %7345 = vmatprep.subr.bf16.mxu1 %v8847_v25  ;;  %v5968_v49 = vld [vmem:[%s13372_s15 + $0x5c0] sm:$0xff]  ;;  %v8848_v55 = vcombine.low %v5888_v15, %v5904_v8  ;;  %v8850_v25 = vcombine.low %v5889_v30, %v5905_v43  ;;  %v8853_v15 = vcombine.high %v5890_v58, %v5906_v33  ;;  %v5923_v30 = vld [vmem:[%s13372_s15 + $0x458] sm:$0xff] }
0x11a9   : > { %7324 = vmatprep.mubr.bf16.mxu0 %v13459_v7  ;;  %7371 = vmatprep.mubr.bf16.mxu1 %v13459_v7  ;;  %v8913_v9 = vcombine.high %v5952_v44, %v5968_v49  ;;  %v8855_v8 = vcombine.high %v5891_v22, %v5907_v45  ;;  %v5939_v43 = vld [vmem:[%s13372_s15 + $0x4d8] sm:$0xff] }
0x11aa   : > { %v8887_v54 = vcombine.high %v5923_v30, %v5939_v43 }
0x11ab   : > { %7299 = vmatpush1.bf16.msra.mxu0 %v8844_v37  ;;  %7346 = vmatpush1.bf16.msra.mxu1 %v8846_v23  ;;  %v8912_v37 = vcombine.low %v5952_v44, %v5968_v49  ;;  %v8914_v23 = vcombine.low %v5953_v34, %v5969_v59  ;;  %v8919_v49 = vcombine.high %v5955_v4, %v5971_v32 }
0x11ac   : > { %7300 = vmatprep.subr.bf16.mxu0 %v8877_v61  ;;  %7347 = vmatprep.subr.bf16.mxu1 %v8879_v35  ;;  %v6966_v61 = vand.u32 %v8913_v9, %v12578_v0  ;;  %v6972_v35 = vand.u32 %v8915_v31, %v12578_v0  ;;  %v8886_v59 = vcombine.low %v5923_v30, %v5939_v43  ;;  %v5796_v9 = vld [vmem:[%s13372_s15 + $0x60] sm:$0xff] }
0x11ad   : > { %v6963_v12 = vand.u32 %v8912_v37, %v12578_v0  ;;  %v6969_v39 = vand.u32 %v8914_v23, %v12578_v0  ;;  %v5812_v31 = vld [vmem:[%s13372_s15 + $0xe0] sm:$0xff] }
0x11af   : > { %7301 = vmatpush1.bf16.msra.mxu0 %v8876_v52  ;;  %7348 = vmatpush1.bf16.msra.mxu1 %v8878_v13  ;;  %v5795_v52 = vld [vmem:[%s13372_s15 + $0x58] sm:$0xff] }
0x11b0   : > { %7302 = vmatprep.subr.bf16.mxu0 %v6954_v21  ;;  %7349 = vmatprep.subr.bf16.mxu1 %v6960_v41  ;;  %v5811_v13 = vld [vmem:[%s13372_s15 + $0xd8] sm:$0xff]  ;;  %v8757_v21 = vcombine.high %v5794_v17, %v5810_v1 }
0x11b1   : > { %v8759_v41 = vcombine.high %v5795_v52, %v5811_v13 }
0x11b3   : > { %7303 = vmatpush1.bf16.msra.mxu0 %v6951_v26  ;;  %7350 = vmatpush1.bf16.msra.mxu1 %v6957_v28  ;;  %v8756_v26 = vcombine.low %v5794_v17, %v5810_v1  ;;  %v8758_v28 = vcombine.low %v5795_v52, %v5811_v13  ;;  %v5828_v17 = vld [vmem:[%s13372_s15 + $0x160] sm:$0xff]  ;;  %v5829_v52 = vld [vmem:[%s13372_s15 + $0x168] sm:$0xff] }
0x11b4   : > { %7386 = vmatprep.subr.bf16.mxu0 %v8753_v19  ;;  %7433 = vmatprep.subr.bf16.mxu1 %v8755_v5  ;;  %v8789_v19 = vcombine.high %v5826_v50, %v5842_v24  ;;  %v8791_v5 = vcombine.high %v5827_v11, %v5843_v2  ;;  %v5844_v1 = vld [vmem:[%s13372_s15 + $0x1e0] sm:$0xff]  ;;  %v5845_v13 = vld [vmem:[%s13372_s15 + $0x1e8] sm:$0xff] }
0x11b6   : > { %8940 = vmatmul.mubr.msk.bf16.vlgmr.msra.gmra.mrb[108].mxu0 %vm1733_vm10, %v12636_v40  ;;  %8942 = vmatmul.mubr.msk.bf16.vlgmr.msra.gmra.mrb[116].mxu1 %vm1733_vm10, %v12636_v40 }
0x11b7   : > { %7387 = vmatpush1.bf16.msra.mxu0 %v8752_v60  ;;  %7434 = vmatpush1.bf16.msra.mxu1 %v8754_v36  ;;  %v8788_v60 = vcombine.low %v5826_v50, %v5842_v24  ;;  %v8790_v36 = vcombine.low %v5827_v11, %v5843_v2  ;;  %v5860_v50 = vld [vmem:[%s13372_s15 + $0x260] sm:$0xff]  ;;  %v5861_v11 = vld [vmem:[%s13372_s15 + $0x268] sm:$0xff] }
0x11b8   : > { %7388 = vmatprep.subr.bf16.mxu0 %v8785_v57  ;;  %7435 = vmatprep.subr.bf16.mxu1 %v8787_v38  ;;  %v8821_v57 = vcombine.high %v5858_v48, %v5874_v14  ;;  %v8823_v38 = vcombine.high %v5859_v56, %v5875_v10  ;;  %v5876_v24 = vld [vmem:[%s13372_s15 + $0x2e0] sm:$0xff]  ;;  %v5877_v2 = vld [vmem:[%s13372_s15 + $0x2e8] sm:$0xff] }
0x11b9   : > { %7332 = vmatprep.mubr.bf16.mxu0 %v13459_v7  ;;  %7379 = vmatprep.mubr.bf16.mxu1 %v13459_v7 }
0x11bb   : > { %7389 = vmatpush1.bf16.msra.mxu0 %v8784_v16  ;;  %7436 = vmatpush1.bf16.msra.mxu1 %v8786_v3  ;;  %v8820_v16 = vcombine.low %v5858_v48, %v5874_v14  ;;  %v8822_v3 = vcombine.low %v5859_v56, %v5875_v10  ;;  %v5892_v48 = vld [vmem:[%s13372_s15 + $0x360] sm:$0xff]  ;;  %v5893_v56 = vld [vmem:[%s13372_s15 + $0x368] sm:$0xff] }
0x11bc   : > { %7390 = vmatprep.subr.bf16.mxu0 %v8817_v47  ;;  %7437 = vmatprep.subr.bf16.mxu1 %v8819_v6  ;;  %v5922_v47 = vld [vmem:[%s13372_s15 + $0x450] sm:$0xff]  ;;  %v5908_v14 = vld [vmem:[%s13372_s15 + $0x3e0] sm:$0xff]  ;;  %v5909_v10 = vld [vmem:[%s13372_s15 + $0x3e8] sm:$0xff] }
0x11bd   : > { %v5938_v6 = vld [vmem:[%s13372_s15 + $0x4d0] sm:$0xff] }
0x11be   : > { %8941 = vmatmul.mubr.msk.bf16.gmra.mrb[112].mxu0 %vm1733_vm10, %v12638_v29  ;;  %8943 = vmatmul.mubr.msk.bf16.gmra.mrb[120].mxu1 %vm1733_vm10, %v12638_v29  ;;  %v8885_v20 = vcombine.high %v5922_v47, %v5938_v6  ;;  %v8884_v34 = vcombine.low %v5922_v47, %v5938_v6  ;;  %v5957_v47 = vld [vmem:[%s13372_s15 + $0x568] sm:$0xff] }
0x11bf   : > { %7391 = vmatpush1.bf16.msra.mxu0 %v8816_v63  ;;  %7438 = vmatpush1.bf16.msra.mxu1 %v8818_v53  ;;  %v5954_v63 = vld [vmem:[%s13372_s15 + $0x550] sm:$0xff]  ;;  %v5973_v6 = vld [vmem:[%s13372_s15 + $0x5e8] sm:$0xff] }
0x11c0   : > { %7392 = vmatprep.subr.bf16.mxu0 %v8849_v62  ;;  %7439 = vmatprep.subr.bf16.mxu1 %v8851_v42  ;;  %v5970_v53 = vld [vmem:[%s13372_s15 + $0x5d0] sm:$0xff]  ;;  %v8852_v62 = vcombine.low %v5890_v58, %v5906_v33  ;;  %v8854_v42 = vcombine.low %v5891_v22, %v5907_v45  ;;  %v8857_v58 = vcombine.high %v5892_v48, %v5908_v14  ;;  %v5925_v22 = vld [vmem:[%s13372_s15 + $0x468] sm:$0xff] }
0x11c1   : > { %7418 = vmatprep.mubr.bf16.mxu0 %v13459_v7  ;;  %7465 = vmatprep.mubr.bf16.mxu1 %v13459_v7  ;;  %v8917_v44 = vcombine.high %v5954_v63, %v5970_v53  ;;  %v8859_v33 = vcombine.high %v5893_v56, %v5909_v10  ;;  %v5941_v45 = vld [vmem:[%s13372_s15 + $0x4e8] sm:$0xff] }
0x11c2   : > { %v8891_v43 = vcombine.high %v5925_v22, %v5941_v45 }
0x11c3   : > { %7393 = vmatpush1.bf16.msra.mxu0 %v8848_v55  ;;  %7440 = vmatpush1.bf16.msra.mxu1 %v8850_v25  ;;  %v8916_v55 = vcombine.low %v5954_v63, %v5970_v53  ;;  %v8918_v25 = vcombine.low %v5955_v4, %v5971_v32  ;;  %v8923_v53 = vcombine.high %v5957_v47, %v5973_v6 }
0x11c4   : > { %7394 = vmatprep.subr.bf16.mxu0 %v8881_v51  ;;  %7441 = vmatprep.subr.bf16.mxu1 %v8883_v18  ;;  %v6978_v51 = vand.u32 %v8917_v44, %v12578_v0  ;;  %v6984_v18 = vand.u32 %v8919_v49, %v12578_v0  ;;  %v8890_v32 = vcombine.low %v5925_v22, %v5941_v45  ;;  %v5798_v44 = vld [vmem:[%s13372_s15 + $0x70] sm:$0xff] }
0x11c5   : > { %v6975_v37 = vand.u32 %v8916_v55, %v12578_v0  ;;  %v6981_v23 = vand.u32 %v8918_v25, %v12578_v0  ;;  %v5814_v49 = vld [vmem:[%s13372_s15 + $0xf0] sm:$0xff] }
0x11c7   : > { %7395 = vmatpush1.bf16.msra.mxu0 %v8880_v27  ;;  %7442 = vmatpush1.bf16.msra.mxu1 %v8882_v46  ;;  %v5797_v27 = vld [vmem:[%s13372_s15 + $0x68] sm:$0xff] }
0x11c8   : > { %7396 = vmatprep.subr.bf16.mxu0 %v6966_v61  ;;  %7443 = vmatprep.subr.bf16.mxu1 %v6972_v35  ;;  %v5813_v46 = vld [vmem:[%s13372_s15 + $0xe8] sm:$0xff]  ;;  %v8761_v61 = vcombine.high %v5796_v9, %v5812_v31 }
0x11c9   : > { %v8763_v35 = vcombine.high %v5797_v27, %v5813_v46 }
0x11cb   : > { %7397 = vmatpush1.bf16.msra.mxu0 %v6963_v12  ;;  %7444 = vmatpush1.bf16.msra.mxu1 %v6969_v39  ;;  %v8760_v12 = vcombine.low %v5796_v9, %v5812_v31  ;;  %v8762_v39 = vcombine.low %v5797_v27, %v5813_v46  ;;  %v5830_v9 = vld [vmem:[%s13372_s15 + $0x170] sm:$0xff]  ;;  %v5831_v27 = vld [vmem:[%s13372_s15 + $0x178] sm:$0xff] }
0x11cc   : > { %7480 = vmatprep.subr.bf16.mxu0 %v8757_v21  ;;  %7527 = vmatprep.subr.bf16.mxu1 %v8759_v41  ;;  %v8793_v21 = vcombine.high %v5828_v17, %v5844_v1  ;;  %v8795_v41 = vcombine.high %v5829_v52, %v5845_v13  ;;  %v5846_v31 = vld [vmem:[%s13372_s15 + $0x1f0] sm:$0xff]  ;;  %v5847_v46 = vld [vmem:[%s13372_s15 + $0x1f8] sm:$0xff] }
0x11ce   : > { %8944 = vmatmul.mubr.msk.bf16.vlgmr.msra.gmra.mrb[116].mxu0 %vm1733_vm10, %v12636_v40  ;;  %8946 = vmatmul.mubr.msk.bf16.vlgmr.msra.gmra.mrb[124].mxu1 %vm1733_vm10, %v12636_v40 }
0x11cf   : > { %7481 = vmatpush1.bf16.msra.mxu0 %v8756_v26  ;;  %7528 = vmatpush1.bf16.msra.mxu1 %v8758_v28  ;;  %v8792_v26 = vcombine.low %v5828_v17, %v5844_v1  ;;  %v8794_v28 = vcombine.low %v5829_v52, %v5845_v13  ;;  %v5862_v17 = vld [vmem:[%s13372_s15 + $0x270] sm:$0xff]  ;;  %v5863_v52 = vld [vmem:[%s13372_s15 + $0x278] sm:$0xff] }
0x11d0   : > { %7482 = vmatprep.subr.bf16.mxu0 %v8789_v19  ;;  %7529 = vmatprep.subr.bf16.mxu1 %v8791_v5  ;;  %v8825_v19 = vcombine.high %v5860_v50, %v5876_v24  ;;  %v8827_v5 = vcombine.high %v5861_v11, %v5877_v2  ;;  %v5878_v1 = vld [vmem:[%s13372_s15 + $0x2f0] sm:$0xff]  ;;  %v5879_v13 = vld [vmem:[%s13372_s15 + $0x2f8] sm:$0xff] }
0x11d1   : > { %7424 = vmatprep.mubr.bf16.mxu0 %v13459_v7  ;;  %7471 = vmatprep.mubr.bf16.mxu1 %v13459_v7 }
0x11d3   : > { %7483 = vmatpush1.bf16.msra.mxu0 %v8788_v60  ;;  %7530 = vmatpush1.bf16.msra.mxu1 %v8790_v36  ;;  %v8824_v60 = vcombine.low %v5860_v50, %v5876_v24  ;;  %v8826_v36 = vcombine.low %v5861_v11, %v5877_v2  ;;  %v5894_v50 = vld [vmem:[%s13372_s15 + $0x370] sm:$0xff]  ;;  %v5895_v11 = vld [vmem:[%s13372_s15 + $0x378] sm:$0xff] }
0x11d4   : > { %7484 = vmatprep.subr.bf16.mxu0 %v8821_v57  ;;  %7531 = vmatprep.subr.bf16.mxu1 %v8823_v38  ;;  %v5924_v57 = vld [vmem:[%s13372_s15 + $0x460] sm:$0xff]  ;;  %v5910_v24 = vld [vmem:[%s13372_s15 + $0x3f0] sm:$0xff]  ;;  %v5911_v2 = vld [vmem:[%s13372_s15 + $0x3f8] sm:$0xff] }
0x11d5   : > { %v5940_v38 = vld [vmem:[%s13372_s15 + $0x4e0] sm:$0xff] }
0x11d6   : > { %8945 = vmatmul.mubr.msk.bf16.gmra.mrb[120].mxu0 %vm1733_vm10, %v12638_v29  ;;  %8947 = vmatmul.mubr.msk.bf16.gmra.mrb[128].mxu1 %vm1733_vm10, %v12638_v29  ;;  %v8889_v30 = vcombine.high %v5924_v57, %v5940_v38  ;;  %v8888_v4 = vcombine.low %v5924_v57, %v5940_v38  ;;  %v5959_v57 = vld [vmem:[%s13372_s15 + $0x578] sm:$0xff] }
0x11d7   : > { %7485 = vmatpush1.bf16.msra.mxu0 %v8820_v16  ;;  %7532 = vmatpush1.bf16.msra.mxu1 %v8822_v3  ;;  %v5956_v16 = vld [vmem:[%s13372_s15 + $0x560] sm:$0xff]  ;;  %v5975_v38 = vld [vmem:[%s13372_s15 + $0x5f8] sm:$0xff] }
0x11d8   : > { %7486 = vmatprep.subr.bf16.mxu0 %v8853_v15  ;;  %7533 = vmatprep.subr.bf16.mxu1 %v8855_v8  ;;  %v5972_v3 = vld [vmem:[%s13372_s15 + $0x5e0] sm:$0xff]  ;;  %v8856_v15 = vcombine.low %v5892_v48, %v5908_v14  ;;  %v8858_v8 = vcombine.low %v5893_v56, %v5909_v10  ;;  %v8861_v48 = vcombine.high %v5894_v50, %v5910_v24  ;;  %v5927_v56 = vld [vmem:[%s13372_s15 + $0x478] sm:$0xff] }
0x11d9   : > { %7512 = vmatprep.mubr.bf16.mxu0 %v13459_v7  ;;  %7559 = vmatprep.mubr.bf16.mxu1 %v13459_v7  ;;  %v8921_v63 = vcombine.high %v5956_v16, %v5972_v3  ;;  %v8863_v14 = vcombine.high %v5895_v11, %v5911_v2  ;;  %v5943_v10 = vld [vmem:[%s13372_s15 + $0x4f8] sm:$0xff] }
0x11da   : > { %v8895_v45 = vcombine.high %v5927_v56, %v5943_v10 }
0x11db   : > { %7487 = vmatpush1.bf16.msra.mxu0 %v8852_v62  ;;  %7534 = vmatpush1.bf16.msra.mxu1 %v8854_v42  ;;  %v8920_v62 = vcombine.low %v5956_v16, %v5972_v3  ;;  %v8922_v42 = vcombine.low %v5957_v47, %v5973_v6  ;;  %v8927_v3 = vcombine.high %v5959_v57, %v5975_v38 }
0x11dc   : > { %7488 = vmatprep.subr.bf16.mxu0 %v8885_v20  ;;  %7535 = vmatprep.subr.bf16.mxu1 %v8887_v54  ;;  %v6990_v20 = vand.u32 %v8921_v63, %v12578_v0  ;;  %v6996_v54 = vand.u32 %v8923_v53, %v12578_v0  ;;  %v8894_v6 = vcombine.low %v5927_v56, %v5943_v10 }
0x11dd   : > { %v6987_v55 = vand.u32 %v8920_v62, %v12578_v0  ;;  %v6993_v25 = vand.u32 %v8922_v42, %v12578_v0  ;;  %v13464_v62 = vld [vmem:[#allocation8_spill] sm:$0xff] }
0x11df   : > { %7489 = vmatpush1.bf16.msra.mxu0 %v8884_v34  ;;  %7536 = vmatpush1.bf16.msra.mxu1 %v8886_v59  ;;  %v5799_v34 = vld [vmem:[%s13372_s15 + $0x78] sm:$0xff] }
0x11e0   : > { %7490 = vmatprep.subr.bf16.mxu0 %v6978_v51  ;;  %7537 = vmatprep.subr.bf16.mxu1 %v6984_v18  ;;  %v5815_v59 = vld [vmem:[%s13372_s15 + $0xf8] sm:$0xff]  ;;  %v8765_v51 = vcombine.high %v5798_v44, %v5814_v49 }
0x11e1   : > { %v8767_v18 = vcombine.high %v5799_v34, %v5815_v59 }
0x11e3   : > { %7491 = vmatpush1.bf16.msra.mxu0 %v6975_v37  ;;  %7538 = vmatpush1.bf16.msra.mxu1 %v6981_v23  ;;  %v8764_v37 = vcombine.low %v5798_v44, %v5814_v49  ;;  %v8766_v23 = vcombine.low %v5799_v34, %v5815_v59 }
0x11e4   : > { %7574 = vmatprep.subr.bf16.mxu0 %v8761_v61  ;;  %7621 = vmatprep.subr.bf16.mxu1 %v8763_v35  ;;  %v8797_v61 = vcombine.high %v5830_v9, %v5846_v31  ;;  %v8799_v35 = vcombine.high %v5831_v27, %v5847_v46 }
0x11e6   : > { %8948 = vmatmul.mubr.msk.bf16.vlgmr.msra.gmra.mrb[124].mxu0 %vm1733_vm10, %v12636_v40  ;;  %8950 = vmatmul.mubr.msk.bf16.vlgmr.msra.gmra.mrb[132].mxu1 %vm1733_vm10, %v12636_v40 }
0x11e7   : > { %7575 = vmatpush1.bf16.msra.mxu0 %v8760_v12  ;;  %7622 = vmatpush1.bf16.msra.mxu1 %v8762_v39  ;;  %v8796_v12 = vcombine.low %v5830_v9, %v5846_v31  ;;  %v8798_v39 = vcombine.low %v5831_v27, %v5847_v46 }
0x11e8   : > { %7576 = vmatprep.subr.bf16.mxu0 %v8793_v21  ;;  %7623 = vmatprep.subr.bf16.mxu1 %v8795_v41  ;;  %v8829_v21 = vcombine.high %v5862_v17, %v5878_v1  ;;  %v8831_v41 = vcombine.high %v5863_v52, %v5879_v13 }
0x11e9   : > { %7518 = vmatprep.mubr.bf16.mxu0 %v13459_v7  ;;  %7565 = vmatprep.mubr.bf16.mxu1 %v13459_v7 }
0x11eb   : > { %7577 = vmatpush1.bf16.msra.mxu0 %v8792_v26  ;;  %7624 = vmatpush1.bf16.msra.mxu1 %v8794_v28  ;;  %v8828_v26 = vcombine.low %v5862_v17, %v5878_v1  ;;  %v8830_v28 = vcombine.low %v5863_v52, %v5879_v13 }
0x11ec   : > { %7578 = vmatprep.subr.bf16.mxu0 %v8825_v19  ;;  %7625 = vmatprep.subr.bf16.mxu1 %v8827_v5  ;;  %v5926_v19 = vld [vmem:[%s13372_s15 + $0x470] sm:$0xff] }
0x11ed   : > { %v5942_v5 = vld [vmem:[%s13372_s15 + $0x4f0] sm:$0xff] }
0x11ee   : > { %8949 = vmatmul.mubr.msk.bf16.gmra.mrb[128].mxu0 %vm1733_vm10, %v12638_v29  ;;  %8951 = vmatmul.mubr.msk.bf16.gmra.mrb[136].mxu1 %vm1733_vm10, %v12638_v29  ;;  %v8893_v22 = vcombine.high %v5926_v19, %v5942_v5  ;;  %v8892_v47 = vcombine.low %v5926_v19, %v5942_v5 }
0x11ef   : > { %7579 = vmatpush1.bf16.msra.mxu0 %v8824_v60  ;;  %7626 = vmatpush1.bf16.msra.mxu1 %v8826_v36  ;;  %v5958_v60 = vld [vmem:[%s13372_s15 + $0x570] sm:$0xff] }
0x11f0   : > { %7580 = vmatprep.subr.bf16.mxu0 %v8857_v58  ;;  %7627 = vmatprep.subr.bf16.mxu1 %v8859_v33  ;;  %v5974_v36 = vld [vmem:[%s13372_s15 + $0x5f0] sm:$0xff]  ;;  %v8860_v58 = vcombine.low %v5894_v50, %v5910_v24  ;;  %v8862_v33 = vcombine.low %v5895_v11, %v5911_v2 }
0x11f1   : > { %7606 = vmatprep.mubr.bf16.mxu0 %v13459_v7  ;;  %7653 = vmatprep.mubr.bf16.mxu1 %v13459_v7  ;;  %v8925_v16 = vcombine.high %v5958_v60, %v5974_v36 }
0x11f3   : > { %7581 = vmatpush1.bf16.msra.mxu0 %v8856_v15  ;;  %7628 = vmatpush1.bf16.msra.mxu1 %v8858_v8  ;;  %v8924_v15 = vcombine.low %v5958_v60, %v5974_v36  ;;  %v8926_v8 = vcombine.low %v5959_v57, %v5975_v38 }
0x11f4   : > { %7582 = vmatprep.subr.bf16.mxu0 %v8889_v30  ;;  %7629 = vmatprep.subr.bf16.mxu1 %v8891_v43  ;;  %v7002_v30 = vand.u32 %v8925_v16, %v12578_v0  ;;  %v7008_v43 = vand.u32 %v8927_v3, %v12578_v0 }
0x11f5   : > { %v6999_v63 = vand.u32 %v8924_v15, %v12578_v0  ;;  %v7005_v53 = vand.u32 %v8926_v8, %v12578_v0  ;;  %v10514_v0 = vmov 1966171168  }
0x11f7   : > { %7583 = vmatpush1.bf16.msra.mxu0 %v8888_v4  ;;  %7630 = vmatpush1.bf16.msra.mxu1 %v8890_v32  ;;  %v7766_v4 = vunpack.c.l.s4 %v10514_v0 }
0x11f8   : > { %7584 = vmatprep.subr.bf16.mxu0 %v6990_v20  ;;  %7631 = vmatprep.subr.bf16.mxu1 %v6996_v54 }
0x11f9   : > { %v7767_v32 = vunpack.c.0.s8 %v7766_v4 }
0x11fb   : > { %7585 = vmatpush1.bf16.msra.mxu0 %v6987_v55  ;;  %7632 = vmatpush1.bf16.msra.mxu1 %v6993_v25  ;;  %v13249_v42 = vsub.s32 %v7767_v32, %v13464_v62 }
0x11fc   : > { %7668 = vmatprep.subr.bf16.mxu0 %v8765_v51  ;;  %7715 = vmatprep.subr.bf16.mxu1 %v8767_v18 }
0x11fe   : > { %8952 = vmatmul.mubr.msk.bf16.vlgmr.msra.gmra.mrb[132].mxu0 %vm1733_vm10, %v12636_v40  ;;  %8954 = vmatmul.mubr.msk.bf16.vlgmr.msra.gmra.mrb[140].mxu1 %vm1733_vm10, %v12636_v40 }
0x11ff   : > { %7669 = vmatpush1.bf16.msra.mxu0 %v8764_v37  ;;  %7716 = vmatpush1.bf16.msra.mxu1 %v8766_v23 }
0x1200   : > { %7670 = vmatprep.subr.bf16.mxu0 %v8797_v61  ;;  %7717 = vmatprep.subr.bf16.mxu1 %v8799_v35 }
0x1201   : > { %7612 = vmatprep.mubr.bf16.mxu0 %v13459_v7  ;;  %7659 = vmatprep.mubr.bf16.mxu1 %v13459_v7 }
0x1203   : > { %7671 = vmatpush1.bf16.msra.mxu0 %v8796_v12  ;;  %7718 = vmatpush1.bf16.msra.mxu1 %v8798_v39 }
0x1204   : > { %7672 = vmatprep.subr.bf16.mxu0 %v8829_v21  ;;  %7719 = vmatprep.subr.bf16.mxu1 %v8831_v41 }
0x1206   : > { %8953 = vmatmul.mubr.msk.bf16.gmra.mrb[136].mxu0 %vm1733_vm10, %v12638_v29  ;;  %8955 = vmatmul.mubr.msk.bf16.gmra.mrb[144].mxu1 %vm1733_vm10, %v12638_v29 }
0x1207   : > { %7673 = vmatpush1.bf16.msra.mxu0 %v8828_v26  ;;  %7720 = vmatpush1.bf16.msra.mxu1 %v8830_v28 }
0x1208   : > { %7674 = vmatprep.subr.bf16.mxu0 %v8861_v48  ;;  %7721 = vmatprep.subr.bf16.mxu1 %v8863_v14 }
0x1209   : > { %7700 = vmatprep.mubr.bf16.mxu0 %v13459_v7  ;;  %7747 = vmatprep.mubr.bf16.mxu1 %v13459_v7 }
0x120b   : > { %7675 = vmatpush1.bf16.msra.mxu0 %v8860_v58  ;;  %7722 = vmatpush1.bf16.msra.mxu1 %v8862_v33 }
0x120c   : > { %7676 = vmatprep.subr.bf16.mxu0 %v8893_v22  ;;  %7723 = vmatprep.subr.bf16.mxu1 %v8895_v45 }
0x120f   : > { %7677 = vmatpush1.bf16.msra.mxu0 %v8892_v47  ;;  %7724 = vmatpush1.bf16.msra.mxu1 %v8894_v6 }
0x1210   : > { %7678 = vmatprep.subr.bf16.mxu0 %v7002_v30  ;;  %7725 = vmatprep.subr.bf16.mxu1 %v7008_v43 }
0x1213   : > { %7679 = vmatpush1.bf16.msra.mxu0 %v6999_v63  ;;  %7726 = vmatpush1.bf16.msra.mxu1 %v7005_v53 }
0x1216   : > { %8956 = vmatmul.mubr.msk.bf16.vlgmr.msra.gmra.mrb[140].mxu0 %vm1733_vm10, %v12636_v40  ;;  %8958 = vmatmul.mubr.msk.bf16.vlgmr.msra.gmra.mrb[148].mxu1 %vm1733_vm10, %v12636_v40 }
0x1217   : > { %7706 = vmatprep.mubr.bf16.mxu0 %v13459_v7  ;;  %7753 = vmatprep.mubr.bf16.mxu1 %v13459_v7 }
0x121e   : > { %8957 = vmatmul.mubr.msk.bf16.gmra.mrb[144].mxu0 %vm1733_vm10, %v12638_v29  ;;  %8959 = vmatmul.mubr.msk.bf16.gmra.mrb[152].mxu1 %vm1733_vm10, %v12638_v29  ;;  %v7762_v29 = vld [vmem:[%s13373_s16] sm:$0x1] }
0x1241   : > { %v7044_v20 = vpop.f32.mrb[84].mxu0  ;;  %v7091_v54 = vpop.f32.mrb[92].mxu1 }
0x1242   : > { %v7789_v40 = vrot.slane %v7091_v54, %v13249_v42  ;;  %v7046_v44 = vpop.f32.mrb[85].mxu0  ;;  %v7093_v49 = vpop.f32.mrb[93].mxu1  ;;  %v7763_v27 = vadd.f32 %v7762_v29, %v7044_v20 }
0x1243   : > { %v7771_v7 = vrot.slane %v7046_v44, %v13249_v42  ;;  %v7807_v34 = vrot.slane %v7093_v49, %v13249_v42  ;;  %v7048_v59 = vpop.f32.mrb[86].mxu0  ;;  %v7095_v55 = vpop.f32.mrb[94].mxu1 }
0x1244   : > { %v7796_v25 = vrot.slane %v7789_v40, %v13249_v42  ;;  %v7049_v51 = vpop.f32.mrb[87].mxu0  ;;  %v7096_v18 = vpop.f32.mrb[95].mxu1 }
0x1245   : > { %v7772_v9 = vcombine.high %v7771_v7, %v7771_v7  ;;  %v7808_v31 = vcombine.high %v7807_v34, %v7807_v34 }
0x1246   : > { %v7797_v23 = vcombine.high %v7796_v25, %v7796_v25 }
0x1247   : > { %v7779_v46 = vrot.slane %v7772_v9, %v13249_v42  ;;  %v7815_v37 = vrot.slane %v7808_v31, %v13249_v42 }
0x1249   : > { %v7781_v61 = vadd.f32 %v7779_v46, %v7763_v27  ;;  %v7052_v35 = vpop.f32.mrb[88].mxu0  ;;  %v7099_v17 = vpop.f32.mrb[96].mxu1  ;;  %v7816_v12 = vcombine.high %v7815_v37, %v7815_v37 }
0x124a   : > { %v7053_v1 = vpop.f32.mrb[89].mxu0  ;;  %v7100_v52 = vpop.f32.mrb[97].mxu1 }
0x124b   : > { %v7799_v13 = vadd.f32 %v7797_v23, %v7781_v61  ;;  %v7054_v39 = vpop.f32.mrb[90].mxu0  ;;  %v7101_v21 = vpop.f32.mrb[98].mxu1 }
0x124c   : > { %v7055_v41 = vpop.f32.mrb[91].mxu0  ;;  %v7102_v50 = vpop.f32.mrb[99].mxu1 }
0x124d   : > { %v7818_v24 = vadd.f32 %v7816_v12, %v7799_v13 }
0x1259   : > { %v7138_v11 = vpop.f32.mrb[92].mxu0  ;;  %v7185_v2 = vpop.f32.mrb[100].mxu1 }
0x125a   : > { %v7820_v26 = vcombine.high %v7138_v11, %v7138_v11  ;;  %v7857_v28 = vcombine.high %v7185_v2, %v7185_v2  ;;  %v7140_v19 = vpop.f32.mrb[93].mxu0  ;;  %v7187_v5 = vpop.f32.mrb[101].mxu1 }
0x125b   : > { %v7838_v48 = vcombine.high %v7140_v19, %v7140_v19  ;;  %v7876_v14 = vcombine.high %v7187_v5, %v7187_v5  ;;  %v7142_v56 = vpop.f32.mrb[94].mxu0  ;;  %v7189_v10 = vpop.f32.mrb[102].mxu1 }
0x125c   : > { %v7827_v60 = vrot.slane %v7820_v26, %v13249_v42  ;;  %v7864_v36 = vrot.slane %v7857_v28, %v13249_v42  ;;  %v7143_v57 = vpop.f32.mrb[95].mxu0  ;;  %v7190_v38 = vpop.f32.mrb[103].mxu1 }
0x125d   : > { %v7845_v58 = vrot.slane %v7838_v48, %v13249_v42  ;;  %v7883_v33 = vrot.slane %v7876_v14, %v13249_v42 }
0x125e   : > { %v7834_v22 = vrot.slane %v7827_v60, %v13249_v42  ;;  %v7871_v45 = vrot.slane %v7864_v36, %v13249_v42 }
0x125f   : > { %v7846_v16 = vcombine.high %v7845_v58, %v7845_v58  ;;  %v7884_v3 = vcombine.high %v7883_v33, %v7883_v33 }
0x1260   : > { %v7836_v47 = vadd.f32 %v7834_v22, %v7818_v24  ;;  %v7872_v53 = vcombine.high %v7871_v45, %v7871_v45 }
0x1261   : > { %v7853_v6 = vrot.slane %v7846_v16, %v13249_v42  ;;  %v7146_v15 = vpop.f32.mrb[96].mxu0  ;;  %v7193_v8 = vpop.f32.mrb[104].mxu1  ;;  %v7891_v30 = vrot.slane %v7884_v3, %v13249_v42 }
0x1262   : > { %v7147_v43 = vpop.f32.mrb[97].mxu0  ;;  %v7194_v63 = vpop.f32.mrb[105].mxu1 }
0x1263   : > { %v7148_v0 = vpop.f32.mrb[98].mxu0  ;;  %v7195_v4 = vpop.f32.mrb[106].mxu1  ;;  %v7855_v32 = vadd.f32 %v7853_v6, %v7836_v47  ;;  %v7892_v40 = vcombine.high %v7891_v30, %v7891_v30 }
0x1264   : > { %v7149_v62 = vpop.f32.mrb[99].mxu0  ;;  %v7196_v20 = vpop.f32.mrb[107].mxu1 }
0x1265   : > { %v7874_v54 = vadd.f32 %v7872_v53, %v7855_v32 }
0x1267   : > { %v7894_v44 = vadd.f32 %v7892_v40, %v7874_v54 }
0x1271   : > { %v7232_v49 = vpop.f32.mrb[100].mxu0  ;;  %v7279_v7 = vpop.f32.mrb[108].mxu1 }
0x1272   : > { %v7233_v34 = vpop.f32.mrb[101].mxu0  ;;  %v7280_v59 = vpop.f32.mrb[109].mxu1 }
0x1273   : > { %v7234_v55 = vpop.f32.mrb[102].mxu0  ;;  %v7281_v29 = vpop.f32.mrb[110].mxu1 }
0x1274   : > { %v7895_v25 = vadd.f32 %v7894_v44, %v7234_v55  ;;  %v7921_v51 = vrot.slane %v7281_v29, %v13249_v42  ;;  %v7236_v18 = vpop.f32.mrb[103].mxu0  ;;  %v7283_v9 = vpop.f32.mrb[111].mxu1 }
0x1275   : > { %v7903_v31 = vrot.slane %v7236_v18, %v13249_v42  ;;  %v7939_v27 = vrot.slane %v7283_v9, %v13249_v42 }
0x1276   : > { %v7928_v46 = vrot.slane %v7921_v51, %v13249_v42 }
0x1277   : > { %v7904_v37 = vcombine.high %v7903_v31, %v7903_v31  ;;  %v7940_v23 = vcombine.high %v7939_v27, %v7939_v27 }
0x1278   : > { %v7929_v12 = vcombine.high %v7928_v46, %v7928_v46 }
0x1279   : > { %v7911_v61 = vrot.slane %v7904_v37, %v13249_v42  ;;  %v7947_v35 = vrot.slane %v7940_v23, %v13249_v42  ;;  %v7240_v17 = vpop.f32.mrb[104].mxu0  ;;  %v7287_v1 = vpop.f32.mrb[112].mxu1 }
0x127a   : > { %v7241_v52 = vpop.f32.mrb[105].mxu0  ;;  %v7288_v13 = vpop.f32.mrb[113].mxu1 }
0x127b   : > { %v7913_v39 = vadd.f32 %v7911_v61, %v7895_v25  ;;  %v7242_v21 = vpop.f32.mrb[106].mxu0  ;;  %v7289_v41 = vpop.f32.mrb[114].mxu1  ;;  %v7948_v2 = vcombine.high %v7947_v35, %v7947_v35 }
0x127c   : > { %v7243_v50 = vpop.f32.mrb[107].mxu0  ;;  %v7290_v24 = vpop.f32.mrb[115].mxu1 }
0x127d   : > { %v7931_v11 = vadd.f32 %v7929_v12, %v7913_v39 }
0x127f   : > { %v7950_v26 = vadd.f32 %v7948_v2, %v7931_v11 }
0x1289   : > { %v7326_v28 = vpop.f32.mrb[108].mxu0  ;;  %v7373_v19 = vpop.f32.mrb[116].mxu1 }
0x128a   : > { %v7327_v5 = vpop.f32.mrb[109].mxu0  ;;  %v7374_v48 = vpop.f32.mrb[117].mxu1 }
0x128b   : > { %v7328_v14 = vpop.f32.mrb[110].mxu0  ;;  %v7375_v56 = vpop.f32.mrb[118].mxu1 }
0x128c   : > { %v7952_v10 = vcombine.high %v7328_v14, %v7328_v14  ;;  %v7989_v60 = vcombine.high %v7375_v56, %v7375_v56  ;;  %v7330_v36 = vpop.f32.mrb[111].mxu0  ;;  %v7377_v57 = vpop.f32.mrb[119].mxu1 }
0x128d   : > { %v7970_v38 = vcombine.high %v7330_v36, %v7330_v36  ;;  %v8008_v58 = vcombine.high %v7377_v57, %v7377_v57 }
0x128e   : > { %v7959_v33 = vrot.slane %v7952_v10, %v13249_v42  ;;  %v7996_v22 = vrot.slane %v7989_v60, %v13249_v42 }
0x128f   : > { %v7977_v45 = vrot.slane %v7970_v38, %v13249_v42  ;;  %v8015_v16 = vrot.slane %v8008_v58, %v13249_v42 }
0x1290   : > { %v7966_v3 = vrot.slane %v7959_v33, %v13249_v42  ;;  %v8003_v47 = vrot.slane %v7996_v22, %v13249_v42 }
0x1291   : > { %v7978_v6 = vcombine.high %v7977_v45, %v7977_v45  ;;  %v8016_v15 = vcombine.high %v8015_v16, %v8015_v16  ;;  %v7334_v8 = vpop.f32.mrb[112].mxu0  ;;  %v7381_v30 = vpop.f32.mrb[120].mxu1 }
0x1292   : > { %v7968_v43 = vadd.f32 %v7966_v3, %v7950_v26  ;;  %v7335_v63 = vpop.f32.mrb[113].mxu0  ;;  %v7382_v53 = vpop.f32.mrb[121].mxu1  ;;  %v8004_v40 = vcombine.high %v8003_v47, %v8003_v47 }
0x1293   : > { %v7985_v0 = vrot.slane %v7978_v6, %v13249_v42  ;;  %v7336_v4 = vpop.f32.mrb[114].mxu0  ;;  %v7383_v32 = vpop.f32.mrb[122].mxu1  ;;  %v8023_v62 = vrot.slane %v8016_v15, %v13249_v42 }
0x1294   : > { %v7337_v20 = vpop.f32.mrb[115].mxu0  ;;  %v7384_v54 = vpop.f32.mrb[123].mxu1 }
0x1295   : > { %v7987_v44 = vadd.f32 %v7985_v0, %v7968_v43  ;;  %v8024_v7 = vcombine.high %v8023_v62, %v8023_v62 }
0x1297   : > { %v8006_v49 = vadd.f32 %v8004_v40, %v7987_v44 }
0x1299   : > { %v8026_v34 = vadd.f32 %v8024_v7, %v8006_v49 }
0x12a1   : > { %v7420_v59 = vpop.f32.mrb[116].mxu0  ;;  %v7467_v55 = vpop.f32.mrb[124].mxu1 }
0x12a2   : > { %v7421_v29 = vpop.f32.mrb[117].mxu0  ;;  %v7468_v25 = vpop.f32.mrb[125].mxu1 }
0x12a3   : > { %v7422_v51 = vpop.f32.mrb[118].mxu0  ;;  %v7469_v18 = vpop.f32.mrb[126].mxu1 }
0x12a4   : > { %v7423_v9 = vpop.f32.mrb[119].mxu0  ;;  %v7470_v31 = vpop.f32.mrb[127].mxu1 }
0x12a9   : > { %v7426_v27 = vpop.f32.mrb[120].mxu0  ;;  %v7473_v46 = vpop.f32.mrb[128].mxu1 }
0x12aa   : > { %v8027_v37 = vadd.f32 %v8026_v34, %v7426_v27  ;;  %v8053_v23 = vrot.slane %v7473_v46, %v13249_v42  ;;  %v7428_v61 = vpop.f32.mrb[121].mxu0  ;;  %v7475_v35 = vpop.f32.mrb[129].mxu1 }
0x12ab   : > { %v8035_v17 = vrot.slane %v7428_v61, %v13249_v42  ;;  %v8071_v1 = vrot.slane %v7475_v35, %v13249_v42  ;;  %v7430_v52 = vpop.f32.mrb[122].mxu0  ;;  %v7477_v13 = vpop.f32.mrb[130].mxu1 }
0x12ac   : > { %v8060_v12 = vrot.slane %v8053_v23, %v13249_v42  ;;  %v7431_v39 = vpop.f32.mrb[123].mxu0  ;;  %v7478_v21 = vpop.f32.mrb[131].mxu1 }
0x12ad   : > { %v8036_v41 = vcombine.high %v8035_v17, %v8035_v17  ;;  %v8072_v50 = vcombine.high %v8071_v1, %v8071_v1 }
0x12ae   : > { %v8061_v2 = vcombine.high %v8060_v12, %v8060_v12 }
0x12af   : > { %v8043_v24 = vrot.slane %v8036_v41, %v13249_v42  ;;  %v8079_v11 = vrot.slane %v8072_v50, %v13249_v42 }
0x12b1   : > { %v8045_v26 = vadd.f32 %v8043_v24, %v8027_v37  ;;  %v8080_v19 = vcombine.high %v8079_v11, %v8079_v11 }
0x12b3   : > { %v8063_v28 = vadd.f32 %v8061_v2, %v8045_v26 }
0x12b5   : > { %v8082_v5 = vadd.f32 %v8080_v19, %v8063_v28 }
0x12b9   : > { %v7514_v48 = vpop.f32.mrb[124].mxu0  ;;  %v7561_v14 = vpop.f32.mrb[132].mxu1 }
0x12ba   : > { %v7515_v56 = vpop.f32.mrb[125].mxu0  ;;  %v7562_v10 = vpop.f32.mrb[133].mxu1 }
0x12bb   : > { %v7516_v60 = vpop.f32.mrb[126].mxu0  ;;  %v7563_v36 = vpop.f32.mrb[134].mxu1 }
0x12bc   : > { %v7517_v57 = vpop.f32.mrb[127].mxu0  ;;  %v7564_v38 = vpop.f32.mrb[135].mxu1 }
0x12c1   : > { %v7520_v58 = vpop.f32.mrb[128].mxu0  ;;  %v7567_v33 = vpop.f32.mrb[136].mxu1 }
0x12c2   : > { %v8084_v22 = vcombine.high %v7520_v58, %v7520_v58  ;;  %v8121_v45 = vcombine.high %v7567_v33, %v7567_v33  ;;  %v7522_v16 = vpop.f32.mrb[129].mxu0  ;;  %v7569_v3 = vpop.f32.mrb[137].mxu1 }
0x12c3   : > { %v8102_v47 = vcombine.high %v7522_v16, %v7522_v16  ;;  %v8140_v6 = vcombine.high %v7569_v3, %v7569_v3  ;;  %v7524_v15 = vpop.f32.mrb[130].mxu0  ;;  %v7571_v8 = vpop.f32.mrb[138].mxu1 }
0x12c4   : > { %v8091_v30 = vrot.slane %v8084_v22, %v13249_v42  ;;  %v8128_v43 = vrot.slane %v8121_v45, %v13249_v42  ;;  %v7525_v63 = vpop.f32.mrb[131].mxu0  ;;  %v7572_v53 = vpop.f32.mrb[139].mxu1 }
0x12c5   : > { %v8109_v0 = vrot.slane %v8102_v47, %v13249_v42  ;;  %v8147_v4 = vrot.slane %v8140_v6, %v13249_v42 }
0x12c6   : > { %v8098_v32 = vrot.slane %v8091_v30, %v13249_v42  ;;  %v8135_v62 = vrot.slane %v8128_v43, %v13249_v42 }
0x12c7   : > { %v8110_v20 = vcombine.high %v8109_v0, %v8109_v0  ;;  %v8148_v54 = vcombine.high %v8147_v4, %v8147_v4 }
0x12c8   : > { %v8100_v40 = vadd.f32 %v8098_v32, %v8082_v5  ;;  %v8136_v7 = vcombine.high %v8135_v62, %v8135_v62 }
0x12c9   : > { %v8117_v44 = vrot.slane %v8110_v20, %v13249_v42  ;;  %v8155_v49 = vrot.slane %v8148_v54, %v13249_v42 }
0x12cb   : > { %v8119_v34 = vadd.f32 %v8117_v44, %v8100_v40  ;;  %v8156_v55 = vcombine.high %v8155_v49, %v8155_v49 }
0x12cd   : > { %v8138_v59 = vadd.f32 %v8136_v7, %v8119_v34 }
0x12cf   : > { %v8158_v29 = vadd.f32 %v8156_v55, %v8138_v59 }
0x12d1   : > { %v7608_v25 = vpop.f32.mrb[132].mxu0  ;;  %v7655_v51 = vpop.f32.mrb[140].mxu1 }
0x12d2   : > { %v7609_v18 = vpop.f32.mrb[133].mxu0  ;;  %v7656_v9 = vpop.f32.mrb[141].mxu1 }
0x12d3   : > { %v7610_v31 = vpop.f32.mrb[134].mxu0  ;;  %v7657_v27 = vpop.f32.mrb[142].mxu1 }
0x12d4   : > { %v7611_v46 = vpop.f32.mrb[135].mxu0  ;;  %v7658_v37 = vpop.f32.mrb[143].mxu1 }
0x12d9   : > { %v7614_v23 = vpop.f32.mrb[136].mxu0  ;;  %v7661_v61 = vpop.f32.mrb[144].mxu1 }
0x12da   : > { %v7615_v35 = vpop.f32.mrb[137].mxu0  ;;  %v7662_v17 = vpop.f32.mrb[145].mxu1 }
0x12db   : > { %v7616_v1 = vpop.f32.mrb[138].mxu0  ;;  %v7663_v52 = vpop.f32.mrb[146].mxu1 }
0x12dc   : > { %v8159_v13 = vadd.f32 %v8158_v29, %v7616_v1  ;;  %v8185_v12 = vrot.slane %v7663_v52, %v13249_v42  ;;  %v7618_v39 = vpop.f32.mrb[139].mxu0  ;;  %v7665_v21 = vpop.f32.mrb[147].mxu1 }
0x12dd   : > { %v8167_v41 = vrot.slane %v7618_v39, %v13249_v42  ;;  %v8203_v50 = vrot.slane %v7665_v21, %v13249_v42 }
0x12de   : > { %v8192_v24 = vrot.slane %v8185_v12, %v13249_v42 }
0x12df   : > { %v8168_v11 = vcombine.high %v8167_v41, %v8167_v41  ;;  %v8204_v2 = vcombine.high %v8203_v50, %v8203_v50 }
0x12e0   : > { %v8193_v19 = vcombine.high %v8192_v24, %v8192_v24 }
0x12e1   : > { %v8175_v26 = vrot.slane %v8168_v11, %v13249_v42  ;;  %v8211_v28 = vrot.slane %v8204_v2, %v13249_v42 }
0x12e3   : > { %v8177_v5 = vadd.f32 %v8175_v26, %v8159_v13  ;;  %v8212_v14 = vcombine.high %v8211_v28, %v8211_v28 }
0x12e5   : > { %v8195_v48 = vadd.f32 %v8193_v19, %v8177_v5 }
0x12e7   : > { %v8214_v56 = vadd.f32 %v8212_v14, %v8195_v48 }
0x12e9   : > { %v7702_v10 = vpop.f32.mrb[140].mxu0  ;;  %v7749_v60 = vpop.f32.mrb[148].mxu1 }
0x12ea   : > { %v7703_v36 = vpop.f32.mrb[141].mxu0  ;;  %v7750_v57 = vpop.f32.mrb[149].mxu1 }
0x12eb   : > { %v7704_v38 = vpop.f32.mrb[142].mxu0  ;;  %v7751_v58 = vpop.f32.mrb[150].mxu1 }
0x12ec   : > { %v7705_v33 = vpop.f32.mrb[143].mxu0  ;;  %v7752_v22 = vpop.f32.mrb[151].mxu1 }
0x12f1   : > { %v7708_v45 = vpop.f32.mrb[144].mxu0  ;;  %v7755_v16 = vpop.f32.mrb[152].mxu1 }
0x12f2   : > { %v7709_v3 = vpop.f32.mrb[145].mxu0  ;;  %v7756_v47 = vpop.f32.mrb[153].mxu1 }
0x12f3   : > { %v7710_v6 = vpop.f32.mrb[146].mxu0  ;;  %v7757_v15 = vpop.f32.mrb[154].mxu1 }
0x12f4   : > { %v8216_v8 = vcombine.high %v7710_v6, %v7710_v6  ;;  %v8253_v30 = vcombine.high %v7757_v15, %v7757_v15  ;;  %v7712_v43 = vpop.f32.mrb[147].mxu0  ;;  %v7759_v63 = vpop.f32.mrb[155].mxu1 }
0x12f5   : > { %v8234_v53 = vcombine.high %v7712_v43, %v7712_v43  ;;  %v8272_v0 = vcombine.high %v7759_v63, %v7759_v63 }
0x12f6   : > { %v8223_v4 = vrot.slane %v8216_v8, %v13249_v42  ;;  %v8260_v32 = vrot.slane %v8253_v30, %v13249_v42 }
0x12f7   : > { %v8241_v62 = vrot.slane %v8234_v53, %v13249_v42  ;;  %v8279_v20 = vrot.slane %v8272_v0, %v13249_v42 }
0x12f8   : > { %v8230_v54 = vrot.slane %v8223_v4, %v13249_v42  ;;  %v8267_v40 = vrot.slane %v8260_v32, %v13249_v42 }
0x12f9   : > { %v8242_v44 = vcombine.high %v8241_v62, %v8241_v62  ;;  %v8280_v49 = vcombine.high %v8279_v20, %v8279_v20 }
0x12fa   : > { %v8232_v7 = vadd.f32 %v8230_v54, %v8214_v56  ;;  %v8268_v55 = vcombine.high %v8267_v40, %v8267_v40 }
0x12fb   : > { %v8249_v34 = vrot.slane %v8242_v44, %v13249_v42  ;;  %v8287_v59 = vrot.slane %v8280_v49, %v13249_v42 }
0x12fd   : > { %v8251_v29 = vadd.f32 %v8249_v34, %v8232_v7  ;;  %v8288_v25 = vcombine.high %v8287_v59, %v8287_v59 }
0x12ff   : > { %v8270_v51 = vadd.f32 %v8268_v55, %v8251_v29 }
0x1301   : > { %v8290_v18 = vadd.f32 %v8288_v25, %v8270_v51 }
0x1303   : > { %8291 = vst [vmem:[%s551_s19] sm:$0x1] %v8290_v18 }
0x1304   : > { %10457 = shalt.err (!%p10454_p4)
}
0x1305   : > { %s10458_s4 = scalar_lea.hbm %s13315_s2, 16  ;;  %s10462_s19 = scalar_lea.hbm %s13374_s17, 32 }
0x1306   : > { %p10459_p7 = scmp.ne.s32.totalorder %s13315_s2, %s10458_s4  ;;  %p10463_p10 = scmp.lt.u32.totalorder %s13315_s2, %s13374_s17 }
0x1307   : > { %p10464_p11 = scmp.lt.u32.totalorder %s10462_s19, %s10458_s4  ;;  %p10466_p13 = scmp.lt.u32.totalorder %s10458_s4, %s13315_s2 }
0x1308   : > { %p10460_p8 = pnand %p10459_p7, %p10644_p5 }
0x1309   : > { %p10465_p12 = por %p10464_p11, %p10463_p10 }
0x130a   : > { %p10461_p9 = pneg %p10460_p8 }
0x130b   : > { %p10467_p0 = por %p10466_p13, %p10465_p12 }
0x130d   : > { %p10468_p1 = pnand %p10467_p0, %p10461_p9 }
0x130f   : > { %10471 = shalt.err (!%p10468_p1)
}
0x1310   : > { %9976 = dma.vmem_to_hbm [thread:$0]  (%p10644_p5), %s13317_s22, 16, %s13315_s2, %s8293_s0  }
0x1311 PF: > { %p9982_p2 = scmp.ge.s32.totalorder %s10506_s27, 2  ;;  %s8317_s29 = sand.u32 1, %s10494_s24  }
0x1312   : > { %s8318_s28 = scalar_lea.sflag [#allocation3], %s8317_s29 }
0x1313   : > { %p9979_p3 = pnand %p9982_p2, %p10648_p6 }
0x1315   : > { %10489 = dma.done.wait (!%p9979_p3), %s8318_s28, 16  }
0x1316   : > { %10491 = vsyncadd (!%p9979_p3), %s8318_s28, 4294967280  ;;  %s13465_s27 = sld [smem:[#allocation6_spill]]  ;;  %s13466_s30 = sld [smem:[#allocation5_spill]] }
0x1317   : > { %s13467_s26 = sld [smem:[#allocation7_spill]]  ;;  %s13468_s24 = smov %s10498_s25 }
0x131c   : > { %p27_p4 = scmp.ge.s32.totalorder %s13465_s27, 4   ;;  %s13469_s25 = smov %s13466_s30 }
0x131e   :  { %29 = sbr.rel (!%p27_p4) target bundleno = 9 (0x9), region = 138 }
0x1325   :  { %8322 = vsyncpa [#allocation3], 1 }
0x1326   :  { %8324 = vsyncpa [#allocation3 + $0x1], 1 }

</bundles_post_ra>
